<compile_context>
chip_gen: v7x
topology: tpu7x:2x2x1
jax: 0.10.0
libtpu: 0.0.40
codegen_flags: <defaults>
</compile_context>

<pallas_src>
import functools

import jax
import jax.numpy as jnp
from jax.experimental import pallas as pl
from jax.experimental.pallas import tpu as pltpu


TB = 32  # max batch tile per grid step (effective tile is a multiple of 16)


# ----------------------------------------------------------------------------
# Fused LeNet kernel: one grid step = tb images, everything stays in VMEM.
# ----------------------------------------------------------------------------
def _lenet_kernel(x_ref, w1_ref, b1_ref, p1c_ref, w2_ref, b2_ref, p2c_ref,
                  w3_ref, b3_ref, w4_ref, b4_ref, w5_ref, b5_ref,
                  o_ref, *, tb):
    f32 = jnp.float32
    bf16 = jnp.bfloat16

    def banded_conv(lhs_of, w_ref, b_ref, nrows, ncols):
        # relu(sum_i lhs_i @ w[i] + bias); two accumulator chains so MXU
        # pushes can overlap result pops on v5e/v6e (harmless elsewhere).
        acc = [jnp.broadcast_to(b_ref[...], (nrows, ncols)).astype(f32),
               jnp.zeros((nrows, ncols), f32)]
        for i in range(5):
            acc[i % 2] = acc[i % 2] + jnp.dot(
                lhs_of(i), w_ref[i], preferred_element_type=f32)
        return jnp.maximum(acc[0] + acc[1], 0.0)

    def pool(h, hh, ncols, sel_ref):
        # Rows: pure VPU max over the two tb-row blocks of each pooled row
        # (tb is a multiple of 16, so all slices stay tile-aligned).
        hr = h.reshape(hh, 2 * tb, ncols)
        rmax = jnp.maximum(hr[:, :tb, :], hr[:, tb:, :]).reshape(hh * tb, ncols)
        # Cols: exact 0/1 selector matmuls (small, independent of tb).
        rb = rmax.astype(bf16)
        return jnp.maximum(
            jnp.dot(rb, sel_ref[0], preferred_element_type=f32),
            jnp.dot(rb, sel_ref[1], preferred_element_type=f32))

    # ---- conv1 (1->6, 5x5, pad=2) + ReLU: (32*tb, 32) -> (28*tb, 168) ------
    h1 = banded_conv(lambda i: x_ref[pl.ds(i * tb, 28 * tb), :],
                     w1_ref, b1_ref, 28 * tb, 28 * 6)
    # ---- maxpool 2x2: -> (14*tb, 84) ---------------------------------------
    p1 = pool(h1, 14, 28 * 6, p1c_ref).astype(bf16)

    # ---- conv2 (6->16, 5x5, valid) + ReLU: -> (10*tb, 160) -----------------
    h2 = banded_conv(lambda i: p1[i * tb:i * tb + 10 * tb, :],
                     w2_ref, b2_ref, 10 * tb, 10 * 16)
    # ---- maxpool 2x2: -> (5*tb, 80) ----------------------------------------
    p2 = pool(h2, 5, 10 * 16, p2c_ref).astype(bf16)

    # ---- fc1 (PyTorch (C,H,W) flatten order folded into w3) ---------------
    acc = jnp.broadcast_to(b3_ref[...], (tb, 120)).astype(f32)
    for y in range(5):
        acc = acc + jnp.dot(p2[y * tb:(y + 1) * tb, :], w3_ref[y],
                            preferred_element_type=f32)

    # ---- fc2, fc3 (no activations, matching the module) -------------------
    h4 = jnp.dot(acc, w4_ref[...], preferred_element_type=f32) + b4_ref[...]
    h5 = jnp.dot(h4, w5_ref[...], preferred_element_type=f32) + b5_ref[...]
    o_ref[...] = h5.astype(o_ref.dtype)


# ----------------------------------------------------------------------------
# Parameters (PyTorch layout) and one-time preprocessing.
# ----------------------------------------------------------------------------
def init_params(key):
    ks = jax.random.split(key, 10)
    f32 = jnp.float32
    return {
        "conv1_w": 0.1 * jax.random.normal(ks[0], (6, 1, 5, 5), f32),
        "conv1_b": 0.1 * jax.random.normal(ks[1], (6,), f32),
        "conv2_w": 0.1 * jax.random.normal(ks[2], (16, 6, 5, 5), f32),
        "conv2_b": 0.1 * jax.random.normal(ks[3], (16,), f32),
        "fc1_w": 0.1 * jax.random.normal(ks[4], (120, 400), f32),
        "fc1_b": 0.1 * jax.random.normal(ks[5], (120,), f32),
        "fc2_w": 0.1 * jax.random.normal(ks[6], (84, 120), f32),
        "fc2_b": 0.1 * jax.random.normal(ks[7], (84,), f32),
        "fc3_w": 0.1 * jax.random.normal(ks[8], (10, 84), f32),
        "fc3_b": 0.1 * jax.random.normal(ks[9], (10,), f32),
    }


def prepare_params(params):
    """One-time weight preprocessing: banded conv weights, pooling column
    selectors, folded flatten permutation, bf16 casts.  Independent of the
    batch-tile size (runs once, not per forward)."""
    f32 = jnp.float32
    bf16 = jnp.bfloat16

    # conv1 -> 5 banded rhs matrices (5, 32, 168):
    #   rhs1[i, v, x*6 + c] = conv1_w[c, 0, i, v - x]  if 0 <= v - x <= 4
    w1t = jnp.transpose(params["conv1_w"].astype(f32)[:, 0], (1, 2, 0))  # (5,5,6) [i,j,c]
    v = jnp.arange(32)[:, None]          # padded input column
    x = jnp.arange(28)[None, :]          # output column
    j1 = v - x
    band1 = jnp.where(((j1 >= 0) & (j1 <= 4))[None, :, :, None],
                      w1t[:, jnp.clip(j1, 0, 4), :], 0.0)      # (5, 32, 28, 6)
    w1band = band1.reshape(5, 32, 168)

    # conv2 -> 5 banded rhs matrices (5, 84, 160):
    #   rhs2[i, x1*6 + c, x2*16 + o] = conv2_w[o, c, i, x1 - x2] if 0 <= . <= 4
    w2t = jnp.transpose(params["conv2_w"].astype(f32), (2, 3, 1, 0))  # (5,5,6,16) [i,j,c,o]
    x1 = jnp.arange(14)[:, None]
    x2 = jnp.arange(10)[None, :]
    j2 = x1 - x2
    band2 = jnp.where(((j2 >= 0) & (j2 <= 4))[None, :, :, None, None],
                      w2t[:, jnp.clip(j2, 0, 4), :, :], 0.0)   # (5, 14, 10, 6, 16)
    w2band = jnp.transpose(band2, (0, 1, 3, 2, 4)).reshape(5, 84, 160)

    def col_sel(wout, win, nchan):
        # (2, win*nchan, wout*nchan): picks col (2*wp + d)*nchan + c
        wp, w = jnp.arange(wout), jnp.arange(win)
        eye_c = jnp.eye(nchan, dtype=f32)
        return jnp.stack(
            [jnp.kron((w[:, None] == 2 * wp[None, :] + d).astype(f32), eye_c)
             for d in range(2)], axis=0)

    # fc1 with the PyTorch flatten permutation folded in:
    # w3p[y, x*16+c, n] = fc1_w[n, c*25 + y*5 + x]
    w3 = params["fc1_w"].astype(f32).reshape(120, 16, 5, 5)    # (n, c, y, x)
    w3p = jnp.transpose(w3, (2, 3, 1, 0)).reshape(5, 80, 120)

    return {
        "w1band": w1band.astype(bf16),
        "b1row": jnp.tile(params["conv1_b"].astype(f32), 28).reshape(1, 168),
        "p1c": col_sel(14, 28, 6).astype(bf16),
        "w2band": w2band.astype(bf16),
        "b2row": jnp.tile(params["conv2_b"].astype(f32), 10).reshape(1, 160),
        "p2c": col_sel(5, 10, 16).astype(bf16),
        "w3p": w3p.astype(bf16),
        "b3row": params["fc1_b"].astype(f32).reshape(1, 120),
        "w4": jnp.transpose(params["fc2_w"].astype(f32)),
        "b4row": params["fc2_b"].astype(f32).reshape(1, 84),
        "w5": jnp.transpose(params["fc3_w"].astype(f32)),
        "b5row": params["fc3_b"].astype(f32).reshape(1, 10),
    }


# ----------------------------------------------------------------------------
# Forward: single fused pallas_call, grid over batch tiles.
# ----------------------------------------------------------------------------
@functools.partial(jax.jit, static_argnames=("tb",))
def lenet_forward(prep, x_nchw, tb=TB):
    x = x_nchw.astype(jnp.float32)
    if x.ndim == 4:
        assert x.shape[1] == 1, "LeNet expects a single input channel"
        x = x[:, 0]
    assert x.ndim == 3 and x.shape[1:] == (28, 28), \
        "LeNet's view(-1, 400) requires 28x28 single-channel inputs"
    n = x.shape[0]

    # Effective batch tile: multiple of 16 (bf16 sublane tile), capped at `tb`
    # and at ~half the rounded batch so ntiles >= 2 when the batch allows it
    # (lets dimension_semantics=("parallel",) shard across v7x's two TCs).
    half = -(-n // 2)
    tbe = min(tb, max(16, 16 * (-(-half // 16))))
    ntiles = -(-n // tbe)
    npad = ntiles * tbe
    if npad != n:
        x = jnp.pad(x, ((0, npad - n), (0, 0), (0, 0)))

    # Zero-pad for conv1 (padding=2) and pack rows tile-major, y-major:
    # packed row index = tile*32*tbe + y*tbe + b_local.  Shipped as bf16
    # (the matmul operand dtype) to halve the packed input's HBM traffic.
    xp = jnp.pad(x, ((0, 0), (2, 2), (2, 2))).astype(jnp.bfloat16)   # (npad,32,32)
    xpk = jnp.transpose(xp.reshape(ntiles, tbe, 32, 32),
                        (0, 2, 1, 3)).reshape(npad * 32, 32)

    def c2(i):
        return (0, 0)

    def c3(i):
        return (0, 0, 0)

    in_specs = [
        pl.BlockSpec((32 * tbe, 32), lambda i: (i, 0)),    # packed input tile
        pl.BlockSpec((5, 32, 168), c3),                    # conv1 banded weights
        pl.BlockSpec((1, 168), c2),                        # conv1 bias row
        pl.BlockSpec((2, 168, 84), c3),                    # pool1 column selectors
        pl.BlockSpec((5, 84, 160), c3),                    # conv2 banded weights
        pl.BlockSpec((1, 160), c2),                        # conv2 bias row
        pl.BlockSpec((2, 160, 80), c3),                    # pool2 column selectors
        pl.BlockSpec((5, 80, 120), c3),                    # fc1 (flatten folded)
        pl.BlockSpec((1, 120), c2),                        # fc1 bias
        pl.BlockSpec((120, 84), c2),                       # fc2 weight
        pl.BlockSpec((1, 84), c2),                         # fc2 bias
        pl.BlockSpec((84, 10), c2),                        # fc3 weight
        pl.BlockSpec((1, 10), c2),                         # fc3 bias
    ]

    # Advisory cost hint for XLA's scheduler around the custom call.
    flops_per_img = 2 * (28 * 32 * 168 * 5 + 2 * 14 * 168 * 84
                         + 10 * 84 * 160 * 5 + 2 * 5 * 160 * 80
                         + 5 * 80 * 120 + 120 * 84 + 84 * 10)
    weight_bytes = sum(int(v.size) * jnp.dtype(v.dtype).itemsize
                       for v in prep.values())
    cost = pl.CostEstimate(
        flops=npad * flops_per_img, transcendentals=0,
        bytes_accessed=npad * (32 * 32 * 2 + 10 * 4) + weight_bytes)

    out = pl.pallas_call(
        functools.partial(_lenet_kernel, tb=tbe),
        out_shape=jax.ShapeDtypeStruct((npad, 10), jnp.float32),
        grid=(ntiles,),
        in_specs=in_specs,
        out_specs=pl.BlockSpec((tbe, 10), lambda i: (i, 0)),
        compiler_params=pltpu.CompilerParams(
            dimension_semantics=("parallel",)),
        cost_estimate=cost,
    )(xpk, prep["w1band"], prep["b1row"], prep["p1c"],
      prep["w2band"], prep["b2row"], prep["p2c"],
      prep["w3p"], prep["b3row"], prep["w4"], prep["b4row"],
      prep["w5"], prep["b5row"])
    return out[:n]


# ----------------------------------------------------------------------------
# Pure-JAX reference (for the built-in correctness check).
# ----------------------------------------------------------------------------
def _lenet_reference(params, x_nchw):
    hp = jax.lax.Precision.HIGHEST
    x = x_nchw.astype(jnp.float32)
    h = jax.lax.conv_general_dilated(x, params["conv1_w"], (1, 1), ((2, 2), (2, 2)),
                                     dimension_numbers=("NCHW", "OIHW", "NCHW"),
                                     precision=hp)
    h = jnp.maximum(h + params["conv1_b"][None, :, None, None], 0.0)
    h = jax.lax.reduce_window(h, -jnp.inf, jax.lax.max,
                              (1, 1, 2, 2), (1, 1, 2, 2), "VALID")
    h = jax.lax.conv_general_dilated(h, params["conv2_w"], (1, 1), ((0, 0), (0, 0)),
                                     dimension_numbers=("NCHW", "OIHW", "NCHW"),
                                     precision=hp)
    h = jnp.maximum(h + params["conv2_b"][None, :, None, None], 0.0)
    h = jax.lax.reduce_window(h, -jnp.inf, jax.lax.max,
                              (1, 1, 2, 2), (1, 1, 2, 2), "VALID")
    h = h.reshape(h.shape[0], -1)                         # PyTorch view(-1, 400)
    h = jnp.dot(h, params["fc1_w"].T, precision=hp) + params["fc1_b"]
    h = jnp.dot(h, params["fc2_w"].T, precision=hp) + params["fc2_b"]
    h = jnp.dot(h, params["fc3_w"].T, precision=hp) + params["fc3_b"]
    return h


if __name__ == "__main__":
    key = jax.random.PRNGKey(0)
    k_param, k_x = jax.random.split(key)
    params = init_params(k_param)
    prep = prepare_params(params)

    # LeNet's view(-1, 16*5*5) forces 28x28 single-channel input.
    x = jax.random.normal(k_x, (2, 1, 28, 28), jnp.float32)

    out = jax.block_until_ready(lenet_forward(prep, x, tb=TB))
    assert out.shape == (2, 10) and out.dtype == jnp.float32

    ref = jax.block_until_ready(_lenet_reference(params, x))
    max_err = float(jnp.max(jnp.abs(out - ref)))
    assert jnp.allclose(out, ref, rtol=5e-2, atol=5e-2), max_err
    print("KERNEL_OK")
</pallas_src>

<mosaic_0001>
module attributes {stable_mosaic.version = 11 : i64} {
  func.func @_lenet_kernel(%arg0: i32, %arg1: memref<512x32xbf16, #tpu.memory_space<vmem>>, %arg2: memref<5x32x168xbf16, #tpu.memory_space<vmem>>, %arg3: memref<1x168xf32, #tpu.memory_space<vmem>>, %arg4: memref<2x168x84xbf16, #tpu.memory_space<vmem>>, %arg5: memref<5x84x160xbf16, #tpu.memory_space<vmem>>, %arg6: memref<1x160xf32, #tpu.memory_space<vmem>>, %arg7: memref<2x160x80xbf16, #tpu.memory_space<vmem>>, %arg8: memref<5x80x120xbf16, #tpu.memory_space<vmem>>, %arg9: memref<1x120xf32, #tpu.memory_space<vmem>>, %arg10: memref<120x84xf32, #tpu.memory_space<vmem>>, %arg11: memref<1x84xf32, #tpu.memory_space<vmem>>, %arg12: memref<84x10xf32, #tpu.memory_space<vmem>>, %arg13: memref<1x10xf32, #tpu.memory_space<vmem>>, %arg14: memref<16x10xf32, #tpu.memory_space<vmem>>) attributes {dimension_semantics = [#tpu.dimension_semantics<parallel>], iteration_bounds = array<i64: 1>, scalar_prefetch = 0 : i64, scratch_operands = 0 : i64, tpu.core_type = #tpu.core_type<tc>, window_params = [{transform_indices = @transform_0, window_bounds = array<i64: 512, 32>}, {pipeline_mode = #tpu.pipeline_mode<synchronous>, transform_indices = @transform_1, window_bounds = array<i64: 5, 32, 168>}, {pipeline_mode = #tpu.pipeline_mode<synchronous>, transform_indices = @transform_2, window_bounds = array<i64: 1, 168>}, {pipeline_mode = #tpu.pipeline_mode<synchronous>, transform_indices = @transform_3, window_bounds = array<i64: 2, 168, 84>}, {pipeline_mode = #tpu.pipeline_mode<synchronous>, transform_indices = @transform_4, window_bounds = array<i64: 5, 84, 160>}, {pipeline_mode = #tpu.pipeline_mode<synchronous>, transform_indices = @transform_5, window_bounds = array<i64: 1, 160>}, {pipeline_mode = #tpu.pipeline_mode<synchronous>, transform_indices = @transform_6, window_bounds = array<i64: 2, 160, 80>}, {pipeline_mode = #tpu.pipeline_mode<synchronous>, transform_indices = @transform_7, window_bounds = array<i64: 5, 80, 120>}, {pipeline_mode = #tpu.pipeline_mode<synchronous>, transform_indices = @transform_8, window_bounds = array<i64: 1, 120>}, {pipeline_mode = #tpu.pipeline_mode<synchronous>, transform_indices = @transform_9, window_bounds = array<i64: 120, 84>}, {pipeline_mode = #tpu.pipeline_mode<synchronous>, transform_indices = @transform_10, window_bounds = array<i64: 1, 84>}, {pipeline_mode = #tpu.pipeline_mode<synchronous>, transform_indices = @transform_11, window_bounds = array<i64: 84, 10>}, {pipeline_mode = #tpu.pipeline_mode<synchronous>, transform_indices = @transform_12, window_bounds = array<i64: 1, 10>}, {transform_indices = @transform_13, window_bounds = array<i64: 16, 10>}]} {
    %c0 = arith.constant 0 : index
    %c0_0 = arith.constant 0 : index
    %0 = vector.load %arg3[%c0, %c0_0] : memref<1x168xf32, #tpu.memory_space<vmem>>, vector<1x168xf32>
    %1 = vector.shape_cast %0 : vector<1x168xf32> to vector<1x168xf32>
    %2 = vector.broadcast %1 : vector<1x168xf32> to vector<448x168xf32>
    %cst = arith.constant 0.000000e+00 : f32
    %3 = vector.broadcast %cst : f32 to vector<448x168xf32>
    %c0_1 = arith.constant 0 : index
    %c0_2 = arith.constant 0 : index
    %4 = vector.load %arg1[%c0_1, %c0_2] : memref<512x32xbf16, #tpu.memory_space<vmem>>, vector<448x32xbf16>
    %c0_3 = arith.constant 0 : index
    %c0_4 = arith.constant 0 : index
    %c0_5 = arith.constant 0 : index
    %5 = vector.load %arg2[%c0_3, %c0_4, %c0_5] : memref<5x32x168xbf16, #tpu.memory_space<vmem>>, vector<1x32x168xbf16>
    %6 = vector.shape_cast %5 : vector<1x32x168xbf16> to vector<32x168xbf16>
    %cst_6 = arith.constant dense<0.000000e+00> : vector<448x168xf32>
    %7 = tpu.matmul %4, %6, %cst_6 {dimension_numbers = #tpu.dot_dimension_numbers<[1], [0], [0], [1], [0, 0, 1, 1], [], []>} : vector<448x32xbf16>, vector<32x168xbf16>, vector<448x168xf32> -> vector<448x168xf32>
    %8 = arith.addf %2, %7 : vector<448x168xf32>
    %c16 = arith.constant 16 : index
    %c0_7 = arith.constant 0 : index
    %9 = vector.load %arg1[%c16, %c0_7] : memref<512x32xbf16, #tpu.memory_space<vmem>>, vector<448x32xbf16>
    %c1 = arith.constant 1 : index
    %c0_8 = arith.constant 0 : index
    %c0_9 = arith.constant 0 : index
    %10 = vector.load %arg2[%c1, %c0_8, %c0_9] : memref<5x32x168xbf16, #tpu.memory_space<vmem>>, vector<1x32x168xbf16>
    %11 = vector.shape_cast %10 : vector<1x32x168xbf16> to vector<32x168xbf16>
    %cst_10 = arith.constant dense<0.000000e+00> : vector<448x168xf32>
    %12 = tpu.matmul %9, %11, %cst_10 {dimension_numbers = #tpu.dot_dimension_numbers<[1], [0], [0], [1], [0, 0, 1, 1], [], []>} : vector<448x32xbf16>, vector<32x168xbf16>, vector<448x168xf32> -> vector<448x168xf32>
    %13 = arith.addf %3, %12 : vector<448x168xf32>
    %c32 = arith.constant 32 : index
    %c0_11 = arith.constant 0 : index
    %14 = vector.load %arg1[%c32, %c0_11] : memref<512x32xbf16, #tpu.memory_space<vmem>>, vector<448x32xbf16>
    %c2 = arith.constant 2 : index
    %c0_12 = arith.constant 0 : index
    %c0_13 = arith.constant 0 : index
    %15 = vector.load %arg2[%c2, %c0_12, %c0_13] : memref<5x32x168xbf16, #tpu.memory_space<vmem>>, vector<1x32x168xbf16>
    %16 = vector.shape_cast %15 : vector<1x32x168xbf16> to vector<32x168xbf16>
    %cst_14 = arith.constant dense<0.000000e+00> : vector<448x168xf32>
    %17 = tpu.matmul %14, %16, %cst_14 {dimension_numbers = #tpu.dot_dimension_numbers<[1], [0], [0], [1], [0, 0, 1, 1], [], []>} : vector<448x32xbf16>, vector<32x168xbf16>, vector<448x168xf32> -> vector<448x168xf32>
    %18 = arith.addf %8, %17 : vector<448x168xf32>
    %c48 = arith.constant 48 : index
    %c0_15 = arith.constant 0 : index
    %19 = vector.load %arg1[%c48, %c0_15] : memref<512x32xbf16, #tpu.memory_space<vmem>>, vector<448x32xbf16>
    %c3 = arith.constant 3 : index
    %c0_16 = arith.constant 0 : index
    %c0_17 = arith.constant 0 : index
    %20 = vector.load %arg2[%c3, %c0_16, %c0_17] : memref<5x32x168xbf16, #tpu.memory_space<vmem>>, vector<1x32x168xbf16>
    %21 = vector.shape_cast %20 : vector<1x32x168xbf16> to vector<32x168xbf16>
    %cst_18 = arith.constant dense<0.000000e+00> : vector<448x168xf32>
    %22 = tpu.matmul %19, %21, %cst_18 {dimension_numbers = #tpu.dot_dimension_numbers<[1], [0], [0], [1], [0, 0, 1, 1], [], []>} : vector<448x32xbf16>, vector<32x168xbf16>, vector<448x168xf32> -> vector<448x168xf32>
    %23 = arith.addf %13, %22 : vector<448x168xf32>
    %c64 = arith.constant 64 : index
    %c0_19 = arith.constant 0 : index
    %24 = vector.load %arg1[%c64, %c0_19] : memref<512x32xbf16, #tpu.memory_space<vmem>>, vector<448x32xbf16>
    %c4 = arith.constant 4 : index
    %c0_20 = arith.constant 0 : index
    %c0_21 = arith.constant 0 : index
    %25 = vector.load %arg2[%c4, %c0_20, %c0_21] : memref<5x32x168xbf16, #tpu.memory_space<vmem>>, vector<1x32x168xbf16>
    %26 = vector.shape_cast %25 : vector<1x32x168xbf16> to vector<32x168xbf16>
    %cst_22 = arith.constant dense<0.000000e+00> : vector<448x168xf32>
    %27 = tpu.matmul %24, %26, %cst_22 {dimension_numbers = #tpu.dot_dimension_numbers<[1], [0], [0], [1], [0, 0, 1, 1], [], []>} : vector<448x32xbf16>, vector<32x168xbf16>, vector<448x168xf32> -> vector<448x168xf32>
    %28 = arith.addf %18, %27 : vector<448x168xf32>
    %29 = arith.addf %28, %23 : vector<448x168xf32>
    %cst_23 = arith.constant 0.000000e+00 : f32
    %30 = vector.broadcast %cst_23 : f32 to vector<448x168xf32>
    %31 = arith.maximumf %29, %30 : vector<448x168xf32>
    %32 = vector.shape_cast %31 : vector<448x168xf32> to vector<14x32x168xf32>
    %33 = vector.extract_strided_slice %32 {offsets = [0, 0, 0], sizes = [14, 16, 168], strides = [1, 1, 1]} : vector<14x32x168xf32> to vector<14x16x168xf32>
    %34 = vector.extract_strided_slice %32 {offsets = [0, 16, 0], sizes = [14, 16, 168], strides = [1, 1, 1]} : vector<14x32x168xf32> to vector<14x16x168xf32>
    %35 = arith.maximumf %33, %34 : vector<14x16x168xf32>
    %36 = vector.shape_cast %35 : vector<14x16x168xf32> to vector<224x168xf32>
    %37 = arith.truncf %36 : vector<224x168xf32> to vector<224x168xbf16>
    %c0_24 = arith.constant 0 : index
    %c0_25 = arith.constant 0 : index
    %c0_26 = arith.constant 0 : index
    %38 = vector.load %arg4[%c0_24, %c0_25, %c0_26] : memref<2x168x84xbf16, #tpu.memory_space<vmem>>, vector<1x168x84xbf16>
    %39 = vector.shape_cast %38 : vector<1x168x84xbf16> to vector<168x84xbf16>
    %cst_27 = arith.constant dense<0.000000e+00> : vector<224x84xf32>
    %40 = tpu.matmul %37, %39, %cst_27 {dimension_numbers = #tpu.dot_dimension_numbers<[1], [0], [0], [1], [0, 0, 1, 1], [], []>} : vector<224x168xbf16>, vector<168x84xbf16>, vector<224x84xf32> -> vector<224x84xf32>
    %c1_28 = arith.constant 1 : index
    %c0_29 = arith.constant 0 : index
    %c0_30 = arith.constant 0 : index
    %41 = vector.load %arg4[%c1_28, %c0_29, %c0_30] : memref<2x168x84xbf16, #tpu.memory_space<vmem>>, vector<1x168x84xbf16>
    %42 = vector.shape_cast %41 : vector<1x168x84xbf16> to vector<168x84xbf16>
    %cst_31 = arith.constant dense<0.000000e+00> : vector<224x84xf32>
    %43 = tpu.matmul %37, %42, %cst_31 {dimension_numbers = #tpu.dot_dimension_numbers<[1], [0], [0], [1], [0, 0, 1, 1], [], []>} : vector<224x168xbf16>, vector<168x84xbf16>, vector<224x84xf32> -> vector<224x84xf32>
    %44 = arith.maximumf %40, %43 : vector<224x84xf32>
    %45 = arith.truncf %44 : vector<224x84xf32> to vector<224x84xbf16>
    %c0_32 = arith.constant 0 : index
    %c0_33 = arith.constant 0 : index
    %46 = vector.load %arg6[%c0_32, %c0_33] : memref<1x160xf32, #tpu.memory_space<vmem>>, vector<1x160xf32>
    %47 = vector.shape_cast %46 : vector<1x160xf32> to vector<1x160xf32>
    %48 = vector.broadcast %47 : vector<1x160xf32> to vector<160x160xf32>
    %cst_34 = arith.constant 0.000000e+00 : f32
    %49 = vector.broadcast %cst_34 : f32 to vector<160x160xf32>
    %50 = vector.extract_strided_slice %45 {offsets = [0, 0], sizes = [160, 84], strides = [1, 1]} : vector<224x84xbf16> to vector<160x84xbf16>
    %c0_35 = arith.constant 0 : index
    %c0_36 = arith.constant 0 : index
    %c0_37 = arith.constant 0 : index
    %51 = vector.load %arg5[%c0_35, %c0_36, %c0_37] : memref<5x84x160xbf16, #tpu.memory_space<vmem>>, vector<1x84x160xbf16>
    %52 = vector.shape_cast %51 : vector<1x84x160xbf16> to vector<84x160xbf16>
    %cst_38 = arith.constant dense<0.000000e+00> : vector<160x160xf32>
    %53 = tpu.matmul %50, %52, %cst_38 {dimension_numbers = #tpu.dot_dimension_numbers<[1], [0], [0], [1], [0, 0, 1, 1], [], []>} : vector<160x84xbf16>, vector<84x160xbf16>, vector<160x160xf32> -> vector<160x160xf32>
    %54 = arith.addf %48, %53 : vector<160x160xf32>
    %55 = vector.extract_strided_slice %45 {offsets = [16, 0], sizes = [160, 84], strides = [1, 1]} : vector<224x84xbf16> to vector<160x84xbf16>
    %c1_39 = arith.constant 1 : index
    %c0_40 = arith.constant 0 : index
    %c0_41 = arith.constant 0 : index
    %56 = vector.load %arg5[%c1_39, %c0_40, %c0_41] : memref<5x84x160xbf16, #tpu.memory_space<vmem>>, vector<1x84x160xbf16>
    %57 = vector.shape_cast %56 : vector<1x84x160xbf16> to vector<84x160xbf16>
    %cst_42 = arith.constant dense<0.000000e+00> : vector<160x160xf32>
    %58 = tpu.matmul %55, %57, %cst_42 {dimension_numbers = #tpu.dot_dimension_numbers<[1], [0], [0], [1], [0, 0, 1, 1], [], []>} : vector<160x84xbf16>, vector<84x160xbf16>, vector<160x160xf32> -> vector<160x160xf32>
    %59 = arith.addf %49, %58 : vector<160x160xf32>
    %60 = vector.extract_strided_slice %45 {offsets = [32, 0], sizes = [160, 84], strides = [1, 1]} : vector<224x84xbf16> to vector<160x84xbf16>
    %c2_43 = arith.constant 2 : index
    %c0_44 = arith.constant 0 : index
    %c0_45 = arith.constant 0 : index
    %61 = vector.load %arg5[%c2_43, %c0_44, %c0_45] : memref<5x84x160xbf16, #tpu.memory_space<vmem>>, vector<1x84x160xbf16>
    %62 = vector.shape_cast %61 : vector<1x84x160xbf16> to vector<84x160xbf16>
    %cst_46 = arith.constant dense<0.000000e+00> : vector<160x160xf32>
    %63 = tpu.matmul %60, %62, %cst_46 {dimension_numbers = #tpu.dot_dimension_numbers<[1], [0], [0], [1], [0, 0, 1, 1], [], []>} : vector<160x84xbf16>, vector<84x160xbf16>, vector<160x160xf32> -> vector<160x160xf32>
    %64 = arith.addf %54, %63 : vector<160x160xf32>
    %65 = vector.extract_strided_slice %45 {offsets = [48, 0], sizes = [160, 84], strides = [1, 1]} : vector<224x84xbf16> to vector<160x84xbf16>
    %c3_47 = arith.constant 3 : index
    %c0_48 = arith.constant 0 : index
    %c0_49 = arith.constant 0 : index
    %66 = vector.load %arg5[%c3_47, %c0_48, %c0_49] : memref<5x84x160xbf16, #tpu.memory_space<vmem>>, vector<1x84x160xbf16>
    %67 = vector.shape_cast %66 : vector<1x84x160xbf16> to vector<84x160xbf16>
    %cst_50 = arith.constant dense<0.000000e+00> : vector<160x160xf32>
    %68 = tpu.matmul %65, %67, %cst_50 {dimension_numbers = #tpu.dot_dimension_numbers<[1], [0], [0], [1], [0, 0, 1, 1], [], []>} : vector<160x84xbf16>, vector<84x160xbf16>, vector<160x160xf32> -> vector<160x160xf32>
    %69 = arith.addf %59, %68 : vector<160x160xf32>
    %70 = vector.extract_strided_slice %45 {offsets = [64, 0], sizes = [160, 84], strides = [1, 1]} : vector<224x84xbf16> to vector<160x84xbf16>
    %c4_51 = arith.constant 4 : index
    %c0_52 = arith.constant 0 : index
    %c0_53 = arith.constant 0 : index
    %71 = vector.load %arg5[%c4_51, %c0_52, %c0_53] : memref<5x84x160xbf16, #tpu.memory_space<vmem>>, vector<1x84x160xbf16>
    %72 = vector.shape_cast %71 : vector<1x84x160xbf16> to vector<84x160xbf16>
    %cst_54 = arith.constant dense<0.000000e+00> : vector<160x160xf32>
    %73 = tpu.matmul %70, %72, %cst_54 {dimension_numbers = #tpu.dot_dimension_numbers<[1], [0], [0], [1], [0, 0, 1, 1], [], []>} : vector<160x84xbf16>, vector<84x160xbf16>, vector<160x160xf32> -> vector<160x160xf32>
    %74 = arith.addf %64, %73 : vector<160x160xf32>
    %75 = arith.addf %74, %69 : vector<160x160xf32>
    %cst_55 = arith.constant 0.000000e+00 : f32
    %76 = vector.broadcast %cst_55 : f32 to vector<160x160xf32>
    %77 = arith.maximumf %75, %76 : vector<160x160xf32>
    %78 = vector.shape_cast %77 : vector<160x160xf32> to vector<5x32x160xf32>
    %79 = vector.extract_strided_slice %78 {offsets = [0, 0, 0], sizes = [5, 16, 160], strides = [1, 1, 1]} : vector<5x32x160xf32> to vector<5x16x160xf32>
    %80 = vector.extract_strided_slice %78 {offsets = [0, 16, 0], sizes = [5, 16, 160], strides = [1, 1, 1]} : vector<5x32x160xf32> to vector<5x16x160xf32>
    %81 = arith.maximumf %79, %80 : vector<5x16x160xf32>
    %82 = vector.shape_cast %81 : vector<5x16x160xf32> to vector<80x160xf32>
    %83 = arith.truncf %82 : vector<80x160xf32> to vector<80x160xbf16>
    %c0_56 = arith.constant 0 : index
    %c0_57 = arith.constant 0 : index
    %c0_58 = arith.constant 0 : index
    %84 = vector.load %arg7[%c0_56, %c0_57, %c0_58] : memref<2x160x80xbf16, #tpu.memory_space<vmem>>, vector<1x160x80xbf16>
    %85 = vector.shape_cast %84 : vector<1x160x80xbf16> to vector<160x80xbf16>
    %cst_59 = arith.constant dense<0.000000e+00> : vector<80x80xf32>
    %86 = tpu.matmul %83, %85, %cst_59 {dimension_numbers = #tpu.dot_dimension_numbers<[1], [0], [0], [1], [0, 0, 1, 1], [], []>} : vector<80x160xbf16>, vector<160x80xbf16>, vector<80x80xf32> -> vector<80x80xf32>
    %c1_60 = arith.constant 1 : index
    %c0_61 = arith.constant 0 : index
    %c0_62 = arith.constant 0 : index
    %87 = vector.load %arg7[%c1_60, %c0_61, %c0_62] : memref<2x160x80xbf16, #tpu.memory_space<vmem>>, vector<1x160x80xbf16>
    %88 = vector.shape_cast %87 : vector<1x160x80xbf16> to vector<160x80xbf16>
    %cst_63 = arith.constant dense<0.000000e+00> : vector<80x80xf32>
    %89 = tpu.matmul %83, %88, %cst_63 {dimension_numbers = #tpu.dot_dimension_numbers<[1], [0], [0], [1], [0, 0, 1, 1], [], []>} : vector<80x160xbf16>, vector<160x80xbf16>, vector<80x80xf32> -> vector<80x80xf32>
    %90 = arith.maximumf %86, %89 : vector<80x80xf32>
    %91 = arith.truncf %90 : vector<80x80xf32> to vector<80x80xbf16>
    %c0_64 = arith.constant 0 : index
    %c0_65 = arith.constant 0 : index
    %92 = vector.load %arg9[%c0_64, %c0_65] : memref<1x120xf32, #tpu.memory_space<vmem>>, vector<1x120xf32>
    %93 = vector.shape_cast %92 : vector<1x120xf32> to vector<1x120xf32>
    %94 = vector.broadcast %93 : vector<1x120xf32> to vector<16x120xf32>
    %95 = vector.extract_strided_slice %91 {offsets = [0, 0], sizes = [16, 80], strides = [1, 1]} : vector<80x80xbf16> to vector<16x80xbf16>
    %c0_66 = arith.constant 0 : index
    %c0_67 = arith.constant 0 : index
    %c0_68 = arith.constant 0 : index
    %96 = vector.load %arg8[%c0_66, %c0_67, %c0_68] : memref<5x80x120xbf16, #tpu.memory_space<vmem>>, vector<1x80x120xbf16>
    %97 = vector.shape_cast %96 : vector<1x80x120xbf16> to vector<80x120xbf16>
    %cst_69 = arith.constant dense<0.000000e+00> : vector<16x120xf32>
    %98 = tpu.matmul %95, %97, %cst_69 {dimension_numbers = #tpu.dot_dimension_numbers<[1], [0], [0], [1], [0, 0, 1, 1], [], []>} : vector<16x80xbf16>, vector<80x120xbf16>, vector<16x120xf32> -> vector<16x120xf32>
    %99 = arith.addf %94, %98 : vector<16x120xf32>
    %100 = vector.extract_strided_slice %91 {offsets = [16, 0], sizes = [16, 80], strides = [1, 1]} : vector<80x80xbf16> to vector<16x80xbf16>
    %c1_70 = arith.constant 1 : index
    %c0_71 = arith.constant 0 : index
    %c0_72 = arith.constant 0 : index
    %101 = vector.load %arg8[%c1_70, %c0_71, %c0_72] : memref<5x80x120xbf16, #tpu.memory_space<vmem>>, vector<1x80x120xbf16>
    %102 = vector.shape_cast %101 : vector<1x80x120xbf16> to vector<80x120xbf16>
    %cst_73 = arith.constant dense<0.000000e+00> : vector<16x120xf32>
    %103 = tpu.matmul %100, %102, %cst_73 {dimension_numbers = #tpu.dot_dimension_numbers<[1], [0], [0], [1], [0, 0, 1, 1], [], []>} : vector<16x80xbf16>, vector<80x120xbf16>, vector<16x120xf32> -> vector<16x120xf32>
    %104 = arith.addf %99, %103 : vector<16x120xf32>
    %105 = vector.extract_strided_slice %91 {offsets = [32, 0], sizes = [16, 80], strides = [1, 1]} : vector<80x80xbf16> to vector<16x80xbf16>
    %c2_74 = arith.constant 2 : index
    %c0_75 = arith.constant 0 : index
    %c0_76 = arith.constant 0 : index
    %106 = vector.load %arg8[%c2_74, %c0_75, %c0_76] : memref<5x80x120xbf16, #tpu.memory_space<vmem>>, vector<1x80x120xbf16>
    %107 = vector.shape_cast %106 : vector<1x80x120xbf16> to vector<80x120xbf16>
    %cst_77 = arith.constant dense<0.000000e+00> : vector<16x120xf32>
    %108 = tpu.matmul %105, %107, %cst_77 {dimension_numbers = #tpu.dot_dimension_numbers<[1], [0], [0], [1], [0, 0, 1, 1], [], []>} : vector<16x80xbf16>, vector<80x120xbf16>, vector<16x120xf32> -> vector<16x120xf32>
    %109 = arith.addf %104, %108 : vector<16x120xf32>
    %110 = vector.extract_strided_slice %91 {offsets = [48, 0], sizes = [16, 80], strides = [1, 1]} : vector<80x80xbf16> to vector<16x80xbf16>
    %c3_78 = arith.constant 3 : index
    %c0_79 = arith.constant 0 : index
    %c0_80 = arith.constant 0 : index
    %111 = vector.load %arg8[%c3_78, %c0_79, %c0_80] : memref<5x80x120xbf16, #tpu.memory_space<vmem>>, vector<1x80x120xbf16>
    %112 = vector.shape_cast %111 : vector<1x80x120xbf16> to vector<80x120xbf16>
    %cst_81 = arith.constant dense<0.000000e+00> : vector<16x120xf32>
    %113 = tpu.matmul %110, %112, %cst_81 {dimension_numbers = #tpu.dot_dimension_numbers<[1], [0], [0], [1], [0, 0, 1, 1], [], []>} : vector<16x80xbf16>, vector<80x120xbf16>, vector<16x120xf32> -> vector<16x120xf32>
    %114 = arith.addf %109, %113 : vector<16x120xf32>
    %115 = vector.extract_strided_slice %91 {offsets = [64, 0], sizes = [16, 80], strides = [1, 1]} : vector<80x80xbf16> to vector<16x80xbf16>
    %c4_82 = arith.constant 4 : index
    %c0_83 = arith.constant 0 : index
    %c0_84 = arith.constant 0 : index
    %116 = vector.load %arg8[%c4_82, %c0_83, %c0_84] : memref<5x80x120xbf16, #tpu.memory_space<vmem>>, vector<1x80x120xbf16>
    %117 = vector.shape_cast %116 : vector<1x80x120xbf16> to vector<80x120xbf16>
    %cst_85 = arith.constant dense<0.000000e+00> : vector<16x120xf32>
    %118 = tpu.matmul %115, %117, %cst_85 {dimension_numbers = #tpu.dot_dimension_numbers<[1], [0], [0], [1], [0, 0, 1, 1], [], []>} : vector<16x80xbf16>, vector<80x120xbf16>, vector<16x120xf32> -> vector<16x120xf32>
    %119 = arith.addf %114, %118 : vector<16x120xf32>
    %c0_86 = arith.constant 0 : index
    %c0_87 = arith.constant 0 : index
    %120 = vector.load %arg10[%c0_86, %c0_87] : memref<120x84xf32, #tpu.memory_space<vmem>>, vector<120x84xf32>
    %cst_88 = arith.constant dense<0.000000e+00> : vector<16x84xf32>
    %121 = tpu.matmul %119, %120, %cst_88 {dimension_numbers = #tpu.dot_dimension_numbers<[1], [0], [0], [1], [0, 0, 1, 1], [], []>} : vector<16x120xf32>, vector<120x84xf32>, vector<16x84xf32> -> vector<16x84xf32>
    %c0_89 = arith.constant 0 : index
    %c0_90 = arith.constant 0 : index
    %122 = vector.load %arg11[%c0_89, %c0_90] : memref<1x84xf32, #tpu.memory_space<vmem>>, vector<1x84xf32>
    %123 = vector.broadcast %122 : vector<1x84xf32> to vector<16x84xf32>
    %124 = arith.addf %121, %123 : vector<16x84xf32>
    %c0_91 = arith.constant 0 : index
    %c0_92 = arith.constant 0 : index
    %125 = vector.load %arg12[%c0_91, %c0_92] : memref<84x10xf32, #tpu.memory_space<vmem>>, vector<84x10xf32>
    %cst_93 = arith.constant dense<0.000000e+00> : vector<16x10xf32>
    %126 = tpu.matmul %124, %125, %cst_93 {dimension_numbers = #tpu.dot_dimension_numbers<[1], [0], [0], [1], [0, 0, 1, 1], [], []>} : vector<16x84xf32>, vector<84x10xf32>, vector<16x10xf32> -> vector<16x10xf32>
    %c0_94 = arith.constant 0 : index
    %c0_95 = arith.constant 0 : index
    %127 = vector.load %arg13[%c0_94, %c0_95] : memref<1x10xf32, #tpu.memory_space<vmem>>, vector<1x10xf32>
    %128 = vector.broadcast %127 : vector<1x10xf32> to vector<16x10xf32>
    %129 = arith.addf %126, %128 : vector<16x10xf32>
    %c0_96 = arith.constant 0 : index
    %c0_97 = arith.constant 0 : index
    %130 = vector.load %arg14[%c0_96, %c0_97] : memref<16x10xf32, #tpu.memory_space<vmem>>, vector<16x10xf32>
    tpu.vector_store %arg14[%c0_96, %c0_97], %129 {strides = array<i32>} : memref<16x10xf32, #tpu.memory_space<vmem>>, vector<16x10xf32>,
    return
  }
  func.func @transform_0(%arg0: i32) -> (i32, i32) {
    %c0_i32 = arith.constant 0 : i32
    %c0_i32_0 = arith.constant 0 : i32
    return %arg0, %c0_i32 : i32, i32
  }
  func.func @transform_1(%arg0: i32) -> (i32, i32, i32) {
    %c0_i32 = arith.constant 0 : i32
    %c0_i32_0 = arith.constant 0 : i32
    %c0_i32_1 = arith.constant 0 : i32
    %c0_i32_2 = arith.constant 0 : i32
    return %c0_i32, %c0_i32_0, %c0_i32_1 : i32, i32, i32
  }
  func.func @transform_2(%arg0: i32) -> (i32, i32) {
    %c0_i32 = arith.constant 0 : i32
    %c0_i32_0 = arith.constant 0 : i32
    %c0_i32_1 = arith.constant 0 : i32
    return %c0_i32, %c0_i32_0 : i32, i32
  }
  func.func @transform_3(%arg0: i32) -> (i32, i32, i32) {
    %c0_i32 = arith.constant 0 : i32
    %c0_i32_0 = arith.constant 0 : i32
    %c0_i32_1 = arith.constant 0 : i32
    %c0_i32_2 = arith.constant 0 : i32
    return %c0_i32, %c0_i32_0, %c0_i32_1 : i32, i32, i32
  }
  func.func @transform_4(%arg0: i32) -> (i32, i32, i32) {
    %c0_i32 = arith.constant 0 : i32
    %c0_i32_0 = arith.constant 0 : i32
    %c0_i32_1 = arith.constant 0 : i32
    %c0_i32_2 = arith.constant 0 : i32
    return %c0_i32, %c0_i32_0, %c0_i32_1 : i32, i32, i32
  }
  func.func @transform_5(%arg0: i32) -> (i32, i32) {
    %c0_i32 = arith.constant 0 : i32
    %c0_i32_0 = arith.constant 0 : i32
    %c0_i32_1 = arith.constant 0 : i32
    return %c0_i32, %c0_i32_0 : i32, i32
  }
  func.func @transform_6(%arg0: i32) -> (i32, i32, i32) {
    %c0_i32 = arith.constant 0 : i32
    %c0_i32_0 = arith.constant 0 : i32
    %c0_i32_1 = arith.constant 0 : i32
    %c0_i32_2 = arith.constant 0 : i32
    return %c0_i32, %c0_i32_0, %c0_i32_1 : i32, i32, i32
  }
  func.func @transform_7(%arg0: i32) -> (i32, i32, i32) {
    %c0_i32 = arith.constant 0 : i32
    %c0_i32_0 = arith.constant 0 : i32
    %c0_i32_1 = arith.constant 0 : i32
    %c0_i32_2 = arith.constant 0 : i32
    return %c0_i32, %c0_i32_0, %c0_i32_1 : i32, i32, i32
  }
  func.func @transform_8(%arg0: i32) -> (i32, i32) {
    %c0_i32 = arith.constant 0 : i32
    %c0_i32_0 = arith.constant 0 : i32
    %c0_i32_1 = arith.constant 0 : i32
    return %c0_i32, %c0_i32_0 : i32, i32
  }
  func.func @transform_9(%arg0: i32) -> (i32, i32) {
    %c0_i32 = arith.constant 0 : i32
    %c0_i32_0 = arith.constant 0 : i32
    %c0_i32_1 = arith.constant 0 : i32
    return %c0_i32, %c0_i32_0 : i32, i32
  }
  func.func @transform_10(%arg0: i32) -> (i32, i32) {
    %c0_i32 = arith.constant 0 : i32
    %c0_i32_0 = arith.constant 0 : i32
    %c0_i32_1 = arith.constant 0 : i32
    return %c0_i32, %c0_i32_0 : i32, i32
  }
  func.func @transform_11(%arg0: i32) -> (i32, i32) {
    %c0_i32 = arith.constant 0 : i32
    %c0_i32_0 = arith.constant 0 : i32
    %c0_i32_1 = arith.constant 0 : i32
    return %c0_i32, %c0_i32_0 : i32, i32
  }
  func.func @transform_12(%arg0: i32) -> (i32, i32) {
    %c0_i32 = arith.constant 0 : i32
    %c0_i32_0 = arith.constant 0 : i32
    %c0_i32_1 = arith.constant 0 : i32
    return %c0_i32, %c0_i32_0 : i32, i32
  }
  func.func @transform_13(%arg0: i32) -> (i32, i32) {
    %c0_i32 = arith.constant 0 : i32
    %c0_i32_0 = arith.constant 0 : i32
    return %arg0, %c0_i32 : i32, i32
  }
}

</mosaic_0001>

<bundles_post_ra>
// kernel: lenet_forward.1
= control target key start
LH: loop header
LB: loop body
LE: loop exit
PB: predicated region body
PF: predicated region fallthrough
CT: control target
= control target key end

     0   :  { %v10596_v1 = vmov 0   ;;  %vm277_vm0 = vcmask 261120   ;;  %vm3648_vm1 = vcmask 1043456   ;;  %vm3605_vm2 = vcmask 326656   ;;  %s10580_s1 = inlined_call_operand.vmem [shape: bf16[5,32,168], index: 1, kind: input, shape index: {}]   ;;  %s10581_s0 = inlined_call_operand.vmem [shape: bf16[512,32], index: 0, kind: input, shape index: {}]   ;;  %s10582_s3 = inlined_call_operand.vmem [shape: bf16[2,168,84], index: 3, kind: input, shape index: {}]   ;;  %s10583_s2 = inlined_call_operand.vmem [shape: f32[1,168], index: 2, kind: input, shape index: {}]   ;;  %s10584_s4 = inlined_call_operand.vmem [shape: bf16[5,84,160], index: 4, kind: input, shape index: {}]   ;;  %s10585_s6 = inlined_call_operand.vmem [shape: bf16[2,160,80], index: 6, kind: input, shape index: {}]   ;;  %s10586_s5 = inlined_call_operand.vmem [shape: f32[1,160], index: 5, kind: input, shape index: {}]   ;;  %s10587_s7 = inlined_call_operand.vmem [shape: bf16[5,80,120], index: 7, kind: input, shape index: {}]   ;;  %s10588_s9 = inlined_call_operand.vmem [shape: f32[120,84], index: 9, kind: input, shape index: {}]   ;;  %s10589_s11 = inlined_call_operand.vmem [shape: f32[84,10], index: 11, kind: input, shape index: {}]   ;;  %s10590_s8 = inlined_call_operand.vmem [shape: f32[1,120], index: 8, kind: input, shape index: {}]   ;;  %s10591_s10 = inlined_call_operand.vmem [shape: f32[1,84], index: 10, kind: input, shape index: {}]   ;;  %s10592_s12 = inlined_call_operand.vmem [shape: f32[1,10], index: 12, kind: input, shape index: {}]   ;;  %s10593_s13 = inlined_call_operand.vmem [shape: f32[16,10], index: 13, kind: output, shape index: {}]  }
   0x1   :  { %v8047_v0 = vld [vmem:[%s10580_s1 + $0x4] ss:$8 sps:$4 sm:$0xff]   ;;  %394 = vmatprep.mubr.bf16.mxu0 %v10596_v1  ;;  %504 = vmatprep.mubr.bf16.mxu1 %v10596_v1  ;;  %v8049_v2 = vld [vmem:[%s10580_s1] ss:$8 sps:$4 sm:$0xff]   ;;  %v8050_v3 = vld [vmem:[%s10580_s1 + $0x14] ss:$8 sps:$4 sm:$0xff]  }
   0x2   :  { %362 = vmatprep.subr.bf16.mxu0 %v8047_v0  ;;  %7262 = vmatprep.subr.bf16.mxu1 %v8047_v0  ;;  %v8052_v4 = vld [vmem:[%s10580_s1 + $0x10] ss:$8 sps:$4 sm:$0xff]   ;;  %v8056_v5 = vld [vmem:[%s10580_s1 + $0x44] ss:$8 sps:$4 sm:$0xff]   ;;  %v8054_v7 = vld [vmem:[%s10580_s1 + $0x40] ss:$8 sps:$4 sm:$0xff]  }
   0x3   :  { %363 = vmatpush1.bf16.msra.mxu0 %v8049_v2  ;;  %7264 = vmatpush1.bf16.msra.mxu1 %v8049_v2  ;;  %v8053_v6 = vld [vmem:[%s10581_s0] sm:$0xff]   ;;  %v8062_v8 = vld [vmem:[%s10580_s1 + $0x50] ss:$8 sps:$4 sm:$0xff]   ;;  %v8064_v9 = vld [vmem:[%s10580_s1 + $0x54] ss:$8 sps:$4 sm:$0xff]   ;;  %vm4181_vm3 = vcmask 1041408  }
   0x4   :  { %364 = vmatprep.subr.bf16.mxu0 %v8050_v3  ;;  %7263 = vmatprep.subr.bf16.mxu1 %v8050_v3  ;;  %v8057_v10 = vld [vmem:[%s10581_s0 + $0x8] sm:$0xff]   ;;  %v8058_v12 = vld [vmem:[%s10581_s0 + $0x10] sm:$0xff]   ;;  %v8059_v13 = vld [vmem:[%s10581_s0 + $0x18] sm:$0xff]   ;;  %vm4150_vm4 = vcmask 687104   ;;  %vm8344_vm5 = vmmov 0   ;;  %vm5771_vm6 = vcmask 654336  }
   0x5   :  { %v8073_v11 = vld [vmem:[%s10580_s1 + $0x64] ss:$8 sps:$4 sm:$0xff]   ;;  %v8065_v16 = vld [vmem:[%s10581_s0 + $0x30] sm:$0xff]   ;;  %v8066_v17 = vld [vmem:[%s10581_s0 + $0x38] sm:$0xff]   ;;  %vm6188_vm7 = vcmask 982016   ;;  %vm6372_vm8 = vcmask 80896  }
   0x6   :  { %v8060_v14 = vld [vmem:[%s10581_s0 + $0x20] sm:$0xff]   ;;  %v8061_v15 = vld [vmem:[%s10581_s0 + $0x28] sm:$0xff]   ;;  %v8069_v20 = vld [vmem:[%s10581_s0 + $0x50] sm:$0xff]  }
   0x7   :  { %365 = vmatpush1.bf16.msra.mxu0 %v8052_v4  ;;  %7265 = vmatpush1.bf16.msra.mxu1 %v8052_v4  ;;  %v8067_v18 = vld [vmem:[%s10581_s0 + $0x40] sm:$0xff]   ;;  %v8068_v19 = vld [vmem:[%s10581_s0 + $0x48] sm:$0xff]   ;;  %v8503_v21 = vld [vmem:[%s10581_s0 + $0x10] sm:$0xff]  }
   0x8   :  { %1099 = vmatprep.subr.bf16.mxu0 %v8056_v5  ;;  %3652 = vmatprep.subr.bf16.mxu1 %v10596_v1  ;;  %v8071_v22 = vld [vmem:[%s10580_s1 + $0x60] ss:$8 sps:$4 sm:$0xff]   ;;  %v8090_v23 = vld [vmem:[%s10580_s1 + $0x74] ss:$8 sps:$4 sm:$0xff]   ;;  %v8088_v24 = vld [vmem:[%s10580_s1 + $0x70] ss:$8 sps:$4 sm:$0xff]  }
   0x9   :  { %v8520_v25 = vld [vmem:[%s10581_s0 + $0x18] sm:$0xff]   ;;  %v8528_v26 = vld [vmem:[%s10581_s0 + $0x20] sm:$0xff]   ;;  %v8536_v27 = vld [vmem:[%s10581_s0 + $0x28] sm:$0xff]  }
   0xa   :  { %6411 = vmatmul.mubr.msk.bf16.vlgmr.msra.gmra.mrb[0].mxu0 %vm277_vm0, %v8053_v6  ;;  %v8544_v28 = vld [vmem:[%s10581_s0 + $0x30] sm:$0xff]   ;;  %v8552_v29 = vld [vmem:[%s10581_s0 + $0x38] sm:$0xff]   ;;  %v8560_v30 = vld [vmem:[%s10581_s0 + $0x40] sm:$0xff]  }
   0xb   :  { %1100 = vmatpush1.bf16.msra.mxu0 %v8054_v7  ;;  %404 = vmatprep.mubr.bf16.mxu0 %v10596_v1  ;;  %v8568_v31 = vld [vmem:[%s10581_s0 + $0x48] sm:$0xff]   ;;  %v8576_v32 = vld [vmem:[%s10581_s0 + $0x50] sm:$0xff]   ;;  %v8584_v33 = vld [vmem:[%s10581_s0 + $0x58] sm:$0xff]  }
   0xc   :  { %1101 = vmatprep.subr.bf16.mxu0 %v8064_v9  ;;  %v8592_v34 = vld [vmem:[%s10581_s0 + $0x60] sm:$0xff]   ;;  %v8600_v35 = vld [vmem:[%s10581_s0 + $0x68] sm:$0xff]   ;;  %v8608_v36 = vld [vmem:[%s10581_s0 + $0x70] sm:$0xff]  }
   0xd   :  { %v8107_v37 = vld [vmem:[%s10580_s1 + $0x24] ss:$8 sps:$4 sm:$0xff]   ;;  %v8619_v38 = vld [vmem:[%s10581_s0 + $0x78] sm:$0xff]   ;;  %v8643_v41 = vld [vmem:[%s10581_s0 + $0x90] sm:$0xff]  }
   0xe   :  { %v8627_v39 = vld [vmem:[%s10581_s0 + $0x80] sm:$0xff]   ;;  %v8635_v40 = vld [vmem:[%s10581_s0 + $0x88] sm:$0xff]   ;;  %v8651_v42 = vld [vmem:[%s10581_s0 + $0x98] sm:$0xff]  }
   0xf   :  { %1102 = vmatpush1.bf16.msra.mxu0 %v8062_v8  ;;  %v8659_v43 = vld [vmem:[%s10581_s0 + $0xa0] sm:$0xff]   ;;  %v8667_v44 = vld [vmem:[%s10581_s0 + $0xa8] sm:$0xff]   ;;  %v8675_v45 = vld [vmem:[%s10581_s0 + $0xb0] sm:$0xff]  }
  0x10   :  { %1829 = vmatprep.subr.bf16.mxu0 %v8073_v11  ;;  %v8683_v46 = vld [vmem:[%s10581_s0 + $0xb8] sm:$0xff]   ;;  %v8691_v47 = vld [vmem:[%s10581_s0 + $0xc0] sm:$0xff]   ;;  %v8699_v48 = vld [vmem:[%s10581_s0 + $0xc8] sm:$0xff]  }
  0x11   :  { %v8707_v49 = vld [vmem:[%s10581_s0 + $0xd0] sm:$0xff]   ;;  %v8715_v50 = vld [vmem:[%s10581_s0 + $0xd8] sm:$0xff]   ;;  %v8723_v51 = vld [vmem:[%s10581_s0 + $0xe0] sm:$0xff]  }
  0x12   :  { %6412 = vmatmul.mubr.msk.bf16.gmra.mrb[4].mxu0 %vm277_vm0, %v8057_v10  ;;  %v8103_v52 = vld [vmem:[%s10581_s0 + $0xe8] sm:$0xff]   ;;  %v8104_v53 = vld [vmem:[%s10581_s0 + $0x18] sm:$0xff]   ;;  %v8108_v57 = vld [vmem:[%s10581_s0 + $0x20] sm:$0xff]  }
  0x13   :  { %414 = vmatprep.mubr.bf16.mxu0 %v10596_v1  ;;  %v8105_v54 = vld [vmem:[%s10580_s1 + $0x20] ss:$8 sps:$4 sm:$0xff]   ;;  %v8124_v55 = vld [vmem:[%s10580_s1 + $0x34] ss:$8 sps:$4 sm:$0xff]   ;;  %v8122_v56 = vld [vmem:[%s10580_s1 + $0x30] ss:$8 sps:$4 sm:$0xff]  }
  0x14   :  { %v8109_v58 = vld [vmem:[%s10581_s0 + $0x28] sm:$0xff]   ;;  %v8110_v59 = vld [vmem:[%s10581_s0 + $0x30] sm:$0xff]   ;;  %v8111_v60 = vld [vmem:[%s10581_s0 + $0x38] sm:$0xff]  }
  0x15   :  { %v8112_v61 = vld [vmem:[%s10581_s0 + $0x40] sm:$0xff]   ;;  %v8113_v62 = vld [vmem:[%s10581_s0 + $0x48] sm:$0xff]   ;;  %v8114_v63 = vld [vmem:[%s10581_s0 + $0x50] sm:$0xff]  }
  0x16   :  { %v8115_v0 = vld [vmem:[%s10581_s0 + $0x58] sm:$0xff]   ;;  %v8116_v2 = vld [vmem:[%s10581_s0 + $0x60] sm:$0xff]   ;;  %v8117_v3 = vld [vmem:[%s10581_s0 + $0x68] sm:$0xff]  }
  0x17   :  { %v8118_v4 = vld [vmem:[%s10581_s0 + $0x70] sm:$0xff]   ;;  %v8119_v5 = vld [vmem:[%s10581_s0 + $0x78] sm:$0xff]   ;;  %v8141_v6 = vld [vmem:[%s10580_s1 + $0x84] ss:$8 sps:$4 sm:$0xff]  }
  0x18   :  { %v8120_v7 = vld [vmem:[%s10581_s0 + $0x80] sm:$0xff]   ;;  %v8121_v8 = vld [vmem:[%s10581_s0 + $0x88] sm:$0xff]   ;;  %v8125_v9 = vld [vmem:[%s10581_s0 + $0x90] sm:$0xff]  }
  0x19   :  { %v8126_v10 = vld [vmem:[%s10581_s0 + $0x98] sm:$0xff]   ;;  %v8127_v11 = vld [vmem:[%s10581_s0 + $0xa0] sm:$0xff]  }
  0x1a   :  { %6413 = vmatmul.mubr.msk.bf16.gmra.mrb[8].mxu0 %vm277_vm0, %v8058_v12  ;;  %v8128_v12 = vld [vmem:[%s10581_s0 + $0xa8] sm:$0xff]  }
  0x1b   :  { %424 = vmatprep.mubr.bf16.mxu0 %v10596_v1 }
  0x22   :  { %6414 = vmatmul.mubr.msk.bf16.gmra.mrb[12].mxu0 %vm277_vm0, %v8059_v13  ;;  %v8129_v13 = vld [vmem:[%s10581_s0 + $0xb0] sm:$0xff]  }
  0x23   :  { %434 = vmatprep.mubr.bf16.mxu0 %v10596_v1 }
  0x2a   :  { %6415 = vmatmul.mubr.msk.bf16.gmra.mrb[16].mxu0 %vm277_vm0, %v8060_v14  ;;  %v8130_v14 = vld [vmem:[%s10581_s0 + $0xb8] sm:$0xff]  }
  0x2b   :  { %444 = vmatprep.mubr.bf16.mxu0 %v10596_v1 }
  0x32   :  { %6416 = vmatmul.mubr.msk.bf16.gmra.mrb[20].mxu0 %vm277_vm0, %v8061_v15  ;;  %v8131_v15 = vld [vmem:[%s10581_s0 + $0xc0] sm:$0xff]  }
  0x33   :  { %454 = vmatprep.mubr.bf16.mxu0 %v10596_v1 }
  0x3a   :  { %6417 = vmatmul.mubr.msk.bf16.gmra.mrb[24].mxu0 %vm277_vm0, %v8065_v16  ;;  %v8132_v16 = vld [vmem:[%s10581_s0 + $0xc8] sm:$0xff]  }
  0x3b   :  { %464 = vmatprep.mubr.bf16.mxu0 %v10596_v1 }
  0x42   :  { %6418 = vmatmul.mubr.msk.bf16.gmra.mrb[28].mxu0 %vm277_vm0, %v8066_v17  ;;  %v8133_v17 = vld [vmem:[%s10581_s0 + $0xd0] sm:$0xff]  }
  0x43   :  { %474 = vmatprep.mubr.bf16.mxu0 %v10596_v1 }
  0x4a   :  { %6419 = vmatmul.mubr.msk.bf16.gmra.mrb[32].mxu0 %vm277_vm0, %v8067_v18  ;;  %v8134_v18 = vld [vmem:[%s10581_s0 + $0xd8] sm:$0xff]  }
  0x4b   :  { %484 = vmatprep.mubr.bf16.mxu0 %v10596_v1 }
  0x52   :  { %6420 = vmatmul.mubr.msk.bf16.gmra.mrb[36].mxu0 %vm277_vm0, %v8068_v19  ;;  %v8135_v19 = vld [vmem:[%s10581_s0 + $0xe0] sm:$0xff]  }
  0x53   :  { %494 = vmatprep.mubr.bf16.mxu0 %v10596_v1 }
  0x5a   :  { %6421 = vmatmul.mubr.msk.bf16.gmra.mrb[40].mxu0 %vm277_vm0, %v8069_v20  ;;  %v8136_v20 = vld [vmem:[%s10581_s0 + $0xe8] sm:$0xff]  }
  0x5b   :  { %1131 = vmatprep.mubr.bf16.mxu0 %v10596_v1 }
  0x62   :  { %6479 = vmatmul.mubr.msk.bf16.vlgmr.msra.gmra.mrb[0].mxu0 %vm277_vm0, %v8503_v21 }
  0x63   :  { %1830 = vmatpush1.bf16.msra.mxu0 %v8071_v22  ;;  %1141 = vmatprep.mubr.bf16.mxu0 %v10596_v1  ;;  %v8137_v22 = vld [vmem:[%s10581_s0 + $0xf0] sm:$0xff]  }
  0x64   :  { %1831 = vmatprep.subr.bf16.mxu0 %v8090_v23  ;;  %v8138_v23 = vld [vmem:[%s10581_s0 + $0x8] sm:$0xff]  }
  0x67   :  { %1832 = vmatpush1.bf16.msra.mxu0 %v8088_v24  ;;  %v8139_v24 = vld [vmem:[%s10580_s1 + $0x80] ss:$8 sps:$4 sm:$0xff]  }
  0x68   :  { %2170 = vmatprep.subr.bf16.mxu0 %v8107_v37  ;;  %v8144_v37 = vld [vmem:[%s10580_s1 + $0x94] ss:$8 sps:$4 sm:$0xff]  }
  0x6a   :  { %6480 = vmatmul.mubr.msk.bf16.gmra.mrb[4].mxu0 %vm277_vm0, %v8520_v25 }
  0x6b   :  { %1151 = vmatprep.mubr.bf16.mxu0 %v10596_v1 }
  0x72   :  { %6481 = vmatmul.mubr.msk.bf16.gmra.mrb[8].mxu0 %vm277_vm0, %v8528_v26 }
  0x73   :  { %1161 = vmatprep.mubr.bf16.mxu0 %v10596_v1 }
  0x7a   :  { %6482 = vmatmul.mubr.msk.bf16.gmra.mrb[12].mxu0 %vm277_vm0, %v8536_v27 }
  0x7b   :  { %1171 = vmatprep.mubr.bf16.mxu0 %v10596_v1 }
  0x82   :  { %6483 = vmatmul.mubr.msk.bf16.gmra.mrb[16].mxu0 %vm277_vm0, %v8544_v28 }
  0x83   :  { %1181 = vmatprep.mubr.bf16.mxu0 %v10596_v1 }
  0x8a   :  { %6484 = vmatmul.mubr.msk.bf16.gmra.mrb[20].mxu0 %vm277_vm0, %v8552_v29 }
  0x8b   :  { %1191 = vmatprep.mubr.bf16.mxu0 %v10596_v1 }
  0x92   :  { %6485 = vmatmul.mubr.msk.bf16.gmra.mrb[24].mxu0 %vm277_vm0, %v8560_v30 }
  0x93   :  { %1201 = vmatprep.mubr.bf16.mxu0 %v10596_v1 }
  0x9a   :  { %6486 = vmatmul.mubr.msk.bf16.gmra.mrb[28].mxu0 %vm277_vm0, %v8568_v31 }
  0x9b   :  { %1211 = vmatprep.mubr.bf16.mxu0 %v10596_v1 }
  0xa2   :  { %6487 = vmatmul.mubr.msk.bf16.gmra.mrb[32].mxu0 %vm277_vm0, %v8576_v32 }
  0xa3   :  { %1221 = vmatprep.mubr.bf16.mxu0 %v10596_v1 }
  0xaa   :  { %6488 = vmatmul.mubr.msk.bf16.gmra.mrb[36].mxu0 %vm277_vm0, %v8584_v33 }
  0xab   :  { %1231 = vmatprep.mubr.bf16.mxu0 %v10596_v1 }
  0xb2   :  { %6489 = vmatmul.mubr.msk.bf16.gmra.mrb[40].mxu0 %vm277_vm0, %v8592_v34 }
  0xb3   :  { %1241 = vmatprep.mubr.bf16.mxu0 %v10596_v1 }
  0xba   :  { %6490 = vmatmul.mubr.msk.bf16.gmra.mrb[44].mxu0 %vm277_vm0, %v8600_v35 }
  0xbb   :  { %1251 = vmatprep.mubr.bf16.mxu0 %v10596_v1 }
  0xc2   :  { %6491 = vmatmul.mubr.msk.bf16.gmra.mrb[48].mxu0 %vm277_vm0, %v8608_v36 }
  0xc3   :  { %1261 = vmatprep.mubr.bf16.mxu0 %v10596_v1 }
  0xca   :  { %6492 = vmatmul.mubr.msk.bf16.gmra.mrb[52].mxu0 %vm277_vm0, %v8619_v38 }
  0xcb   :  { %1271 = vmatprep.mubr.bf16.mxu0 %v10596_v1 }
  0xd2   :  { %6493 = vmatmul.mubr.msk.bf16.gmra.mrb[56].mxu0 %vm277_vm0, %v8627_v39 }
  0xd3   :  { %1281 = vmatprep.mubr.bf16.mxu0 %v10596_v1 }
  0xda   :  { %6494 = vmatmul.mubr.msk.bf16.gmra.mrb[60].mxu0 %vm277_vm0, %v8635_v40 }
  0xdb   :  { %1291 = vmatprep.mubr.bf16.mxu0 %v10596_v1 }
  0xe2   :  { %6495 = vmatmul.mubr.msk.bf16.gmra.mrb[64].mxu0 %vm277_vm0, %v8643_v41 }
  0xe3   :  { %1301 = vmatprep.mubr.bf16.mxu0 %v10596_v1 }
  0xea   :  { %6496 = vmatmul.mubr.msk.bf16.gmra.mrb[68].mxu0 %vm277_vm0, %v8651_v42 }
  0xeb   :  { %1311 = vmatprep.mubr.bf16.mxu0 %v10596_v1 }
  0xf2   :  { %6497 = vmatmul.mubr.msk.bf16.gmra.mrb[72].mxu0 %vm277_vm0, %v8659_v43 }
  0xf3   :  { %1321 = vmatprep.mubr.bf16.mxu0 %v10596_v1 }
  0xfa   :  { %6498 = vmatmul.mubr.msk.bf16.gmra.mrb[76].mxu0 %vm277_vm0, %v8667_v44 }
  0xfb   :  { %1331 = vmatprep.mubr.bf16.mxu0 %v10596_v1 }
 0x102   :  { %6499 = vmatmul.mubr.msk.bf16.gmra.mrb[80].mxu0 %vm277_vm0, %v8675_v45 }
 0x103   :  { %1341 = vmatprep.mubr.bf16.mxu0 %v10596_v1 }
 0x10a   :  { %6500 = vmatmul.mubr.msk.bf16.gmra.mrb[84].mxu0 %vm277_vm0, %v8683_v46 }
 0x10b   :  { %1351 = vmatprep.mubr.bf16.mxu0 %v10596_v1 }
 0x112   :  { %6501 = vmatmul.mubr.msk.bf16.gmra.mrb[88].mxu0 %vm277_vm0, %v8691_v47 }
 0x113   :  { %1361 = vmatprep.mubr.bf16.mxu0 %v10596_v1 }
 0x11a   :  { %6502 = vmatmul.mubr.msk.bf16.gmra.mrb[92].mxu0 %vm277_vm0, %v8699_v48 }
 0x11b   :  { %1371 = vmatprep.mubr.bf16.mxu0 %v10596_v1 }
 0x122   :  { %6503 = vmatmul.mubr.msk.bf16.gmra.mrb[96].mxu0 %vm277_vm0, %v8707_v49 }
 0x123   :  { %1381 = vmatprep.mubr.bf16.mxu0 %v10596_v1 }
 0x12a   :  { %6504 = vmatmul.mubr.msk.bf16.gmra.mrb[100].mxu0 %vm277_vm0, %v8715_v50 }
 0x12b   :  { %1391 = vmatprep.mubr.bf16.mxu0 %v10596_v1 }
 0x132   :  { %6505 = vmatmul.mubr.msk.bf16.gmra.mrb[104].mxu0 %vm277_vm0, %v8723_v51 }
 0x133   :  { %1401 = vmatprep.mubr.bf16.mxu0 %v10596_v1 }
 0x13a   :  { %6506 = vmatmul.mubr.msk.bf16.gmra.mrb[108].mxu0 %vm277_vm0, %v8103_v52  ;;  %v8142_v52 = vld [vmem:[%s10580_s1 + $0x90] ss:$8 sps:$4 sm:$0xff]  }
 0x13b   :  { %1861 = vmatprep.mubr.bf16.mxu0 %v10596_v1 }
 0x142   :  { %6543 = vmatmul.mubr.msk.bf16.vlgmr.msra.gmra.mrb[0].mxu0 %vm277_vm0, %v8104_v53  ;;  %v8154_v53 = vld [vmem:[%s10581_s0 + $0x68] sm:$0xff]  }
 0x143   :  { %2171 = vmatpush1.bf16.msra.mxu0 %v8105_v54  ;;  %1871 = vmatprep.mubr.bf16.mxu0 %v10596_v1  ;;  %v8189_v54 = vld [vmem:[%s10582_s3 + $0x18] sm:$0xff]  }
 0x144   :  { %2172 = vmatprep.subr.bf16.mxu0 %v8124_v55  ;;  %v8190_v55 = vld [vmem:[%s10581_s0 + $0xd0] sm:$0xff]  }
 0x147   :  { %2173 = vmatpush1.bf16.msra.mxu0 %v8122_v56  ;;  %v8191_v56 = vld [vmem:[%s10582_s3 + $0x20] sm:$0xff]  }
 0x148   :  { %2788 = vmatprep.subr.bf16.mxu0 %v8141_v6  ;;  %v8163_v6 = vld [vmem:[%s10581_s0 + $0x90] sm:$0xff]  }
 0x14a   :  { %6544 = vmatmul.mubr.msk.bf16.gmra.mrb[4].mxu0 %vm277_vm0, %v8108_v57  ;;  %v8155_v57 = vld [vmem:[%s10581_s0 + $0x70] sm:$0xff]  }
 0x14b   :  { %1881 = vmatprep.mubr.bf16.mxu0 %v10596_v1 }
 0x152   :  { %6545 = vmatmul.mubr.msk.bf16.gmra.mrb[8].mxu0 %vm277_vm0, %v8109_v58  ;;  %v8193_v58 = vld [vmem:[%s10582_s3 + $0x28] sm:$0xff]  }
 0x153   :  { %1891 = vmatprep.mubr.bf16.mxu0 %v10596_v1 }
 0x15a   :  { %6546 = vmatmul.mubr.msk.bf16.gmra.mrb[12].mxu0 %vm277_vm0, %v8110_v59  ;;  %v8194_v59 = vld [vmem:[%s10581_s0 + $0xd8] sm:$0xff]  }
 0x15b   :  { %1901 = vmatprep.mubr.bf16.mxu0 %v10596_v1 }
 0x162   :  { %6547 = vmatmul.mubr.msk.bf16.gmra.mrb[16].mxu0 %vm277_vm0, %v8111_v60  ;;  %v8195_v60 = vld [vmem:[%s10582_s3 + $0x30] sm:$0xff]  }
 0x163   :  { %1911 = vmatprep.mubr.bf16.mxu0 %v10596_v1 }
 0x16a   :  { %6548 = vmatmul.mubr.msk.bf16.gmra.mrb[20].mxu0 %vm277_vm0, %v8112_v61  ;;  %v8157_v61 = vld [vmem:[%s10581_s0 + $0x78] sm:$0xff]  }
 0x16b   :  { %1921 = vmatprep.mubr.bf16.mxu0 %v10596_v1 }
 0x172   :  { %6549 = vmatmul.mubr.msk.bf16.gmra.mrb[24].mxu0 %vm277_vm0, %v8113_v62  ;;  %v8197_v62 = vld [vmem:[%s10582_s3 + $0x38] sm:$0xff]  }
 0x173   :  { %1931 = vmatprep.mubr.bf16.mxu0 %v10596_v1 }
 0x17a   :  { %6550 = vmatmul.mubr.msk.bf16.gmra.mrb[28].mxu0 %vm277_vm0, %v8114_v63  ;;  %v8198_v63 = vld [vmem:[%s10582_s3 + $0x40] sm:$0xff]  }
 0x17b   :  { %1941 = vmatprep.mubr.bf16.mxu0 %v10596_v1 }
 0x182   :  { %6551 = vmatmul.mubr.msk.bf16.gmra.mrb[32].mxu0 %vm277_vm0, %v8115_v0  ;;  %v8159_v0 = vld [vmem:[%s10581_s0 + $0x80] sm:$0xff]  }
 0x183   :  { %1951 = vmatprep.mubr.bf16.mxu0 %v10596_v1 }
 0x18a   :  { %6552 = vmatmul.mubr.msk.bf16.gmra.mrb[36].mxu0 %vm277_vm0, %v8116_v2  ;;  %v8199_v2 = vld [vmem:[%s10582_s3 + $0x48] sm:$0xff]  }
 0x18b   :  { %1961 = vmatprep.mubr.bf16.mxu0 %v10596_v1 }
 0x192   :  { %6553 = vmatmul.mubr.msk.bf16.gmra.mrb[40].mxu0 %vm277_vm0, %v8117_v3  ;;  %v8200_v3 = vld [vmem:[%s10582_s3 + $0x50] ss:$0 sps:$4 sm:$0xff]  }
 0x193   :  { %1971 = vmatprep.mubr.bf16.mxu0 %v10596_v1 }
 0x19a   :  { %6554 = vmatmul.mubr.msk.bf16.gmra.mrb[44].mxu0 %vm277_vm0, %v8118_v4  ;;  %v8161_v4 = vld [vmem:[%s10581_s0 + $0x88] sm:$0xff]  }
 0x19b   :  { %1981 = vmatprep.mubr.bf16.mxu0 %v10596_v1 }
 0x1a2   :  { %6555 = vmatmul.mubr.msk.bf16.gmra.mrb[48].mxu0 %vm277_vm0, %v8119_v5  ;;  %v3650_v5 = vsel %vm3648_vm1, %v8200_v3, 0 }
 0x1a3   :  { %1991 = vmatprep.mubr.bf16.mxu0 %v10596_v1 }
 0x1aa   :  { %6556 = vmatmul.mubr.msk.bf16.gmra.mrb[52].mxu0 %vm277_vm0, %v8120_v7  ;;  %v8165_v7 = vld [vmem:[%s10581_s0 + $0x98] sm:$0xff]  }
 0x1ab   :  { %2001 = vmatprep.mubr.bf16.mxu0 %v10596_v1 }
 0x1b2   :  { %6557 = vmatmul.mubr.msk.bf16.gmra.mrb[56].mxu0 %vm277_vm0, %v8121_v8  ;;  %v8167_v8 = vld [vmem:[%s10581_s0 + $0xa0] sm:$0xff]  }
 0x1b3   :  { %2011 = vmatprep.mubr.bf16.mxu0 %v10596_v1 }
 0x1ba   :  { %6558 = vmatmul.mubr.msk.bf16.gmra.mrb[60].mxu0 %vm277_vm0, %v8125_v9  ;;  %v8169_v9 = vld [vmem:[%s10581_s0 + $0xa8] sm:$0xff]  }
 0x1bb   :  { %2021 = vmatprep.mubr.bf16.mxu0 %v10596_v1 }
 0x1c2   :  { %6559 = vmatmul.mubr.msk.bf16.gmra.mrb[64].mxu0 %vm277_vm0, %v8126_v10  ;;  %v8171_v10 = vld [vmem:[%s10581_s0 + $0xb0] sm:$0xff]  }
 0x1c3   :  { %2031 = vmatprep.mubr.bf16.mxu0 %v10596_v1 }
 0x1ca   :  { %6560 = vmatmul.mubr.msk.bf16.gmra.mrb[68].mxu0 %vm277_vm0, %v8127_v11  ;;  %v8173_v11 = vld [vmem:[%s10581_s0 + $0xb8] sm:$0xff]  }
 0x1cb   :  { %2041 = vmatprep.mubr.bf16.mxu0 %v10596_v1 }
 0x1d2   :  { %6561 = vmatmul.mubr.msk.bf16.gmra.mrb[72].mxu0 %vm277_vm0, %v8128_v12  ;;  %v8175_v12 = vld [vmem:[%s10581_s0 + $0xc0] sm:$0xff]  }
 0x1d3   :  { %2051 = vmatprep.mubr.bf16.mxu0 %v10596_v1 }
 0x1da   :  { %6562 = vmatmul.mubr.msk.bf16.gmra.mrb[76].mxu0 %vm277_vm0, %v8129_v13  ;;  %v8177_v13 = vld [vmem:[%s10581_s0 + $0xc8] sm:$0xff]  }
 0x1db   :  { %2061 = vmatprep.mubr.bf16.mxu0 %v10596_v1 }
 0x1e2   :  { %6563 = vmatmul.mubr.msk.bf16.gmra.mrb[80].mxu0 %vm277_vm0, %v8130_v14 }
 0x1e3   :  { %2071 = vmatprep.mubr.bf16.mxu0 %v10596_v1 }
 0x1ea   :  { %6564 = vmatmul.mubr.msk.bf16.gmra.mrb[84].mxu0 %vm277_vm0, %v8131_v15 }
 0x1eb   :  { %2081 = vmatprep.mubr.bf16.mxu0 %v10596_v1 }
 0x1f2   :  { %6565 = vmatmul.mubr.msk.bf16.gmra.mrb[88].mxu0 %vm277_vm0, %v8132_v16 }
 0x1f3   :  { %2091 = vmatprep.mubr.bf16.mxu0 %v10596_v1 }
 0x1fa   :  { %6566 = vmatmul.mubr.msk.bf16.gmra.mrb[92].mxu0 %vm277_vm0, %v8133_v17 }
 0x1fb   :  { %2101 = vmatprep.mubr.bf16.mxu0 %v10596_v1 }
 0x202   :  { %6567 = vmatmul.mubr.msk.bf16.gmra.mrb[96].mxu0 %vm277_vm0, %v8134_v18  ;;  %v8179_v18 = vld [vmem:[%s10581_s0 + $0xd0] sm:$0xff]  }
 0x203   :  { %2111 = vmatprep.mubr.bf16.mxu0 %v10596_v1 }
 0x20a   :  { %6568 = vmatmul.mubr.msk.bf16.gmra.mrb[100].mxu0 %vm277_vm0, %v8135_v19 }
 0x20b   :  { %2121 = vmatprep.mubr.bf16.mxu0 %v10596_v1 }
 0x212   :  { %6569 = vmatmul.mubr.msk.bf16.gmra.mrb[104].mxu0 %vm277_vm0, %v8136_v20 }
 0x213   :  { %2131 = vmatprep.mubr.bf16.mxu0 %v10596_v1 }
 0x21a   :  { %6570 = vmatmul.mubr.msk.bf16.gmra.mrb[108].mxu0 %vm277_vm0, %v8137_v22 }
 0x21b   :  { %2202 = vmatprep.mubr.bf16.mxu0 %v10596_v1 }
 0x222   :  { %6576 = vmatmul.mubr.msk.bf16.vlgmr.msra.gmra.mrb[0].mxu0 %vm277_vm0, %v8138_v23 }
 0x223   :  { %2789 = vmatpush1.bf16.msra.mxu0 %v8139_v24  ;;  %2212 = vmatprep.mubr.bf16.mxu0 %v10596_v1  ;;  %v8181_v24 = vld [vmem:[%s10581_s0 + $0xd8] sm:$0xff]  }
 0x224   :  { %2790 = vmatprep.subr.bf16.mxu0 %v8144_v37 }
 0x227   :  { %2791 = vmatpush1.bf16.msra.mxu0 %v8142_v52 }
 0x22a   :  { %6577 = vmatmul.mubr.msk.bf16.gmra.mrb[4].mxu0 %vm277_vm0, %v8503_v21  ;;  %v8156_v21 = vld [vmem:[%s10581_s0 + $0x58] sm:$0xff]  }
 0x22b   :  { %2222 = vmatprep.mubr.bf16.mxu0 %v10596_v1  ;;  %6422 = vmatmul.mubr.msk.bf16.vlgmr.msra.gmra.mrb[0].mxu1 %vm277_vm0, %v8156_v21 }
 0x22c   :  { %514 = vmatprep.mubr.bf16.mxu1 %v10596_v1 }
 0x232   :  { %6578 = vmatmul.mubr.msk.bf16.gmra.mrb[8].mxu0 %vm277_vm0, %v8520_v25  ;;  %v8158_v25 = vld [vmem:[%s10581_s0 + $0x60] sm:$0xff]  }
 0x233   :  { %2232 = vmatprep.mubr.bf16.mxu0 %v10596_v1  ;;  %6423 = vmatmul.mubr.msk.bf16.gmra.mrb[4].mxu1 %vm277_vm0, %v8158_v25 }
 0x234   :  { %524 = vmatprep.mubr.bf16.mxu1 %v10596_v1 }
 0x23a   :  { %6579 = vmatmul.mubr.msk.bf16.gmra.mrb[12].mxu0 %vm277_vm0, %v8528_v26  ;;  %v8160_v26 = vld [vmem:[%s10581_s0 + $0x68] sm:$0xff]  }
 0x23b   :  { %2242 = vmatprep.mubr.bf16.mxu0 %v10596_v1  ;;  %6424 = vmatmul.mubr.msk.bf16.gmra.mrb[8].mxu1 %vm277_vm0, %v8160_v26  ;;  %v8184_v26 = vld [vmem:[%s10581_s0 + $0xe0] sm:$0xff]  }
 0x23c   :  { %534 = vmatprep.mubr.bf16.mxu1 %v10596_v1 }
 0x242   :  { %6580 = vmatmul.mubr.msk.bf16.gmra.mrb[16].mxu0 %vm277_vm0, %v8536_v27  ;;  %v8162_v27 = vld [vmem:[%s10581_s0 + $0x70] sm:$0xff]  }
 0x243   :  { %2252 = vmatprep.mubr.bf16.mxu0 %v10596_v1  ;;  %6425 = vmatmul.mubr.msk.bf16.gmra.mrb[12].mxu1 %vm277_vm0, %v8162_v27 }
 0x244   :  { %544 = vmatprep.mubr.bf16.mxu1 %v10596_v1 }
 0x24a   :  { %6581 = vmatmul.mubr.msk.bf16.gmra.mrb[20].mxu0 %vm277_vm0, %v8544_v28  ;;  %v8164_v28 = vld [vmem:[%s10581_s0 + $0x78] sm:$0xff]  }
 0x24b   :  { %2262 = vmatprep.mubr.bf16.mxu0 %v10596_v1  ;;  %6426 = vmatmul.mubr.msk.bf16.gmra.mrb[16].mxu1 %vm277_vm0, %v8164_v28 }
 0x24c   :  { %554 = vmatprep.mubr.bf16.mxu1 %v10596_v1 }
 0x252   :  { %6582 = vmatmul.mubr.msk.bf16.gmra.mrb[24].mxu0 %vm277_vm0, %v8552_v29  ;;  %v8166_v29 = vld [vmem:[%s10581_s0 + $0x80] sm:$0xff]  }
 0x253   :  { %2272 = vmatprep.mubr.bf16.mxu0 %v10596_v1  ;;  %6427 = vmatmul.mubr.msk.bf16.gmra.mrb[20].mxu1 %vm277_vm0, %v8166_v29 }
 0x254   :  { %564 = vmatprep.mubr.bf16.mxu1 %v10596_v1 }
 0x25a   :  { %6583 = vmatmul.mubr.msk.bf16.gmra.mrb[28].mxu0 %vm277_vm0, %v8560_v30  ;;  %v8145_v30 = vld [vmem:[%s10581_s0 + $0x20] sm:$0xff]  }
 0x25b   :  { %2282 = vmatprep.mubr.bf16.mxu0 %v10596_v1 }
 0x262   :  { %6584 = vmatmul.mubr.msk.bf16.gmra.mrb[32].mxu0 %vm277_vm0, %v8568_v31  ;;  %v8168_v31 = vld [vmem:[%s10581_s0 + $0x88] sm:$0xff]  }
 0x263   :  { %2292 = vmatprep.mubr.bf16.mxu0 %v10596_v1  ;;  %6428 = vmatmul.mubr.msk.bf16.gmra.mrb[24].mxu1 %vm277_vm0, %v8168_v31  ;;  %v8188_v31 = vld [vmem:[%s10581_s0 + $0xe8] sm:$0xff]  }
 0x264   :  { %574 = vmatprep.mubr.bf16.mxu1 %v10596_v1 }
 0x26a   :  { %6585 = vmatmul.mubr.msk.bf16.gmra.mrb[36].mxu0 %vm277_vm0, %v8576_v32  ;;  %v8146_v32 = vld [vmem:[%s10581_s0 + $0x28] sm:$0xff]  }
 0x26b   :  { %2302 = vmatprep.mubr.bf16.mxu0 %v10596_v1 }
 0x272   :  { %6586 = vmatmul.mubr.msk.bf16.gmra.mrb[40].mxu0 %vm277_vm0, %v8584_v33  ;;  %v8170_v33 = vld [vmem:[%s10581_s0 + $0x90] sm:$0xff]  }
 0x273   :  { %2312 = vmatprep.mubr.bf16.mxu0 %v10596_v1  ;;  %6429 = vmatmul.mubr.msk.bf16.gmra.mrb[28].mxu1 %vm277_vm0, %v8170_v33 }
 0x274   :  { %584 = vmatprep.mubr.bf16.mxu1 %v10596_v1 }
 0x27a   :  { %6587 = vmatmul.mubr.msk.bf16.gmra.mrb[44].mxu0 %vm277_vm0, %v8592_v34  ;;  %v8147_v34 = vld [vmem:[%s10581_s0 + $0x30] sm:$0xff]  }
 0x27b   :  { %2322 = vmatprep.mubr.bf16.mxu0 %v10596_v1 }
 0x282   :  { %6588 = vmatmul.mubr.msk.bf16.gmra.mrb[48].mxu0 %vm277_vm0, %v8600_v35  ;;  %v8172_v35 = vld [vmem:[%s10581_s0 + $0x98] sm:$0xff]  }
 0x283   :  { %2332 = vmatprep.mubr.bf16.mxu0 %v10596_v1  ;;  %6430 = vmatmul.mubr.msk.bf16.gmra.mrb[32].mxu1 %vm277_vm0, %v8172_v35 }
 0x284   :  { %594 = vmatprep.mubr.bf16.mxu1 %v10596_v1 }
 0x28a   :  { %6589 = vmatmul.mubr.msk.bf16.gmra.mrb[52].mxu0 %vm277_vm0, %v8608_v36  ;;  %v8148_v36 = vld [vmem:[%s10581_s0 + $0x38] sm:$0xff]  }
 0x28b   :  { %2342 = vmatprep.mubr.bf16.mxu0 %v10596_v1 }
 0x292   :  { %6590 = vmatmul.mubr.msk.bf16.gmra.mrb[56].mxu0 %vm277_vm0, %v8619_v38  ;;  %v8174_v38 = vld [vmem:[%s10581_s0 + $0xa0] sm:$0xff]  }
 0x293   :  { %2352 = vmatprep.mubr.bf16.mxu0 %v10596_v1  ;;  %6431 = vmatmul.mubr.msk.bf16.gmra.mrb[36].mxu1 %vm277_vm0, %v8174_v38  ;;  %v8192_v38 = vld [vmem:[%s10581_s0 + $0xf0] sm:$0xff]  }
 0x294   :  { %604 = vmatprep.mubr.bf16.mxu1 %v10596_v1 }
 0x29a   :  { %6591 = vmatmul.mubr.msk.bf16.gmra.mrb[60].mxu0 %vm277_vm0, %v8627_v39  ;;  %v8149_v39 = vld [vmem:[%s10581_s0 + $0x40] sm:$0xff]  }
 0x29b   :  { %2362 = vmatprep.mubr.bf16.mxu0 %v10596_v1 }
 0x2a2   :  { %6592 = vmatmul.mubr.msk.bf16.gmra.mrb[64].mxu0 %vm277_vm0, %v8635_v40  ;;  %v8176_v40 = vld [vmem:[%s10581_s0 + $0xa8] sm:$0xff]  }
 0x2a3   :  { %2372 = vmatprep.mubr.bf16.mxu0 %v10596_v1  ;;  %6432 = vmatmul.mubr.msk.bf16.gmra.mrb[40].mxu1 %vm277_vm0, %v8176_v40 }
 0x2a4   :  { %614 = vmatprep.mubr.bf16.mxu1 %v10596_v1 }
 0x2aa   :  { %6593 = vmatmul.mubr.msk.bf16.gmra.mrb[68].mxu0 %vm277_vm0, %v8643_v41  ;;  %v8150_v41 = vld [vmem:[%s10581_s0 + $0x48] sm:$0xff]  }
 0x2ab   :  { %2382 = vmatprep.mubr.bf16.mxu0 %v10596_v1 }
 0x2b2   :  { %6594 = vmatmul.mubr.msk.bf16.gmra.mrb[72].mxu0 %vm277_vm0, %v8651_v42  ;;  %v8178_v42 = vld [vmem:[%s10581_s0 + $0xb0] sm:$0xff]  }
 0x2b3   :  { %2392 = vmatprep.mubr.bf16.mxu0 %v10596_v1  ;;  %6433 = vmatmul.mubr.msk.bf16.gmra.mrb[44].mxu1 %vm277_vm0, %v8178_v42 }
 0x2b4   :  { %624 = vmatprep.mubr.bf16.mxu1 %v10596_v1 }
 0x2ba   :  { %6595 = vmatmul.mubr.msk.bf16.gmra.mrb[76].mxu0 %vm277_vm0, %v8659_v43  ;;  %v8151_v43 = vld [vmem:[%s10581_s0 + $0x50] sm:$0xff]  }
 0x2bb   :  { %2402 = vmatprep.mubr.bf16.mxu0 %v10596_v1 }
 0x2c2   :  { %6596 = vmatmul.mubr.msk.bf16.gmra.mrb[80].mxu0 %vm277_vm0, %v8667_v44  ;;  %v8180_v44 = vld [vmem:[%s10581_s0 + $0xb8] sm:$0xff]  }
 0x2c3   :  { %2412 = vmatprep.mubr.bf16.mxu0 %v10596_v1  ;;  %6434 = vmatmul.mubr.msk.bf16.gmra.mrb[48].mxu1 %vm277_vm0, %v8180_v44 }
 0x2c4   :  { %634 = vmatprep.mubr.bf16.mxu1 %v10596_v1 }
 0x2ca   :  { %6597 = vmatmul.mubr.msk.bf16.gmra.mrb[84].mxu0 %vm277_vm0, %v8675_v45  ;;  %v8152_v45 = vld [vmem:[%s10581_s0 + $0x58] sm:$0xff]  }
 0x2cb   :  { %2422 = vmatprep.mubr.bf16.mxu0 %v10596_v1 }
 0x2d2   :  { %6598 = vmatmul.mubr.msk.bf16.gmra.mrb[88].mxu0 %vm277_vm0, %v8683_v46  ;;  %v8182_v46 = vld [vmem:[%s10581_s0 + $0xc0] sm:$0xff]  }
 0x2d3   :  { %2432 = vmatprep.mubr.bf16.mxu0 %v10596_v1  ;;  %6435 = vmatmul.mubr.msk.bf16.gmra.mrb[52].mxu1 %vm277_vm0, %v8182_v46 }
 0x2d4   :  { %644 = vmatprep.mubr.bf16.mxu1 %v10596_v1 }
 0x2da   :  { %6599 = vmatmul.mubr.msk.bf16.gmra.mrb[92].mxu0 %vm277_vm0, %v8691_v47  ;;  %v8183_v47 = vld [vmem:[%s10582_s3] sm:$0xff]  }
 0x2db   :  { %2442 = vmatprep.mubr.bf16.mxu0 %v10596_v1  ;;  %3653 = vmatpush1.bf16.msra.mxu1 %v8183_v47 }
 0x2dc   :  { %3654 = vmatprep.subr.bf16.mxu1 %v10596_v1 }
 0x2e2   :  { %6600 = vmatmul.mubr.msk.bf16.gmra.mrb[96].mxu0 %vm277_vm0, %v8699_v48  ;;  %v8153_v48 = vld [vmem:[%s10581_s0 + $0x60] sm:$0xff]  }
 0x2e3   :  { %2452 = vmatprep.mubr.bf16.mxu0 %v10596_v1 }
 0x2ea   :  { %6601 = vmatmul.mubr.msk.bf16.gmra.mrb[100].mxu0 %vm277_vm0, %v8707_v49  ;;  %v8185_v49 = vld [vmem:[%s10582_s3 + $0x8] sm:$0xff]  }
 0x2eb   :  { %2462 = vmatprep.mubr.bf16.mxu0 %v10596_v1  ;;  %3655 = vmatpush1.bf16.msra.mxu1 %v8185_v49  ;;  %v8196_v49 = vld [vmem:[%s10581_s0 + $0xf8] sm:$0xff]  }
 0x2ec   :  { %3656 = vmatprep.subr.bf16.mxu1 %v10596_v1 }
 0x2f2   :  { %6602 = vmatmul.mubr.msk.bf16.gmra.mrb[104].mxu0 %vm277_vm0, %v8715_v50  ;;  %v8186_v50 = vld [vmem:[%s10581_s0 + $0xc8] sm:$0xff]  }
 0x2f3   :  { %2472 = vmatprep.mubr.bf16.mxu0 %v10596_v1  ;;  %6436 = vmatmul.mubr.msk.bf16.gmra.mrb[56].mxu1 %vm277_vm0, %v8186_v50 }
 0x2f4   :  { %654 = vmatprep.mubr.bf16.mxu1 %v10596_v1 }
 0x2fa   :  { %6603 = vmatmul.mubr.msk.bf16.gmra.mrb[108].mxu0 %vm277_vm0, %v8723_v51  ;;  %v8187_v51 = vld [vmem:[%s10582_s3 + $0x10] sm:$0xff]  }
 0x2fb   :  { %2820 = vmatprep.mubr.bf16.mxu0 %v10596_v1  ;;  %3657 = vmatpush1.bf16.msra.mxu1 %v8187_v51 }
 0x2fc   :  { %3658 = vmatprep.subr.bf16.mxu1 %v10596_v1  ;;  %6437 = vmatmul.mubr.msk.bf16.gmra.mrb[60].mxu1 %vm277_vm0, %v8190_v55 }
 0x2fd   :  { %664 = vmatprep.mubr.bf16.mxu1 %v10596_v1 }
 0x2fe   :  { %v9217_v14 = vpop.f32.mrb[0].mxu1 }
 0x2ff   :  { %3659 = vmatpush1.bf16.msra.mxu1 %v8189_v54  ;;  %v9219_v15 = vpop.f32.mrb[1].mxu1 }
 0x300   :  { %3660 = vmatprep.subr.bf16.mxu1 %v10596_v1  ;;  %v9222_v16 = vpop.f32.mrb[2].mxu1 }
 0x301   :  { %v9225_v17 = vpop.f32.mrb[3].mxu1 }
 0x302   :  { %6640 = vmatmul.mubr.msk.bf16.vlgmr.msra.gmra.mrb[0].mxu0 %vm277_vm0, %v8145_v30 }
 0x303   :  { %2830 = vmatprep.mubr.bf16.mxu0 %v10596_v1  ;;  %3661 = vmatpush1.bf16.msra.mxu1 %v8191_v56 }
 0x304   :  { %3662 = vmatprep.subr.bf16.mxu1 %v10596_v1  ;;  %6438 = vmatmul.mubr.msk.bf16.gmra.mrb[64].mxu1 %vm277_vm0, %v8194_v59 }
 0x306   :  { %v9230_v19 = vpop.f32.mrb[4].mxu1 }
 0x307   :  { %3663 = vmatpush1.bf16.msra.mxu1 %v8193_v58  ;;  %v9232_v20 = vpop.f32.mrb[5].mxu1 }
 0x308   :  { %3664 = vmatprep.subr.bf16.mxu1 %v10596_v1  ;;  %v9235_v22 = vpop.f32.mrb[6].mxu1 }
 0x309   :  { %v9238_v23 = vpop.f32.mrb[7].mxu1 }
 0x30a   :  { %6641 = vmatmul.mubr.msk.bf16.gmra.mrb[4].mxu0 %vm277_vm0, %v8146_v32 }
 0x30b   :  { %2840 = vmatprep.mubr.bf16.mxu0 %v10596_v1  ;;  %3665 = vmatpush1.bf16.msra.mxu1 %v8195_v60 }
 0x30c   :  { %3666 = vmatprep.subr.bf16.mxu1 %v10596_v1 }
 0x30e   :  { %v9243_v37 = vpop.f32.mrb[8].mxu1 }
 0x30f   :  { %3667 = vmatpush1.bf16.msra.mxu1 %v8197_v62  ;;  %v9245_v52 = vpop.f32.mrb[9].mxu1 }
 0x310   :  { %3668 = vmatprep.subr.bf16.mxu1 %v10596_v1  ;;  %v9248_v21 = vpop.f32.mrb[10].mxu1 }
 0x311   :  { %v9251_v25 = vpop.f32.mrb[11].mxu1 }
 0x312   :  { %6642 = vmatmul.mubr.msk.bf16.gmra.mrb[8].mxu0 %vm277_vm0, %v8147_v34 }
 0x313   :  { %2850 = vmatprep.mubr.bf16.mxu0 %v10596_v1  ;;  %3669 = vmatpush1.bf16.msra.mxu1 %v8198_v63 }
 0x314   :  { %3670 = vmatprep.subr.bf16.mxu1 %v10596_v1 }
 0x316   :  { %v9256_v27 = vpop.f32.mrb[12].mxu1 }
 0x317   :  { %3671 = vmatpush1.bf16.msra.mxu1 %v8199_v2  ;;  %v9258_v28 = vpop.f32.mrb[13].mxu1 }
 0x318   :  { %3672 = vmatprep.subr.bf16.mxu1 %v10596_v1  ;;  %v9261_v29 = vpop.f32.mrb[14].mxu1 }
 0x319   :  { %v9264_v30 = vpop.f32.mrb[15].mxu1 }
 0x31a   :  { %6643 = vmatmul.mubr.msk.bf16.gmra.mrb[12].mxu0 %vm277_vm0, %v8148_v36  ;;  %v47_v36 = vlaneseq }
 0x31b   :  { %2860 = vmatprep.mubr.bf16.mxu0 %v10596_v1  ;;  %3673 = vmatpush1.bf16.msra.mxu1 %v3650_v5 }
 0x31c   :  { %3885 = vmatprep.subr.bf16.mxu1 %v10596_v1 }
 0x31e   :  { %v9269_v32 = vpop.f32.mrb[16].mxu1 }
 0x31f   :  { %v9271_v33 = vpop.f32.mrb[17].mxu1 }
 0x320   :  { %v9274_v34 = vpop.f32.mrb[18].mxu1 }
 0x321   :  { %v9277_v35 = vpop.f32.mrb[19].mxu1 }
 0x322   :  { %6644 = vmatmul.mubr.msk.bf16.gmra.mrb[16].mxu0 %vm277_vm0, %v8149_v39  ;;  %v9282_v39 = vshrl.u32 %v47_v36, 7 }
 0x323   :  { %2870 = vmatprep.mubr.bf16.mxu0 %v10596_v1 }
 0x324   :  { %10610 = vst [vmem:[#allocation2_spill] sm:$0xff] %v9282_v39  ;;  %v10595_v44 = vsub.s32 0, %v9282_v39  ;;  %v10594_v47 = vsub.s32 1, %v9282_v39  ;;  %v10616_v39 = vmov 0  }
 0x326   :  { %v9284_v40 = vpop.f32.mrb[20].mxu1 }
 0x32a   :  { %6645 = vmatmul.mubr.msk.bf16.gmra.mrb[20].mxu0 %vm277_vm0, %v8150_v41  ;;  %v9286_v41 = vpop.f32.mrb[21].mxu1 }
 0x32b   :  { %2880 = vmatprep.mubr.bf16.mxu0 %v10596_v1  ;;  %v9289_v42 = vpop.f32.mrb[22].mxu1 }
 0x332   :  { %6646 = vmatmul.mubr.msk.bf16.gmra.mrb[24].mxu0 %vm277_vm0, %v8151_v43  ;;  %v9292_v43 = vpop.f32.mrb[23].mxu1 }
 0x333   :  { %2890 = vmatprep.mubr.bf16.mxu0 %v10596_v1 }
 0x336   :  { %v9306_v54 = vpop.f32.mrb[24].mxu1 }
 0x337   :  { %v9312_v56 = vpop.f32.mrb[25].mxu1 }
 0x33a   :  { %6647 = vmatmul.mubr.msk.bf16.gmra.mrb[28].mxu0 %vm277_vm0, %v8152_v45  ;;  %v45_v45 = vld [vmem:[%s10583_s2] sm:$0x3] }
 0x33b   :  { %2900 = vmatprep.mubr.bf16.mxu0 %v10596_v1  ;;  %v9304_v51 = vrot.slane %v45_v45, %v10595_v44  ;;  %v9310_v55 = vrot.slane %v45_v45, %v10594_v47 }
 0x342   :  { %6648 = vmatmul.mubr.msk.bf16.gmra.mrb[32].mxu0 %vm277_vm0, %v8153_v48 }
 0x343   :  { %2910 = vmatprep.mubr.bf16.mxu0 %v10596_v1 }
 0x34a   :  { %6649 = vmatmul.mubr.msk.bf16.gmra.mrb[36].mxu0 %vm277_vm0, %v8154_v53 }
 0x34b   :  { %2920 = vmatprep.mubr.bf16.mxu0 %v10596_v1 }
 0x352   :  { %6650 = vmatmul.mubr.msk.bf16.gmra.mrb[40].mxu0 %vm277_vm0, %v8155_v57  ;;  %v9315_v57 = vpop.f32.mrb[26].mxu1 }
 0x353   :  { %2930 = vmatprep.mubr.bf16.mxu0 %v10596_v1  ;;  %v9317_v58 = vpop.f32.mrb[27].mxu1 }
 0x35a   :  { %6651 = vmatmul.mubr.msk.bf16.gmra.mrb[44].mxu0 %vm277_vm0, %v8157_v61 }
 0x35b   :  { %2940 = vmatprep.mubr.bf16.mxu0 %v10596_v1 }
 0x362   :  { %6652 = vmatmul.mubr.msk.bf16.gmra.mrb[48].mxu0 %vm277_vm0, %v8159_v0 }
 0x363   :  { %2950 = vmatprep.mubr.bf16.mxu0 %v10596_v1 }
 0x36a   :  { %6653 = vmatmul.mubr.msk.bf16.gmra.mrb[52].mxu0 %vm277_vm0, %v8161_v4 }
 0x36b   :  { %2960 = vmatprep.mubr.bf16.mxu0 %v10596_v1 }
 0x372   :  { %6654 = vmatmul.mubr.msk.bf16.gmra.mrb[56].mxu0 %vm277_vm0, %v8163_v6 }
 0x373   :  { %2970 = vmatprep.mubr.bf16.mxu0 %v10596_v1 }
 0x37a   :  { %6655 = vmatmul.mubr.msk.bf16.gmra.mrb[60].mxu0 %vm277_vm0, %v8165_v7 }
 0x37b   :  { %2980 = vmatprep.mubr.bf16.mxu0 %v10596_v1 }
 0x382   :  { %6656 = vmatmul.mubr.msk.bf16.gmra.mrb[64].mxu0 %vm277_vm0, %v8167_v8 }
 0x383   :  { %2990 = vmatprep.mubr.bf16.mxu0 %v10596_v1 }
 0x38a   :  { %6657 = vmatmul.mubr.msk.bf16.gmra.mrb[68].mxu0 %vm277_vm0, %v8169_v9  ;;  %v9326_v9 = vpop.f32.mrb[28].mxu1 }
 0x38b   :  { %3000 = vmatprep.mubr.bf16.mxu0 %v10596_v1 }
 0x392   :  { %6658 = vmatmul.mubr.msk.bf16.gmra.mrb[72].mxu0 %vm277_vm0, %v8171_v10 }
 0x393   :  { %3010 = vmatprep.mubr.bf16.mxu0 %v10596_v1 }
 0x39a   :  { %6659 = vmatmul.mubr.msk.bf16.gmra.mrb[76].mxu0 %vm277_vm0, %v8173_v11 }
 0x39b   :  { %3020 = vmatprep.mubr.bf16.mxu0 %v10596_v1 }
 0x3a2   :  { %6660 = vmatmul.mubr.msk.bf16.gmra.mrb[80].mxu0 %vm277_vm0, %v8175_v12 }
 0x3a3   :  { %3030 = vmatprep.mubr.bf16.mxu0 %v10596_v1 }
 0x3aa   :  { %6661 = vmatmul.mubr.msk.bf16.gmra.mrb[84].mxu0 %vm277_vm0, %v8177_v13  ;;  %v9329_v13 = vpop.f32.mrb[29].mxu1 }
 0x3ab   :  { %3040 = vmatprep.mubr.bf16.mxu0 %v10596_v1 }
 0x3b2   :  { %6662 = vmatmul.mubr.msk.bf16.gmra.mrb[88].mxu0 %vm277_vm0, %v8179_v18 }
 0x3b3   :  { %3050 = vmatprep.mubr.bf16.mxu0 %v10596_v1 }
 0x3ba   :  { %6663 = vmatmul.mubr.msk.bf16.gmra.mrb[92].mxu0 %vm277_vm0, %v8181_v24 }
 0x3bb   :  { %3060 = vmatprep.mubr.bf16.mxu0 %v10596_v1 }
 0x3c2   :  { %6664 = vmatmul.mubr.msk.bf16.gmra.mrb[96].mxu0 %vm277_vm0, %v8184_v26 }
 0x3c3   :  { %3070 = vmatprep.mubr.bf16.mxu0 %v10596_v1 }
 0x3ca   :  { %6665 = vmatmul.mubr.msk.bf16.gmra.mrb[100].mxu0 %vm277_vm0, %v8188_v31  ;;  %v9331_v31 = vpop.f32.mrb[30].mxu1 }
 0x3cb   :  { %3080 = vmatprep.mubr.bf16.mxu0 %v10596_v1 }
 0x3d2   :  { %6666 = vmatmul.mubr.msk.bf16.gmra.mrb[104].mxu0 %vm277_vm0, %v8192_v38 }
 0x3d3   :  { %3090 = vmatprep.mubr.bf16.mxu0 %v10596_v1 }
 0x3d5   :  { %v2822_v46 = vpop.f32.mrb[0].mxu0 }
 0x3d6   :  { %v2824_v48 = vpop.f32.mrb[1].mxu0  ;;  %v7266_v59 = vadd.f32 %v2822_v46, %v9304_v51  ;;  %v9333_v46 = vpop.f32.mrb[31].mxu1 }
 0x3d7   :  { %v2826_v50 = vpop.f32.mrb[2].mxu0  ;;  %v7267_v60 = vadd.f32 %v2824_v48, %v9310_v55 }
 0x3d8   :  { %v2828_v53 = vpop.f32.mrb[3].mxu0  ;;  %v7268_v62 = vadd.f32 %v2826_v50, %v9304_v51  ;;  %v3325_v5 = vmax.f32 %v7266_v59, 0.0 }
 0x3d9   :  { %v7269_v2 = vadd.f32 %v2828_v53, %v9310_v55  ;;  %v3326_v10 = vmax.f32 %v7267_v60, 0.0 }
 0x3da   :  { %6667 = vmatmul.mubr.msk.bf16.gmra.mrb[108].mxu0 %vm277_vm0, %v8196_v49  ;;  %v3327_v18 = vmax.f32 %v7268_v62, 0.0  ;;  %v8201_v62 = vld [vmem:[%s10582_s3 + $0x54] sm:$0xff]  }
 0x3db   :  { %v3328_v36 = vmax.f32 %v7269_v2, 0.0 }
 0x3dd   :  { %v2832_v61 = vpop.f32.mrb[4].mxu0 }
 0x3de   :  { %v7270_v63 = vadd.f32 %v2832_v61, %v9304_v51  ;;  %v2834_v0 = vpop.f32.mrb[5].mxu0 }
 0x3df   :  { %v7271_v3 = vadd.f32 %v2834_v0, %v9310_v55  ;;  %v2836_v4 = vpop.f32.mrb[6].mxu0  ;;  %v9342_v0 = vpop.f32.mrb[32].mxu1 }
 0x3e0   :  { %v3329_v6 = vmax.f32 %v7270_v63, 0.0  ;;  %v7272_v7 = vadd.f32 %v2836_v4, %v9304_v51  ;;  %v2838_v8 = vpop.f32.mrb[7].mxu0  ;;  %v9346_v2 = vpop.f32.mrb[33].mxu1  ;;  %v8202_v4 = vld [vmem:[%s10582_s3 + $0x5c] sm:$0xff]  }
 0x3e1   :  { %v3330_v11 = vmax.f32 %v7271_v3, 0.0  ;;  %v7273_v12 = vadd.f32 %v2838_v8, %v9310_v55  ;;  %v9349_v3 = vpop.f32.mrb[34].mxu1 }
 0x3e2   :  { %v3437_v24 = vmax.f32 %v3325_v5, %v3329_v6  ;;  %v3331_v26 = vmax.f32 %v7272_v7, 0.0  ;;  %v9354_v5 = vpop.f32.mrb[35].mxu1 }
 0x3e3   :  { %v3438_v38 = vmax.f32 %v3326_v10, %v3330_v11  ;;  %v3332_v45 = vmax.f32 %v7273_v12, 0.0 }
 0x3e4   :  { %v3439_v48 = vmax.f32 %v3327_v18, %v3331_v26 }
 0x3e5   :  { %v3440_v49 = vmax.f32 %v3328_v36, %v3332_v45  ;;  %v2842_v50 = vpop.f32.mrb[8].mxu0  ;;  %v8203_v36 = vld [vmem:[%s10582_s3 + $0x64] sm:$0xff]  }
 0x3e6   :  { %v9335_v53 = vpack.c.bf16 %v3439_v48, %v3437_v24  ;;  %v2844_v59 = vpop.f32.mrb[9].mxu0  ;;  %v7274_v6 = vadd.f32 %v2842_v50, %v9304_v51  ;;  %v9368_v50 = vpop.f32.mrb[36].mxu1 }
 0x3e7   :  { %v9337_v60 = vpack.c.bf16 %v3440_v49, %v3438_v38  ;;  %v2846_v61 = vpop.f32.mrb[10].mxu0  ;;  %v7275_v7 = vadd.f32 %v2844_v59, %v9310_v55 }
 0x3e8   :  { %10611 = vst [vmem:[#allocation3_spill] sm:$0xff] %v9335_v53  ;;  %v2848_v63 = vpop.f32.mrb[11].mxu0  ;;  %v7276_v10 = vadd.f32 %v2846_v61, %v9304_v51  ;;  %v3333_v38 = vmax.f32 %v7274_v6, 0.0 }
 0x3e9   :  { %10612 = vst [vmem:[#allocation4_spill] sm:$0xff] %v9337_v60  ;;  %6679 = vmatprep.mubr.msk.bf16.mxu1 %vm3605_vm2, %v9337_v60  ;;  %v7277_v18 = vadd.f32 %v2848_v63, %v9310_v55  ;;  %v3334_v59 = vmax.f32 %v7275_v7, 0.0  ;;  %v9371_v63 = vpop.f32.mrb[37].mxu1 }
 0x3ea   :  { %3685 = vmatmul.mubr.bf16.vlgmr.msra.gmra.mrb[68].mxu1 %v9335_v53  ;;  %10613 = vst [vmem:[#allocation5_spill] sm:$0xff] %v9371_v63  ;;  %v9373_v47 = vpop.f32.mrb[38].mxu1 }
 0x3eb   :  { %3886 = vmatpush1.bf16.msra.mxu1 %v8201_v62  ;;  %10614 = vst [vmem:[#allocation6_spill] sm:$0xff] %v9373_v47  ;;  %v3336_v6 = vmax.f32 %v7277_v18, 0.0  ;;  %v8204_v18 = vld [vmem:[%s10582_s3 + $0x6c] sm:$0xff]  }
 0x3ec   :  { %3887 = vmatprep.subr.bf16.mxu1 %v10596_v1 }
 0x3ed   :  { %v2852_v8 = vpop.f32.mrb[12].mxu0 }
 0x3ee   :  { %v7278_v11 = vadd.f32 %v2852_v8, %v9304_v51  ;;  %v2854_v12 = vpop.f32.mrb[13].mxu0 }
 0x3ef   :  { %v7279_v24 = vadd.f32 %v2854_v12, %v9310_v55  ;;  %v2856_v26 = vpop.f32.mrb[14].mxu0  ;;  %3888 = vmatpush1.bf16.msra.mxu1 %v8202_v4  ;;  %v3335_v4 = vmax.f32 %v7276_v10, 0.0 }
 0x3f0   :  { %v3337_v45 = vmax.f32 %v7278_v11, 0.0  ;;  %v7280_v48 = vadd.f32 %v2856_v26, %v9304_v51  ;;  %v2858_v49 = vpop.f32.mrb[15].mxu0  ;;  %3889 = vmatprep.subr.bf16.mxu1 %v10596_v1  ;;  %v9375_v26 = vpop.f32.mrb[39].mxu1 }
 0x3f1   :  { %v3338_v61 = vmax.f32 %v7279_v24, 0.0  ;;  %v7281_v62 = vadd.f32 %v2858_v49, %v9310_v55  ;;  %10615 = vst [vmem:[#allocation7_spill] sm:$0xff] %v9375_v26 }
 0x3f2   :  { %v3441_v8 = vmax.f32 %v3333_v38, %v3337_v45  ;;  %v3339_v12 = vmax.f32 %v7280_v48, 0.0  ;;  %v9385_v45 = vpop.f32.mrb[40].mxu1  ;;  %v8205_v48 = vld [vmem:[%s10582_s3 + $0x74] sm:$0xff]  }
 0x3f3   :  { %v3442_v11 = vmax.f32 %v3334_v59, %v3338_v61  ;;  %v3340_v44 = vmax.f32 %v7281_v62, 0.0  ;;  %3890 = vmatpush1.bf16.msra.mxu1 %v8203_v36  ;;  %10619 = vst [vmem:[#allocation10_spill] sm:$0xff] %v9385_v45  ;;  %v9389_v36 = vpop.f32.mrb[41].mxu1 }
 0x3f4   :  { %v3443_v1 = vmax.f32 %v3335_v4, %v3339_v12  ;;  %3891 = vmatprep.subr.bf16.mxu1 %v10616_v39  ;;  %10620 = vst [vmem:[#allocation11_spill] sm:$0xff] %v9389_v36 }
 0x3f5   :  { %v3444_v7 = vmax.f32 %v3336_v6, %v3340_v44  ;;  %v2862_v24 = vpop.f32.mrb[16].mxu0 }
 0x3f6   :  { %v2864_v53 = vpop.f32.mrb[17].mxu0  ;;  %v9378_v49 = vpack.c.bf16 %v3443_v1, %v3441_v8  ;;  %v9392_v1 = vpop.f32.mrb[42].mxu1  ;;  %v7282_v59 = vadd.f32 %v2862_v24, %v9304_v51 }
 0x3f7   :  { %v9380_v60 = vpack.c.bf16 %v3444_v7, %v3442_v11  ;;  %v2866_v10 = vpop.f32.mrb[18].mxu0  ;;  %3892 = vmatpush1.bf16.msra.mxu1 %v8204_v18  ;;  %10621 = vst [vmem:[#allocation12_spill] sm:$0xff] %v9392_v1  ;;  %v9395_v44 = vpop.f32.mrb[43].mxu1  ;;  %v7283_v61 = vadd.f32 %v2864_v53, %v9310_v55 }
 0x3f8   :  { %10617 = vst [vmem:[#allocation8_spill] sm:$0xff] %v9378_v49  ;;  %v2868_v38 = vpop.f32.mrb[19].mxu0  ;;  %3893 = vmatprep.subr.bf16.mxu1 %v10616_v39  ;;  %10622 = vst [vmem:[#allocation13_spill] sm:$0xff] %v9395_v44  ;;  %v7284_v4 = vadd.f32 %v2866_v10, %v9304_v51  ;;  %v3341_v18 = vmax.f32 %v7282_v59, 0.0  ;;  %v9408_v53 = vpop.f32.mrb[44].mxu1 }
 0x3f9   :  { %10618 = vst [vmem:[#allocation9_spill] sm:$0xff] %v9380_v60  ;;  %6680 = vmatprep.mubr.msk.bf16.mxu1 %vm3605_vm2, %v9380_v60  ;;  %v7285_v6 = vadd.f32 %v2868_v38, %v9310_v55  ;;  %10623 = vst [vmem:[#allocation14_spill] sm:$0xff] %v9408_v53 }
 0x3fa   :  { %3693 = vmatmul.mubr.bf16.gmra.mrb[72].mxu1 %v9378_v49  ;;  %v3343_v1 = vmax.f32 %v7284_v4, 0.0 }
 0x3fb   :  { %3894 = vmatpush1.bf16.msra.mxu1 %v8205_v48  ;;  %v3342_v48 = vmax.f32 %v7283_v61, 0.0 }
 0x3fc   :  { %3895 = vmatprep.subr.bf16.mxu1 %v10616_v39 }
 0x3fd   :  { %v2872_v62 = vpop.f32.mrb[20].mxu0 }
 0x3fe   :  { %v7286_v8 = vadd.f32 %v2872_v62, %v9304_v51  ;;  %v2874_v12 = vpop.f32.mrb[21].mxu0  ;;  %v9411_v62 = vpop.f32.mrb[45].mxu1 }
 0x3ff   :  { %v7287_v11 = vadd.f32 %v2874_v12, %v9310_v55  ;;  %v2876_v7 = vpop.f32.mrb[22].mxu0  ;;  %10624 = vst [vmem:[#allocation15_spill] sm:$0xff] %v9411_v62  ;;  %v9413_v38 = vpop.f32.mrb[46].mxu1  ;;  %v3344_v12 = vmax.f32 %v7285_v6, 0.0 }
 0x400   :  { %v3345_v49 = vmax.f32 %v7286_v8, 0.0  ;;  %v7288_v24 = vadd.f32 %v2876_v7, %v9304_v51  ;;  %v2878_v60 = vpop.f32.mrb[23].mxu0  ;;  %10625 = vst [vmem:[#allocation16_spill] sm:$0xff] %v9413_v38  ;;  %v9415_v8 = vpop.f32.mrb[47].mxu1 }
 0x401   :  { %v3346_v44 = vmax.f32 %v7287_v11, 0.0  ;;  %v7289_v10 = vadd.f32 %v2878_v60, %v9310_v55  ;;  %10626 = vst [vmem:[#allocation17_spill] sm:$0xff] %v9415_v8  ;;  %v9421_v4 = vpop.f32.mrb[48].mxu1 }
 0x402   :  { %v3445_v36 = vmax.f32 %v3341_v18, %v3345_v49  ;;  %v3347_v45 = vmax.f32 %v7288_v24, 0.0  ;;  %10629 = vst [vmem:[#allocation20_spill] sm:$0xff] %v9421_v4  ;;  %v8206_v49 = vld [vmem:[%s10582_s3 + $0x7c] sm:$0xff]  }
 0x403   :  { %v3446_v26 = vmax.f32 %v3342_v48, %v3346_v44  ;;  %v3348_v59 = vmax.f32 %v7289_v10, 0.0  ;;  %v9428_v44 = vpop.f32.mrb[49].mxu1  ;;  %3896 = vmatpush1.bf16.msra.mxu1 %v8206_v49 }
 0x404   :  { %v3447_v7 = vmax.f32 %v3343_v1, %v3347_v45  ;;  %10630 = vst [vmem:[#allocation21_spill] sm:$0xff] %v9428_v44  ;;  %v9431_v45 = vpop.f32.mrb[50].mxu1  ;;  %3897 = vmatprep.subr.bf16.mxu1 %v10616_v39 }
 0x405   :  { %v3448_v47 = vmax.f32 %v3344_v12, %v3348_v59  ;;  %v2882_v63 = vpop.f32.mrb[24].mxu0  ;;  %10631 = vst [vmem:[#allocation22_spill] sm:$0xff] %v9431_v45 }
 0x406   :  { %v2884_v53 = vpop.f32.mrb[25].mxu0  ;;  %v9417_v61 = vpack.c.bf16 %v3447_v7, %v3445_v36 }
 0x407   :  { %v9419_v11 = vpack.c.bf16 %v3448_v47, %v3446_v26  ;;  %v2886_v60 = vpop.f32.mrb[26].mxu0  ;;  %v9433_v47 = vpop.f32.mrb[51].mxu1  ;;  %v7290_v26 = vadd.f32 %v2882_v63, %v9304_v51  ;;  %v7291_v36 = vadd.f32 %v2884_v53, %v9310_v55 }
 0x408   :  { %10627 = vst [vmem:[#allocation18_spill] sm:$0xff] %v9417_v61  ;;  %v2888_v62 = vpop.f32.mrb[27].mxu0  ;;  %10632 = vst [vmem:[#allocation23_spill] sm:$0xff] %v9433_v47  ;;  %v7292_v6 = vadd.f32 %v2886_v60, %v9304_v51 }
 0x409   :  { %10628 = vst [vmem:[#allocation19_spill] sm:$0xff] %v9419_v11  ;;  %6681 = vmatprep.mubr.msk.bf16.mxu1 %vm3605_vm2, %v9419_v11  ;;  %v7293_v48 = vadd.f32 %v2888_v62, %v9310_v55  ;;  %v3349_v59 = vmax.f32 %v7290_v26, 0.0  ;;  %v3350_v11 = vmax.f32 %v7291_v36, 0.0 }
 0x40a   :  { %3701 = vmatmul.mubr.bf16.gmra.mrb[76].mxu1 %v9417_v61  ;;  %v9443_v61 = vpop.f32.mrb[52].mxu1 }
 0x40b   :  { %10633 = vst [vmem:[#allocation24_spill] sm:$0xff] %v9443_v61  ;;  %v9446_v60 = vpop.f32.mrb[53].mxu1 }
 0x40c   :  { %10634 = vst [vmem:[#allocation25_spill] sm:$0xff] %v9446_v60  ;;  %v9448_v62 = vpop.f32.mrb[54].mxu1 }
 0x40d   :  { %v2892_v1 = vpop.f32.mrb[28].mxu0  ;;  %10635 = vst [vmem:[#allocation26_spill] sm:$0xff] %v9448_v62 }
 0x40e   :  { %v7294_v18 = vadd.f32 %v2892_v1, %v9304_v51  ;;  %v2894_v24 = vpop.f32.mrb[29].mxu0  ;;  %v3351_v1 = vmax.f32 %v7292_v6, 0.0  ;;  %v8207_v6 = vld [vmem:[%s10582_s3 + $0x84] sm:$0xff]  }
 0x40f   :  { %v7295_v10 = vadd.f32 %v2894_v24, %v9310_v55  ;;  %v2896_v12 = vpop.f32.mrb[30].mxu0  ;;  %v3352_v24 = vmax.f32 %v7293_v48, 0.0  ;;  %3898 = vmatpush1.bf16.msra.mxu1 %v8207_v6 }
 0x410   :  { %v3353_v7 = vmax.f32 %v7294_v18, 0.0  ;;  %v7296_v49 = vadd.f32 %v2896_v12, %v9304_v51  ;;  %v2898_v63 = vpop.f32.mrb[31].mxu0  ;;  %v9450_v18 = vpop.f32.mrb[55].mxu1  ;;  %3899 = vmatprep.subr.bf16.mxu1 %v10616_v39 }
 0x411   :  { %v3354_v53 = vmax.f32 %v7295_v10, 0.0  ;;  %v7297_v47 = vadd.f32 %v2898_v63, %v9310_v55  ;;  %10636 = vst [vmem:[#allocation27_spill] sm:$0xff] %v9450_v18 }
 0x412   :  { %v3449_v45 = vmax.f32 %v3349_v59, %v3353_v7  ;;  %v3355_v44 = vmax.f32 %v7296_v49, 0.0  ;;  %v9459_v7 = vpop.f32.mrb[56].mxu1 }
 0x413   :  { %v3450_v4 = vmax.f32 %v3350_v11, %v3354_v53  ;;  %v3356_v26 = vmax.f32 %v7297_v47, 0.0  ;;  %10639 = vst [vmem:[#allocation30_spill] sm:$0xff] %v9459_v7  ;;  %v9463_v11 = vpop.f32.mrb[57].mxu1 }
 0x414   :  { %v3451_v12 = vmax.f32 %v3351_v1, %v3355_v44  ;;  %10640 = vst [vmem:[#allocation31_spill] sm:$0xff] %v9463_v11 }
 0x415   :  { %v3452_v8 = vmax.f32 %v3352_v24, %v3356_v26  ;;  %v2902_v38 = vpop.f32.mrb[32].mxu0 }
 0x416   :  { %v2904_v61 = vpop.f32.mrb[33].mxu0  ;;  %v9452_v36 = vpack.c.bf16 %v3451_v12, %v3449_v45  ;;  %v7298_v45 = vadd.f32 %v2902_v38, %v9304_v51 }
 0x417   :  { %v9454_v10 = vpack.c.bf16 %v3452_v8, %v3450_v4  ;;  %v2906_v63 = vpop.f32.mrb[34].mxu0  ;;  %v9467_v8 = vpop.f32.mrb[58].mxu1  ;;  %v8208_v4 = vld [vmem:[%s10582_s3 + $0x8c] sm:$0xff]   ;;  %v7299_v47 = vadd.f32 %v2904_v61, %v9310_v55 }
 0x418   :  { %10637 = vst [vmem:[#allocation28_spill] sm:$0xff] %v9452_v36  ;;  %v2908_v59 = vpop.f32.mrb[35].mxu0  ;;  %10641 = vst [vmem:[#allocation32_spill] sm:$0xff] %v9467_v8  ;;  %v9472_v44 = vpop.f32.mrb[59].mxu1  ;;  %3900 = vmatpush1.bf16.msra.mxu1 %v8208_v4  ;;  %v7300_v49 = vadd.f32 %v2906_v63, %v9304_v51  ;;  %v3357_v6 = vmax.f32 %v7298_v45, 0.0 }
 0x419   :  { %10638 = vst [vmem:[#allocation29_spill] sm:$0xff] %v9454_v10  ;;  %6682 = vmatprep.mubr.msk.bf16.mxu1 %vm3605_vm2, %v9454_v10  ;;  %10642 = vst [vmem:[#allocation33_spill] sm:$0xff] %v9472_v44  ;;  %3901 = vmatprep.subr.bf16.mxu1 %v10616_v39  ;;  %v7301_v24 = vadd.f32 %v2908_v59, %v9310_v55  ;;  %v9482_v61 = vpop.f32.mrb[60].mxu1  ;;  %v3358_v4 = vmax.f32 %v7299_v47, 0.0 }
 0x41a   :  { %3709 = vmatmul.mubr.bf16.gmra.mrb[80].mxu1 %v9452_v36  ;;  %10643 = vst [vmem:[#allocation34_spill] sm:$0xff] %v9482_v61  ;;  %v3359_v8 = vmax.f32 %v7300_v49, 0.0 }
 0x41d   :  { %v2912_v48 = vpop.f32.mrb[36].mxu0 }
 0x41e   :  { %v7302_v53 = vadd.f32 %v2912_v48, %v9304_v51  ;;  %v2914_v1 = vpop.f32.mrb[37].mxu0  ;;  %v9485_v48 = vpop.f32.mrb[61].mxu1 }
 0x41f   :  { %v7303_v26 = vadd.f32 %v2914_v1, %v9310_v55  ;;  %v2916_v12 = vpop.f32.mrb[38].mxu0  ;;  %10644 = vst [vmem:[#allocation35_spill] sm:$0xff] %v9485_v48  ;;  %v9487_v59 = vpop.f32.mrb[62].mxu1  ;;  %v3360_v1 = vmax.f32 %v7301_v24, 0.0 }
 0x420   :  { %v3361_v36 = vmax.f32 %v7302_v53, 0.0  ;;  %v7304_v38 = vadd.f32 %v2916_v12, %v9304_v51  ;;  %v2918_v10 = vpop.f32.mrb[39].mxu0  ;;  %v9489_v53 = vpop.f32.mrb[63].mxu1 }
 0x421   :  { %v3362_v44 = vmax.f32 %v7303_v26, 0.0  ;;  %v7305_v63 = vadd.f32 %v2918_v10, %v9310_v55  ;;  %v9498_v49 = vpop.f32.mrb[64].mxu1 }
 0x422   :  { %v3453_v11 = vmax.f32 %v3357_v6, %v3361_v36  ;;  %v3363_v7 = vmax.f32 %v7304_v38, 0.0  ;;  %v8209_v36 = vld [vmem:[%s10582_s3 + $0x94] sm:$0xff]  }
 0x423   :  { %v3454_v18 = vmax.f32 %v3358_v4, %v3362_v44  ;;  %v3364_v45 = vmax.f32 %v7305_v63, 0.0  ;;  %v9502_v44 = vpop.f32.mrb[65].mxu1  ;;  %3902 = vmatpush1.bf16.msra.mxu1 %v8209_v36 }
 0x424   :  { %v3455_v12 = vmax.f32 %v3359_v8, %v3363_v7  ;;  %10647 = vst [vmem:[#allocation38_spill] sm:$0xff] %v9502_v44  ;;  %v719_v7 = vadd.f32 %v9217_v14, %v9304_v51  ;;  %3903 = vmatprep.subr.bf16.mxu1 %v10616_v39  ;;  %v721_v14 = vadd.f32 %v9222_v16, %v9304_v51 }
 0x425   :  { %v3456_v62 = vmax.f32 %v3360_v1, %v3364_v45  ;;  %v2922_v60 = vpop.f32.mrb[40].mxu0  ;;  %v723_v16 = vadd.f32 %v9230_v19, %v9304_v51 }
 0x426   :  { %v2924_v61 = vpop.f32.mrb[41].mxu0  ;;  %v9491_v47 = vpack.c.bf16 %v3455_v12, %v3453_v11  ;;  %v7306_v8 = vadd.f32 %v2922_v60, %v9304_v51  ;;  %v722_v12 = vadd.f32 %v9225_v17, %v9310_v55 }
 0x427   :  { %v9493_v26 = vpack.c.bf16 %v3456_v62, %v3454_v18  ;;  %v2926_v10 = vpop.f32.mrb[42].mxu0  ;;  %v9507_v62 = vpop.f32.mrb[66].mxu1  ;;  %v720_v18 = vadd.f32 %v9219_v15, %v9310_v55  ;;  %v7307_v24 = vadd.f32 %v2924_v61, %v9310_v55 }
 0x428   :  { %10645 = vst [vmem:[#allocation36_spill] sm:$0xff] %v9491_v47  ;;  %v2928_v48 = vpop.f32.mrb[43].mxu0  ;;  %10648 = vst [vmem:[#allocation39_spill] sm:$0xff] %v9507_v62  ;;  %v9511_v11 = vpop.f32.mrb[67].mxu1  ;;  %v7308_v38 = vadd.f32 %v2926_v10, %v9304_v51  ;;  %v3365_v60 = vmax.f32 %v7306_v8, 0.0  ;;  %v8210_v8 = vld [vmem:[%s10582_s3 + $0x9c] sm:$0xff]  }
 0x429   :  { %10646 = vst [vmem:[#allocation37_spill] sm:$0xff] %v9493_v26  ;;  %6683 = vmatprep.mubr.msk.bf16.mxu1 %vm3605_vm2, %v9493_v26  ;;  %10649 = vst [vmem:[#allocation40_spill] sm:$0xff] %v9511_v11  ;;  %v7309_v1 = vadd.f32 %v2928_v48, %v9310_v55  ;;  %v3366_v61 = vmax.f32 %v7307_v24, 0.0  ;;  %3904 = vmatpush1.bf16.msra.mxu1 %v8210_v8 }
 0x42a   :  { %3717 = vmatmul.mubr.bf16.gmra.mrb[84].mxu1 %v9491_v47  ;;  %v3367_v10 = vmax.f32 %v7308_v38, 0.0  ;;  %3905 = vmatprep.subr.bf16.mxu1 %v10616_v39 }
 0x42b   :  { %v3368_v44 = vmax.f32 %v7309_v1, 0.0 }
 0x42d   :  { %v2932_v6 = vpop.f32.mrb[44].mxu0 }
 0x42e   :  { %v7311_v4 = vadd.f32 %v2932_v6, %v719_v7  ;;  %v2934_v63 = vpop.f32.mrb[45].mxu0 }
 0x42f   :  { %v7313_v15 = vadd.f32 %v2934_v63, %v720_v18  ;;  %v2936_v45 = vpop.f32.mrb[46].mxu0  ;;  %v724_v63 = vadd.f32 %v9232_v20, %v9310_v55  ;;  %v726_v20 = vadd.f32 %v9238_v23, %v9310_v55  ;;  %v728_v23 = vadd.f32 %v9245_v52, %v9310_v55 }
 0x430   :  { %v3369_v36 = vmax.f32 %v7311_v4, 0.0  ;;  %v7315_v47 = vadd.f32 %v2936_v45, %v721_v14  ;;  %v2938_v26 = vpop.f32.mrb[47].mxu0  ;;  %v727_v45 = vadd.f32 %v9243_v37, %v9304_v51 }
 0x431   :  { %v3370_v11 = vmax.f32 %v7313_v15, 0.0  ;;  %v7317_v62 = vadd.f32 %v2938_v26, %v722_v12 }
 0x432   :  { %v3457_v7 = vmax.f32 %v3365_v60, %v3369_v36  ;;  %v3371_v6 = vmax.f32 %v7315_v47, 0.0  ;;  %v725_v47 = vadd.f32 %v9235_v22, %v9304_v51  ;;  %v8211_v22 = vld [vmem:[%s10582_s3 + $0xa4] ss:$0 sps:$4 sm:$0xff]  }
 0x433   :  { %v3458_v48 = vmax.f32 %v3366_v61, %v3370_v11  ;;  %v3372_v18 = vmax.f32 %v7317_v62, 0.0  ;;  %v3883_v12 = vsel %vm3648_vm1, %v8211_v22, 0 }
 0x434   :  { %v3459_v17 = vmax.f32 %v3367_v10, %v3371_v6  ;;  %3906 = vmatpush1.bf16.msra.mxu1 %v3883_v12  ;;  %v729_v10 = vadd.f32 %v9248_v21, %v9304_v51 }
 0x435   :  { %v3460_v24 = vmax.f32 %v3368_v44, %v3372_v18  ;;  %v2942_v4 = vpop.f32.mrb[48].mxu0 }
 0x436   :  { %v7319_v26 = vadd.f32 %v2942_v4, %v723_v16  ;;  %v2944_v38 = vpop.f32.mrb[49].mxu0  ;;  %v9531_v14 = vpack.c.bf16 %v3459_v17, %v3457_v7  ;;  %v730_v16 = vadd.f32 %v9251_v25, %v9310_v55 }
 0x437   :  { %v9533_v19 = vpack.c.bf16 %v3460_v24, %v3458_v48  ;;  %v7321_v62 = vadd.f32 %v2944_v38, %v724_v63  ;;  %v2946_v11 = vpop.f32.mrb[50].mxu0 }
 0x438   :  { %v7323_v1 = vadd.f32 %v2946_v11, %v725_v47  ;;  %v2948_v44 = vpop.f32.mrb[51].mxu0  ;;  %v3373_v48 = vmax.f32 %v7319_v26, 0.0  ;;  %v731_v47 = vadd.f32 %v9256_v27, %v9304_v51  ;;  %v734_v27 = vadd.f32 %v9264_v30, %v9310_v55 }
 0x439   :  { %v7325_v15 = vadd.f32 %v2948_v44, %v726_v20  ;;  %6684 = vmatprep.mubr.msk.bf16.mxu1 %vm3605_vm2, %v9533_v19  ;;  %v3374_v17 = vmax.f32 %v7321_v62, 0.0  ;;  %v732_v44 = vadd.f32 %v9258_v28, %v9310_v55  ;;  %v733_v62 = vadd.f32 %v9261_v29, %v9304_v51 }
 0x43a   :  { %3725 = vmatmul.mubr.bf16.gmra.mrb[88].mxu1 %v9531_v14  ;;  %v3375_v24 = vmax.f32 %v7323_v1, 0.0  ;;  %v735_v29 = vadd.f32 %v9269_v32, %v9304_v51  ;;  %v737_v30 = vadd.f32 %v9274_v34, %v9304_v51  ;;  %v739_v34 = vadd.f32 %v9284_v40, %v9304_v51 }
 0x43b   :  { %v3376_v11 = vmax.f32 %v7325_v15, 0.0  ;;  %v742_v40 = vadd.f32 %v9292_v43, %v9310_v55  ;;  %v745_v43 = vadd.f32 %v9315_v57, %v9304_v51  ;;  %v747_v57 = vadd.f32 %v9326_v9, %v9304_v51 }
 0x43c   :  { %v750_v9 = vadd.f32 %v9333_v46, %v9310_v55  ;;  %v753_v46 = vadd.f32 %v9349_v3, %v9304_v51  ;;  %v755_v3 = vadd.f32 %v9368_v50, %v9304_v51  ;;  %v10652_v50 = vld [vmem:[#allocation7_spill] sm:$0xff] }
 0x43d   :  { %v2952_v60 = vpop.f32.mrb[52].mxu0 }
 0x43e   :  { %v7327_v36 = vadd.f32 %v2952_v60, %v727_v45  ;;  %v2954_v61 = vpop.f32.mrb[53].mxu0 }
 0x43f   :  { %v7329_v7 = vadd.f32 %v2954_v61, %v728_v23  ;;  %v2956_v6 = vpop.f32.mrb[54].mxu0 }
 0x440   :  { %v3377_v18 = vmax.f32 %v7327_v36, 0.0  ;;  %v7331_v37 = vadd.f32 %v2956_v6, %v729_v10  ;;  %v2958_v63 = vpop.f32.mrb[55].mxu0  ;;  %v736_v10 = vadd.f32 %v9271_v33, %v9310_v55 }
 0x441   :  { %v3378_v52 = vmax.f32 %v7329_v7, 0.0  ;;  %v7333_v8 = vadd.f32 %v2958_v63, %v730_v16 }
 0x442   :  { %v3461_v4 = vmax.f32 %v3373_v48, %v3377_v18  ;;  %v3379_v38 = vmax.f32 %v7331_v37, 0.0  ;;  %v738_v48 = vadd.f32 %v9277_v35, %v9310_v55  ;;  %v740_v35 = vadd.f32 %v9286_v41, %v9310_v55 }
 0x443   :  { %v3462_v21 = vmax.f32 %v3374_v17, %v3378_v52  ;;  %v3380_v20 = vmax.f32 %v7333_v8, 0.0 }
 0x444   :  { %v3463_v25 = vmax.f32 %v3375_v24, %v3379_v38 }
 0x445   :  { %v3464_v26 = vmax.f32 %v3376_v11, %v3380_v20  ;;  %v2962_v22 = vpop.f32.mrb[56].mxu0 }
 0x446   :  { %v7335_v45 = vadd.f32 %v2962_v22, %v731_v47  ;;  %v2964_v23 = vpop.f32.mrb[57].mxu0  ;;  %v9559_v1 = vpack.c.bf16 %v3463_v25, %v3461_v4  ;;  %v741_v22 = vadd.f32 %v9289_v42, %v9304_v51  ;;  %v743_v42 = vadd.f32 %v9306_v54, %v9304_v51 }
 0x447   :  { %v9561_v12 = vpack.c.bf16 %v3464_v26, %v3462_v21  ;;  %v7337_v15 = vadd.f32 %v2964_v23, %v732_v44  ;;  %v2966_v60 = vpop.f32.mrb[58].mxu0 }
 0x448   :  { %v7339_v36 = vadd.f32 %v2966_v60, %v733_v62  ;;  %v2968_v61 = vpop.f32.mrb[59].mxu0  ;;  %v3381_v63 = vmax.f32 %v7335_v45, 0.0 }
 0x449   :  { %v7341_v28 = vadd.f32 %v2968_v61, %v734_v27  ;;  %6685 = vmatprep.mubr.msk.bf16.mxu1 %vm3605_vm2, %v9561_v12  ;;  %v3382_v8 = vmax.f32 %v7337_v15, 0.0 }
 0x44a   :  { %3733 = vmatmul.mubr.bf16.gmra.mrb[92].mxu1 %v9559_v1  ;;  %v3383_v38 = vmax.f32 %v7339_v36, 0.0 }
 0x44b   :  { %v3384_v11 = vmax.f32 %v7341_v28, 0.0  ;;  %v744_v28 = vadd.f32 %v9312_v56, %v9310_v55 }
 0x44d   :  { %v2972_v7 = vpop.f32.mrb[60].mxu0 }
 0x44e   :  { %v7343_v6 = vadd.f32 %v2972_v7, %v735_v29  ;;  %v2974_v16 = vpop.f32.mrb[61].mxu0 }
 0x44f   :  { %v7345_v18 = vadd.f32 %v2974_v16, %v736_v10  ;;  %v2976_v37 = vpop.f32.mrb[62].mxu0 }
 0x450   :  { %v3385_v17 = vmax.f32 %v7343_v6, 0.0  ;;  %v7347_v52 = vadd.f32 %v2976_v37, %v737_v30  ;;  %v2978_v32 = vpop.f32.mrb[63].mxu0  ;;  %v746_v30 = vadd.f32 %v9317_v58, %v9310_v55  ;;  %v748_v58 = vadd.f32 %v9329_v13, %v9310_v55 }
 0x451   :  { %v3386_v24 = vmax.f32 %v7345_v18, 0.0  ;;  %v7349_v4 = vadd.f32 %v2978_v32, %v738_v48 }
 0x452   :  { %v3465_v33 = vmax.f32 %v3381_v63, %v3385_v17  ;;  %v3387_v47 = vmax.f32 %v7347_v52, 0.0 }
 0x453   :  { %v3466_v21 = vmax.f32 %v3382_v8, %v3386_v24  ;;  %v3388_v20 = vmax.f32 %v7349_v4, 0.0 }
 0x454   :  { %v3467_v44 = vmax.f32 %v3383_v38, %v3387_v47 }
 0x455   :  { %v3468_v25 = vmax.f32 %v3384_v11, %v3388_v20  ;;  %v2982_v26 = vpop.f32.mrb[64].mxu0  ;;  %v749_v11 = vadd.f32 %v9331_v31, %v9304_v51  ;;  %v751_v31 = vadd.f32 %v9342_v0, %v9304_v51 }
 0x456   :  { %v7351_v62 = vadd.f32 %v2982_v26, %v739_v34  ;;  %v2984_v45 = vpop.f32.mrb[65].mxu0  ;;  %v9582_v23 = vpack.c.bf16 %v3467_v44, %v3465_v33 }
 0x457   :  { %v9584_v27 = vpack.c.bf16 %v3468_v25, %v3466_v21  ;;  %v7353_v15 = vadd.f32 %v2984_v45, %v740_v35  ;;  %v2986_v60 = vpop.f32.mrb[66].mxu0  ;;  %v752_v45 = vadd.f32 %v9346_v2, %v9310_v55 }
 0x458   :  { %v7355_v36 = vadd.f32 %v2986_v60, %v741_v22  ;;  %v2988_v61 = vpop.f32.mrb[67].mxu0  ;;  %v3389_v48 = vmax.f32 %v7351_v62, 0.0 }
 0x459   :  { %v7357_v41 = vadd.f32 %v2988_v61, %v742_v40  ;;  %6686 = vmatprep.mubr.msk.bf16.mxu1 %vm3605_vm2, %v9584_v27  ;;  %v3390_v63 = vmax.f32 %v7353_v15, 0.0 }
 0x45a   :  { %3741 = vmatmul.mubr.bf16.gmra.mrb[96].mxu1 %v9582_v23  ;;  %v3391_v32 = vmax.f32 %v7355_v36, 0.0  ;;  %v754_v36 = vadd.f32 %v9354_v5, %v9310_v55  ;;  %v10650_v5 = vld [vmem:[#allocation5_spill] sm:$0xff] }
 0x45b   :  { %v3392_v24 = vmax.f32 %v7357_v41, 0.0 }
 0x45d   :  { %v2992_v29 = vpop.f32.mrb[68].mxu0 }
 0x45e   :  { %v7359_v10 = vadd.f32 %v2992_v29, %v743_v42  ;;  %v2994_v7 = vpop.f32.mrb[69].mxu0 }
 0x45f   :  { %v7361_v6 = vadd.f32 %v2994_v7, %v744_v28  ;;  %v2996_v16 = vpop.f32.mrb[70].mxu0 }
 0x460   :  { %v3393_v18 = vmax.f32 %v7359_v10, 0.0  ;;  %v7363_v37 = vadd.f32 %v2996_v16, %v745_v43  ;;  %v2998_v54 = vpop.f32.mrb[71].mxu0 }
 0x461   :  { %v3394_v17 = vmax.f32 %v7361_v6, 0.0  ;;  %v7365_v52 = vadd.f32 %v2998_v54, %v746_v30 }
 0x462   :  { %v3469_v56 = vmax.f32 %v3389_v48, %v3393_v18  ;;  %v3395_v8 = vmax.f32 %v7363_v37, 0.0  ;;  %v756_v37 = vadd.f32 %v10650_v5, %v9310_v55 }
 0x463   :  { %v3470_v4 = vmax.f32 %v3390_v63, %v3394_v17  ;;  %v3396_v38 = vmax.f32 %v7365_v52, 0.0  ;;  %v10651_v52 = vld [vmem:[#allocation6_spill] sm:$0xff] }
 0x464   :  { %v3471_v33 = vmax.f32 %v3391_v32, %v3395_v8  ;;  %v757_v32 = vadd.f32 %v10651_v52, %v9304_v51 }
 0x465   :  { %v3472_v47 = vmax.f32 %v3392_v24, %v3396_v38  ;;  %v3002_v34 = vpop.f32.mrb[72].mxu0 }
 0x466   :  { %v7367_v21 = vadd.f32 %v3002_v34, %v747_v57  ;;  %v3004_v20 = vpop.f32.mrb[73].mxu0  ;;  %v9605_v35 = vpack.c.bf16 %v3471_v33, %v3469_v56 }
 0x467   :  { %v9607_v44 = vpack.c.bf16 %v3472_v47, %v3470_v4  ;;  %v7369_v25 = vadd.f32 %v3004_v20, %v748_v58  ;;  %v3006_v26 = vpop.f32.mrb[74].mxu0  ;;  %v758_v4 = vadd.f32 %v10652_v50, %v9310_v55  ;;  %v10654_v20 = vld [vmem:[#allocation11_spill] sm:$0xff] }
 0x468   :  { %v7371_v22 = vadd.f32 %v3006_v26, %v749_v11  ;;  %v3008_v62 = vpop.f32.mrb[75].mxu0  ;;  %v3397_v42 = vmax.f32 %v7367_v21, 0.0  ;;  %v10653_v11 = vld [vmem:[#allocation10_spill] sm:$0xff]  ;;  %v10655_v26 = vld [vmem:[#allocation12_spill] sm:$0xff] }
 0x469   :  { %v7373_v13 = vadd.f32 %v3008_v62, %v750_v9  ;;  %6687 = vmatprep.mubr.msk.bf16.mxu1 %vm3605_vm2, %v9607_v44  ;;  %v3398_v43 = vmax.f32 %v7369_v25, 0.0  ;;  %v759_v21 = vadd.f32 %v10653_v11, %v9304_v51  ;;  %v760_v9 = vadd.f32 %v10654_v20, %v9310_v55  ;;  %v10662_v11 = vld [vmem:[#allocation21_spill] sm:$0xff] }
 0x46a   :  { %3749 = vmatmul.mubr.bf16.gmra.mrb[100].mxu1 %v9605_v35  ;;  %v3399_v30 = vmax.f32 %v7371_v22, 0.0  ;;  %v761_v22 = vadd.f32 %v10655_v26, %v9304_v51 }
 0x46b   :  { %v3400_v16 = vmax.f32 %v7373_v13, 0.0 }
 0x46d   :  { %v3012_v40 = vpop.f32.mrb[76].mxu0 }
 0x46e   :  { %v7375_v15 = vadd.f32 %v3012_v40, %v751_v31  ;;  %v3014_v60 = vpop.f32.mrb[77].mxu0  ;;  %v10656_v31 = vld [vmem:[#allocation13_spill] sm:$0xff] }
 0x46f   :  { %v7377_v61 = vadd.f32 %v3014_v60, %v752_v45  ;;  %v3016_v41 = vpop.f32.mrb[78].mxu0  ;;  %v762_v45 = vadd.f32 %v10656_v31, %v9310_v55 }
 0x470   :  { %v3401_v28 = vmax.f32 %v7375_v15, 0.0  ;;  %v7379_v29 = vadd.f32 %v3016_v41, %v753_v46  ;;  %v3018_v0 = vpop.f32.mrb[79].mxu0 }
 0x471   :  { %v3402_v10 = vmax.f32 %v7377_v61, 0.0  ;;  %v7381_v7 = vadd.f32 %v3018_v0, %v754_v36 }
 0x472   :  { %v3473_v2 = vmax.f32 %v3397_v42, %v3401_v28  ;;  %v3403_v6 = vmax.f32 %v7379_v29, 0.0 }
 0x473   :  { %v3474_v48 = vmax.f32 %v3398_v43, %v3402_v10  ;;  %v3404_v18 = vmax.f32 %v7381_v7, 0.0  ;;  %v10657_v10 = vld [vmem:[#allocation14_spill] sm:$0xff] }
 0x474   :  { %v3475_v54 = vmax.f32 %v3399_v30, %v3403_v6  ;;  %v763_v7 = vadd.f32 %v10657_v10, %v9304_v51 }
 0x475   :  { %v3476_v63 = vmax.f32 %v3400_v16, %v3404_v18  ;;  %v3022_v17 = vpop.f32.mrb[80].mxu0 }
 0x476   :  { %v7383_v56 = vadd.f32 %v3022_v17, %v755_v3  ;;  %v3024_v8 = vpop.f32.mrb[81].mxu0  ;;  %v9628_v57 = vpack.c.bf16 %v3475_v54, %v3473_v2  ;;  %v10658_v3 = vld [vmem:[#allocation15_spill] sm:$0xff] }
 0x477   :  { %v9630_v24 = vpack.c.bf16 %v3476_v63, %v3474_v48  ;;  %v7385_v38 = vadd.f32 %v3024_v8, %v756_v37  ;;  %v3026_v58 = vpop.f32.mrb[82].mxu0  ;;  %v764_v16 = vadd.f32 %v10658_v3, %v9310_v55  ;;  %v10659_v37 = vld [vmem:[#allocation16_spill] sm:$0xff] }
 0x478   :  { %v7387_v33 = vadd.f32 %v3026_v58, %v757_v32  ;;  %v3028_v47 = vpop.f32.mrb[83].mxu0  ;;  %v3405_v15 = vmax.f32 %v7383_v56, 0.0  ;;  %v765_v54 = vadd.f32 %v10659_v37, %v9304_v51  ;;  %v10660_v56 = vld [vmem:[#allocation17_spill] sm:$0xff] }
 0x479   :  { %v7389_v34 = vadd.f32 %v3028_v47, %v758_v4  ;;  %6688 = vmatprep.mubr.msk.bf16.mxu1 %vm3605_vm2, %v9630_v24  ;;  %v3406_v41 = vmax.f32 %v7385_v38, 0.0  ;;  %v766_v8 = vadd.f32 %v10660_v56, %v9310_v55  ;;  %v10661_v47 = vld [vmem:[#allocation20_spill] sm:$0xff]  ;;  %v10668_v56 = vld [vmem:[#allocation27_spill] sm:$0xff] }
 0x47a   :  { %3757 = vmatmul.mubr.bf16.gmra.mrb[104].mxu1 %v9628_v57  ;;  %v3407_v29 = vmax.f32 %v7387_v33, 0.0 }
 0x47b   :  { %v3408_v30 = vmax.f32 %v7389_v34, 0.0  ;;  %v767_v34 = vadd.f32 %v10661_v47, %v9304_v51  ;;  %v10669_v47 = vld [vmem:[#allocation30_spill] sm:$0xff] }
 0x47d   :  { %v3032_v25 = vpop.f32.mrb[84].mxu0 }
 0x47e   :  { %v7391_v62 = vadd.f32 %v3032_v25, %v759_v21  ;;  %v3034_v13 = vpop.f32.mrb[85].mxu0  ;;  %v768_v21 = vadd.f32 %v10662_v11, %v9310_v55  ;;  %v10670_v11 = vld [vmem:[#allocation31_spill] sm:$0xff] }
 0x47f   :  { %v7393_v40 = vadd.f32 %v3034_v13, %v760_v9  ;;  %v3036_v46 = vpop.f32.mrb[86].mxu0  ;;  %v10663_v9 = vld [vmem:[#allocation22_spill] sm:$0xff] }
 0x480   :  { %v3409_v60 = vmax.f32 %v7391_v62, 0.0  ;;  %v7395_v36 = vadd.f32 %v3036_v46, %v761_v22  ;;  %v3038_v61 = vpop.f32.mrb[87].mxu0  ;;  %v769_v25 = vadd.f32 %v10663_v9, %v9304_v51  ;;  %v10664_v62 = vld [vmem:[#allocation23_spill] sm:$0xff]  ;;  %v10671_v9 = vld [vmem:[#allocation32_spill] sm:$0xff] }
 0x481   :  { %v3410_v42 = vmax.f32 %v7393_v40, 0.0  ;;  %v7397_v28 = vadd.f32 %v3038_v61, %v762_v45  ;;  %v770_v13 = vadd.f32 %v10664_v62, %v9310_v55  ;;  %v10672_v62 = vld [vmem:[#allocation33_spill] sm:$0xff] }
 0x482   :  { %v3477_v0 = vmax.f32 %v3405_v15, %v3409_v60  ;;  %v3411_v43 = vmax.f32 %v7395_v36, 0.0 }
 0x483   :  { %v3478_v2 = vmax.f32 %v3406_v41, %v3410_v42  ;;  %v3412_v6 = vmax.f32 %v7397_v28, 0.0 }
 0x484   :  { %v3479_v48 = vmax.f32 %v3407_v29, %v3411_v43 }
 0x485   :  { %v3480_v18 = vmax.f32 %v3408_v30, %v3412_v6  ;;  %v3042_v5 = vpop.f32.mrb[88].mxu0 }
 0x486   :  { %v7399_v63 = vadd.f32 %v3042_v5, %v763_v7  ;;  %v3044_v17 = vpop.f32.mrb[89].mxu0  ;;  %v9651_v52 = vpack.c.bf16 %v3479_v48, %v3477_v0  ;;  %v10665_v0 = vld [vmem:[#allocation24_spill] sm:$0xff] }
 0x487   :  { %v9653_v32 = vpack.c.bf16 %v3480_v18, %v3478_v2  ;;  %v7401_v50 = vadd.f32 %v3044_v17, %v764_v16  ;;  %v3046_v4 = vpop.f32.mrb[90].mxu0  ;;  %v771_v43 = vadd.f32 %v10665_v0, %v9304_v51  ;;  %v10666_v2 = vld [vmem:[#allocation25_spill] sm:$0xff]  ;;  %v10667_v18 = vld [vmem:[#allocation26_spill] sm:$0xff] }
 0x488   :  { %v7403_v38 = vadd.f32 %v3046_v4, %v765_v54  ;;  %v3048_v58 = vpop.f32.mrb[91].mxu0  ;;  %v3413_v40 = vmax.f32 %v7399_v63, 0.0  ;;  %v772_v6 = vadd.f32 %v10666_v2, %v9310_v55  ;;  %v773_v5 = vadd.f32 %v10667_v18, %v9304_v51  ;;  %v10673_v0 = vld [vmem:[#allocation34_spill] sm:$0xff]  ;;  %v10674_v2 = vld [vmem:[#allocation35_spill] sm:$0xff] }
 0x489   :  { %v7405_v33 = vadd.f32 %v3048_v58, %v766_v8  ;;  %6689 = vmatprep.mubr.msk.bf16.mxu1 %vm3605_vm2, %v9653_v32  ;;  %v3414_v36 = vmax.f32 %v7401_v50, 0.0  ;;  %v774_v8 = vadd.f32 %v10668_v56, %v9310_v55  ;;  %v781_v18 = vadd.f32 %v9487_v59, %v9304_v51 }
 0x48a   :  { %3765 = vmatmul.mubr.bf16.gmra.mrb[108].mxu1 %v9651_v52  ;;  %v3415_v42 = vmax.f32 %v7403_v38, 0.0  ;;  %v783_v59 = vadd.f32 %v9498_v49, %v9304_v51 }
 0x48b   :  { %v3416_v10 = vmax.f32 %v7405_v33, 0.0 }
 0x48d   :  { %v3052_v20 = vpop.f32.mrb[92].mxu0 }
 0x48e   :  { %v7407_v26 = vadd.f32 %v3052_v20, %v767_v34  ;;  %v3054_v22 = vpop.f32.mrb[93].mxu0  ;;  %v775_v34 = vadd.f32 %v10669_v47, %v9304_v51  ;;  %v10675_v47 = vld [vmem:[#allocation38_spill] sm:$0xff] }
 0x48f   :  { %v7409_v31 = vadd.f32 %v3054_v22, %v768_v21  ;;  %v3056_v45 = vpop.f32.mrb[94].mxu0  ;;  %v776_v21 = vadd.f32 %v10670_v11, %v9310_v55 }
 0x490   :  { %v3417_v46 = vmax.f32 %v7407_v26, 0.0  ;;  %v7411_v15 = vadd.f32 %v3056_v45, %v769_v25  ;;  %v3058_v60 = vpop.f32.mrb[95].mxu0  ;;  %v777_v25 = vadd.f32 %v10671_v9, %v9304_v51 }
 0x491   :  { %v3418_v61 = vmax.f32 %v7409_v31, 0.0  ;;  %v7413_v41 = vadd.f32 %v3058_v60, %v770_v13  ;;  %v778_v13 = vadd.f32 %v10672_v62, %v9310_v55 }
 0x492   :  { %v3481_v28 = vmax.f32 %v3413_v40, %v3417_v46  ;;  %v3419_v29 = vmax.f32 %v7411_v15, 0.0 }
 0x493   :  { %v3482_v7 = vmax.f32 %v3414_v36, %v3418_v61  ;;  %v3420_v30 = vmax.f32 %v7413_v41, 0.0 }
 0x494   :  { %v3483_v3 = vmax.f32 %v3415_v42, %v3419_v29 }
 0x495   :  { %v3484_v16 = vmax.f32 %v3416_v10, %v3420_v30  ;;  %v3062_v48 = vpop.f32.mrb[96].mxu0 }
 0x496   :  { %v7415_v37 = vadd.f32 %v3062_v48, %v771_v43  ;;  %v3064_v54 = vpop.f32.mrb[97].mxu0  ;;  %v9674_v63 = vpack.c.bf16 %v3483_v3, %v3481_v28  ;;  %v779_v43 = vadd.f32 %v10673_v0, %v9304_v51 }
 0x497   :  { %v9676_v17 = vpack.c.bf16 %v3484_v16, %v3482_v7  ;;  %v7417_v50 = vadd.f32 %v3064_v54, %v772_v6  ;;  %v3066_v4 = vpop.f32.mrb[98].mxu0  ;;  %v780_v6 = vadd.f32 %v10674_v2, %v9310_v55 }
 0x498   :  { %v7419_v38 = vadd.f32 %v3066_v4, %v773_v5  ;;  %v3068_v58 = vpop.f32.mrb[99].mxu0  ;;  %v3421_v40 = vmax.f32 %v7415_v37, 0.0 }
 0x499   :  { %v7421_v33 = vadd.f32 %v3068_v58, %v774_v8  ;;  %6690 = vmatprep.mubr.msk.bf16.mxu1 %vm3605_vm2, %v9676_v17  ;;  %v3422_v36 = vmax.f32 %v7417_v50, 0.0  ;;  %v782_v8 = vadd.f32 %v9489_v53, %v9310_v55  ;;  %v8214_v53 = vld [vmem:[%s10584_s4 + $0x4] ss:$8 sps:$4 sm:$0xff]  }
 0x49a   :  { %3773 = vmatmul.mubr.bf16.gmra.mrb[112].mxu1 %v9674_v63  ;;  %v3423_v42 = vmax.f32 %v7419_v38, 0.0  ;;  %4188 = vmatprep.subr.bf16.mxu1 %v8214_v53  ;;  %v10685_v53 = vld [vmem:[#allocation28_spill] sm:$0xff] }
 0x49b   :  { %v3424_v10 = vmax.f32 %v7421_v33, 0.0 }
 0x49d   :  { %v3072_v20 = vpop.f32.mrb[100].mxu0 }
 0x49e   :  { %v7423_v26 = vadd.f32 %v3072_v20, %v775_v34  ;;  %v3074_v22 = vpop.f32.mrb[101].mxu0  ;;  %v784_v34 = vadd.f32 %v10675_v47, %v9310_v55  ;;  %v10683_v47 = vld [vmem:[#allocation18_spill] sm:$0xff] }
 0x49f   :  { %v7425_v31 = vadd.f32 %v3074_v22, %v776_v21  ;;  %v3076_v45 = vpop.f32.mrb[102].mxu0  ;;  %v10676_v21 = vld [vmem:[#allocation39_spill] sm:$0xff] }
 0x4a0   :  { %v3425_v46 = vmax.f32 %v7423_v26, 0.0  ;;  %v7427_v15 = vadd.f32 %v3076_v45, %v777_v25  ;;  %v3078_v60 = vpop.f32.mrb[103].mxu0  ;;  %v785_v20 = vadd.f32 %v10676_v21, %v9304_v51  ;;  %v10677_v26 = vld [vmem:[#allocation40_spill] sm:$0xff] }
 0x4a1   :  { %v3426_v61 = vmax.f32 %v7425_v31, 0.0  ;;  %v7429_v41 = vadd.f32 %v3078_v60, %v778_v13  ;;  %v786_v22 = vadd.f32 %v10677_v26, %v9310_v55  ;;  %v8221_v26 = vld [vmem:[%s10584_s4 + $0x30] ss:$8 sps:$4 sm:$0xff]  }
 0x4a2   :  { %v3485_v28 = vmax.f32 %v3421_v40, %v3425_v46  ;;  %v3427_v29 = vmax.f32 %v7427_v15, 0.0 }
 0x4a3   :  { %v3486_v7 = vmax.f32 %v3422_v36, %v3426_v61  ;;  %v3428_v30 = vmax.f32 %v7429_v41, 0.0 }
 0x4a4   :  { %v3487_v3 = vmax.f32 %v3423_v42, %v3427_v29 }
 0x4a5   :  { %v3488_v16 = vmax.f32 %v3424_v10, %v3428_v30  ;;  %v3082_v48 = vpop.f32.mrb[104].mxu0  ;;  %v10678_v10 = vld [vmem:[#allocation4_spill] sm:$0xff] }
 0x4a6   :  { %v7431_v5 = vadd.f32 %v3082_v48, %v779_v43  ;;  %v3084_v37 = vpop.f32.mrb[105].mxu0  ;;  %v9697_v54 = vpack.c.bf16 %v3487_v3, %v3485_v28  ;;  %v10679_v48 = vld [vmem:[#allocation3_spill] sm:$0xff] }
 0x4a7   :  { %v9699_v56 = vpack.c.bf16 %v3488_v16, %v3486_v7  ;;  %v7433_v50 = vadd.f32 %v3084_v37, %v780_v6  ;;  %v3086_v4 = vpop.f32.mrb[106].mxu0  ;;  %v8212_v6 = vld [vmem:[%s10584_s4] ss:$8 sps:$4 sm:$0xff]   ;;  %v8217_v16 = vld [vmem:[%s10584_s4 + $0x14] ss:$8 sps:$4 sm:$0xff]  }
 0x4a8   :  { %v7435_v38 = vadd.f32 %v3086_v4, %v781_v18  ;;  %v3088_v58 = vpop.f32.mrb[107].mxu0  ;;  %v3429_v13 = vmax.f32 %v7431_v5, 0.0  ;;  %v10680_v18 = vld [vmem:[#allocation9_spill] sm:$0xff]  ;;  %v10681_v37 = vld [vmem:[#allocation8_spill] sm:$0xff] }
 0x4a9   :  { %v7437_v33 = vadd.f32 %v3088_v58, %v782_v8  ;;  %6691 = vmatprep.mubr.msk.bf16.mxu1 %vm3605_vm2, %v9699_v56  ;;  %v3430_v46 = vmax.f32 %v7433_v50, 0.0  ;;  %v8215_v5 = vld [vmem:[%s10584_s4 + $0x10] ss:$8 sps:$4 sm:$0xff]   ;;  %v10682_v8 = vld [vmem:[#allocation19_spill] sm:$0xff] }
 0x4aa   :  { %3781 = vmatmul.mubr.bf16.gmra.mrb[116].mxu1 %v9697_v54  ;;  %v3431_v36 = vmax.f32 %v7435_v38, 0.0 }
 0x4ab   :  { %v3432_v42 = vmax.f32 %v7437_v33, 0.0  ;;  %v8218_v33 = vld [vmem:[%s10584_s4 + $0x20] ss:$8 sps:$4 sm:$0xff]  }
 0x4ad   :  { %v3092_v11 = vpop.f32.mrb[108].mxu0 }
 0x4ae   :  { %v7439_v9 = vadd.f32 %v3092_v11, %v783_v59  ;;  %v3094_v25 = vpop.f32.mrb[109].mxu0  ;;  %v8220_v59 = vld [vmem:[%s10584_s4 + $0x24] ss:$8 sps:$4 sm:$0xff]   ;;  %v10686_v11 = vld [vmem:[#allocation37_spill] sm:$0xff] }
 0x4af   :  { %v7441_v49 = vadd.f32 %v3094_v25, %v784_v34  ;;  %v3096_v62 = vpop.f32.mrb[110].mxu0  ;;  %v10684_v34 = vld [vmem:[#allocation29_spill] sm:$0xff] }
 0x4b0   :  { %v3433_v31 = vmax.f32 %v7439_v9, 0.0  ;;  %v7443_v45 = vadd.f32 %v3096_v62, %v785_v20  ;;  %v3098_v40 = vpop.f32.mrb[111].mxu0 }
 0x4b1   :  { %v3434_v15 = vmax.f32 %v7441_v49, 0.0  ;;  %v7445_v60 = vadd.f32 %v3098_v40, %v786_v22  ;;  %v8223_v22 = vld [vmem:[%s10584_s4 + $0x34] ss:$8 sps:$4 sm:$0xff]   ;;  %v8224_v40 = vld [vmem:[%s10584_s4 + $0x40] ss:$8 sps:$4 sm:$0xff]  }
 0x4b2   :  { %v3489_v61 = vmax.f32 %v3429_v13, %v3433_v31  ;;  %v3435_v41 = vmax.f32 %v7443_v45, 0.0  ;;  %v10687_v49 = vld [vmem:[#allocation36_spill] sm:$0xff] }
 0x4b3   :  { %v3490_v51 = vmax.f32 %v3430_v46, %v3434_v15  ;;  %v3436_v28 = vmax.f32 %v7445_v60, 0.0 }
 0x4b4   :  { %v3491_v29 = vmax.f32 %v3431_v36, %v3435_v41 }
 0x4b5   :  { %v3492_v0 = vmax.f32 %v3432_v42, %v3436_v28 }
 0x4b6   :  { %v9717_v43 = vpack.c.bf16 %v3491_v29, %v3489_v61 }
 0x4b7   :  { %v9719_v55 = vpack.c.bf16 %v3492_v0, %v3490_v51 }
 0x4b9   :  { %6692 = vmatprep.mubr.msk.bf16.mxu1 %vm3605_vm2, %v9719_v55 }
 0x4ba   :  { %3789 = vmatmul.mubr.bf16.gmra.mrb[120].mxu1 %v9717_v43 }
 0x4bb   :  { %6725 = vmatprep.mubr.msk.bf16.mxu1 %vm3605_vm2, %v10678_v10 }
 0x4bd   :  { %v9726_v7 = vpop.f32.mrb[68].mxu1 }
 0x4be   :  { %v3688_v30 = vpop.f32.mrb[69].mxu1 }
 0x4bf   :  { %v9728_v2 = vpop.f32.mrb[70].mxu1 }
 0x4c0   :  { %v3691_v3 = vpop.f32.mrb[71].mxu1 }
 0x4c2   :  { %3918 = vmatmul.mubr.bf16.vlgmr.msra.gmra.mrb[124].mxu1 %v10679_v48 }
 0x4c3   :  { %6726 = vmatprep.mubr.msk.bf16.mxu1 %vm3605_vm2, %v10680_v18  ;;  %4189 = vmatpush1.bf16.msra.mxu1 %v8212_v6 }
 0x4c4   :  { %4190 = vmatprep.subr.bf16.mxu1 %v8217_v16 }
 0x4c7   :  { %4191 = vmatpush1.bf16.msra.mxu1 %v8215_v5 }
 0x4c8   :  { %4192 = vmatprep.subr.bf16.mxu1 %v8220_v59 }
 0x4ca   :  { %3926 = vmatmul.mubr.bf16.gmra.mrb[128].mxu1 %v10681_v37 }
 0x4cb   :  { %6727 = vmatprep.mubr.msk.bf16.mxu1 %vm3605_vm2, %v10682_v8  ;;  %4193 = vmatpush1.bf16.msra.mxu1 %v8218_v33 }
 0x4cc   :  { %4194 = vmatprep.subr.bf16.mxu1 %v8223_v22 }
 0x4cd   :  { %v9745_v50 = vpop.f32.mrb[72].mxu1 }
 0x4ce   :  { %v3696_v4 = vpop.f32.mrb[73].mxu1 }
 0x4cf   :  { %v9747_v38 = vpop.f32.mrb[74].mxu1  ;;  %4195 = vmatpush1.bf16.msra.mxu1 %v8221_v26 }
 0x4d0   :  { %v3699_v58 = vpop.f32.mrb[75].mxu1 }
 0x4d2   :  { %3934 = vmatmul.mubr.bf16.gmra.mrb[132].mxu1 %v10683_v47 }
 0x4d3   :  { %6728 = vmatprep.mubr.msk.bf16.mxu1 %vm3605_vm2, %v10684_v34 }
 0x4da   :  { %3942 = vmatmul.mubr.bf16.gmra.mrb[136].mxu1 %v10685_v53 }
 0x4db   :  { %6729 = vmatprep.mubr.msk.bf16.mxu1 %vm3605_vm2, %v10686_v11 }
 0x4dd   :  { %v9761_v21 = vpop.f32.mrb[76].mxu1 }
 0x4de   :  { %v3704_v20 = vpop.f32.mrb[77].mxu1 }
 0x4df   :  { %v9763_v9 = vpop.f32.mrb[78].mxu1 }
 0x4e0   :  { %v3707_v25 = vpop.f32.mrb[79].mxu1 }
 0x4e2   :  { %3950 = vmatmul.mubr.bf16.gmra.mrb[140].mxu1 %v10687_v49 }
 0x4e3   :  { %6730 = vmatprep.mubr.msk.bf16.mxu1 %vm3605_vm2, %v9533_v19  ;;  %v8226_v19 = vld [vmem:[%s10584_s4 + $0x44] ss:$8 sps:$4 sm:$0xff]  }
 0x4e4   :  { %4196 = vmatprep.subr.bf16.mxu1 %v8226_v19 }
 0x4e5   :  { %4197 = vmatpush1.bf16.msra.mxu1 %v8224_v40  ;;  %v8234_v40 = vld [vmem:[%s10584_s4 + $0xc4] ss:$8 sps:$4 sm:$0xff]  }
 0x4ea   :  { %3958 = vmatmul.mubr.bf16.gmra.mrb[144].mxu1 %v9531_v14 }
 0x4eb   :  { %6731 = vmatprep.mubr.msk.bf16.mxu1 %vm3605_vm2, %v9561_v12 }
 0x4ed   :  { %v9777_v62 = vpop.f32.mrb[80].mxu1 }
 0x4ee   :  { %v3712_v13 = vpop.f32.mrb[81].mxu1 }
 0x4ef   :  { %v9779_v31 = vpop.f32.mrb[82].mxu1  ;;  %v8229_v13 = vld [vmem:[%s10584_s4 + $0xb0] ss:$8 sps:$4 sm:$0xff]  }
 0x4f0   :  { %v3715_v45 = vpop.f32.mrb[83].mxu1 }
 0x4f2   :  { %3966 = vmatmul.mubr.bf16.gmra.mrb[148].mxu1 %v9559_v1  ;;  %v4094_v1 = vld [vmem:[%s10584_s4 + $0x50] sm:$0x33] }
 0x4f3   :  { %6732 = vmatprep.mubr.msk.bf16.mxu1 %vm3605_vm2, %v9584_v27  ;;  %v6750_v60 = vcombine.high %v4094_v1, %v4094_v1  ;;  %v6749_v36 = vcombine.low %v4094_v1, %v4094_v1 }
 0x4f5   :  { %6751 = vmatprep.subr.msk.bf16.mxu1 %vm4181_vm3, %v6750_v60 }
 0x4fa   :  { %3974 = vmatmul.mubr.bf16.gmra.mrb[152].mxu1 %v9582_v23  ;;  %v4183_v23 = vsel %vm4181_vm3, %v6749_v36, 0 }
 0x4fb   :  { %6733 = vmatprep.mubr.msk.bf16.mxu1 %vm3605_vm2, %v9607_v44  ;;  %4199 = vmatpush1.bf16.msra.mxu1 %v4183_v23  ;;  %v8235_v23 = vld [vmem:[%s10584_s4 + $0xd0] ss:$8 sps:$4 sm:$0xff]  }
 0x4fd   :  { %v9793_v14 = vpop.f32.mrb[84].mxu1 }
 0x4fe   :  { %v3720_v12 = vpop.f32.mrb[85].mxu1 }
 0x4ff   :  { %v9795_v46 = vpop.f32.mrb[86].mxu1 }
 0x500   :  { %v3723_v15 = vpop.f32.mrb[87].mxu1 }
 0x501   :  { %v8237_v15 = vld [vmem:[%s10584_s4 + $0xd4] ss:$8 sps:$4 sm:$0xff]  }
 0x502   :  { %3982 = vmatmul.mubr.bf16.gmra.mrb[156].mxu1 %v9605_v35  ;;  %v8231_v35 = vld [vmem:[%s10584_s4 + $0xb4] ss:$8 sps:$4 sm:$0xff]  }
 0x503   :  { %6734 = vmatprep.mubr.msk.bf16.mxu1 %vm3605_vm2, %v9630_v24  ;;  %4452 = vmatprep.subr.bf16.mxu1 %v8231_v35 }
 0x50a   :  { %3990 = vmatmul.mubr.bf16.gmra.mrb[160].mxu1 %v9628_v57 }
 0x50b   :  { %6735 = vmatprep.mubr.msk.bf16.mxu1 %vm3605_vm2, %v9653_v32 }
 0x50d   :  { %v9808_v27 = vpop.f32.mrb[88].mxu1 }
 0x50e   :  { %v3728_v44 = vpop.f32.mrb[89].mxu1 }
 0x50f   :  { %v9810_v61 = vpop.f32.mrb[90].mxu1 }
 0x510   :  { %v3731_v41 = vpop.f32.mrb[91].mxu1 }
 0x512   :  { %3998 = vmatmul.mubr.bf16.gmra.mrb[164].mxu1 %v9651_v52 }
 0x513   :  { %6736 = vmatprep.mubr.msk.bf16.mxu1 %vm3605_vm2, %v9676_v17 }
 0x51a   :  { %4006 = vmatmul.mubr.bf16.gmra.mrb[168].mxu1 %v9674_v63 }
 0x51b   :  { %6737 = vmatprep.mubr.msk.bf16.mxu1 %vm3605_vm2, %v9699_v56 }
 0x51d   :  { %v9821_v57 = vpop.f32.mrb[92].mxu1 }
 0x51e   :  { %v3736_v24 = vpop.f32.mrb[93].mxu1 }
 0x51f   :  { %v9823_v32 = vpop.f32.mrb[94].mxu1 }
 0x520   :  { %v3739_v42 = vpop.f32.mrb[95].mxu1 }
 0x521   :  { %v8243_v42 = vld [vmem:[%s10584_s4 + $0xf4] ss:$8 sps:$4 sm:$0xff]  }
 0x522   :  { %4014 = vmatmul.mubr.bf16.gmra.mrb[172].mxu1 %v9697_v54 }
 0x523   :  { %6738 = vmatprep.mubr.msk.bf16.mxu1 %vm3605_vm2, %v9719_v55 }
 0x52a   :  { %4022 = vmatmul.mubr.bf16.gmra.mrb[176].mxu1 %v9717_v43 }
 0x52b   :  { %4220 = vmatprep.mubr.bf16.mxu1 %v10616_v39 }
 0x52d   :  { %v9830_v52 = vpop.f32.mrb[96].mxu1 }
 0x52e   :  { %v3744_v63 = vpop.f32.mrb[97].mxu1 }
 0x52f   :  { %v9832_v17 = vpop.f32.mrb[98].mxu1 }
 0x530   :  { %v3747_v56 = vpop.f32.mrb[99].mxu1 }
 0x531   :  { %v6783_v56 = vld [vmem:[%s10584_s4 + $0x100] sm:$0x33] }
 0x53d   :  { %v9834_v51 = vpop.f32.mrb[100].mxu1 }
 0x53e   :  { %v3752_v28 = vpop.f32.mrb[101].mxu1 }
 0x53f   :  { %v9836_v29 = vpop.f32.mrb[102].mxu1 }
 0x540   :  { %v3755_v0 = vpop.f32.mrb[103].mxu1 }
 0x54d   :  { %v9838_v54 = vpop.f32.mrb[104].mxu1 }
 0x54e   :  { %v3760_v10 = vpop.f32.mrb[105].mxu1 }
 0x54f   :  { %v9840_v55 = vpop.f32.mrb[106].mxu1  ;;  %v8241_v10 = vld [vmem:[%s10584_s4 + $0xf0] ss:$8 sps:$4 sm:$0xff]  }
 0x550   :  { %v3763_v43 = vpop.f32.mrb[107].mxu1 }
 0x551   :  { %v6795_v43 = vcombine.high %v6783_v56, %v6783_v56 }
 0x55d   :  { %v9842_v30 = vpop.f32.mrb[108].mxu1 }
 0x55e   :  { %v3768_v6 = vpop.f32.mrb[109].mxu1 }
 0x55f   :  { %v9844_v3 = vpop.f32.mrb[110].mxu1  ;;  %v6794_v6 = vcombine.low %v6783_v56, %v6783_v56 }
 0x560   :  { %v3771_v16 = vpop.f32.mrb[111].mxu1 }
 0x56d   :  { %v9846_v48 = vpop.f32.mrb[112].mxu1 }
 0x56e   :  { %v3776_v18 = vpop.f32.mrb[113].mxu1 }
 0x56f   :  { %v9848_v5 = vpop.f32.mrb[114].mxu1 }
 0x570   :  { %v3779_v37 = vpop.f32.mrb[115].mxu1 }
 0x571   :  { %v4447_v37 = vsel %vm4181_vm3, %v6794_v6, 0 }
 0x57d   :  { %v9850_v8 = vpop.f32.mrb[116].mxu1 }
 0x57e   :  { %v3784_v4 = vpop.f32.mrb[117].mxu1 }
 0x57f   :  { %v9852_v58 = vpop.f32.mrb[118].mxu1  ;;  %v8248_v4 = vld [vmem:[%s10584_s4 + $0x10c] ss:$8 sps:$4 sm:$0xff]  }
 0x580   :  { %v3787_v33 = vpop.f32.mrb[119].mxu1 }
 0x58d   :  { %v9854_v59 = vpop.f32.mrb[120].mxu1 }
 0x58e   :  { %v3792_v47 = vpop.f32.mrb[121].mxu1 }
 0x58f   :  { %v9856_v34 = vpop.f32.mrb[122].mxu1 }
 0x590   :  { %v3795_v53 = vpop.f32.mrb[123].mxu1 }
 0x595   :  { %v3919_v11 = vpop.f32.mrb[124].mxu1 }
 0x596   :  { %v4030_v20 = vmax.f32 %v9726_v7, %v3919_v11  ;;  %v3921_v25 = vpop.f32.mrb[125].mxu1  ;;  %v8232_v7 = vld [vmem:[%s10584_s4 + $0xc0] ss:$8 sps:$4 sm:$0xff]  }
 0x597   :  { %v3922_v26 = vpop.f32.mrb[126].mxu1 }
 0x598   :  { %v4031_v22 = vmax.f32 %v9728_v2, %v3922_v26  ;;  %v3924_v49 = vpop.f32.mrb[127].mxu1 }
 0x59a   :  { %v4058_v45 = vpack.c.bf16 %v4031_v22, %v4030_v20 }
 0x59c   :  { %6752 = vmatmul.mubr.msk.bf16.vlgmr.msra.gmra.mrb[180].mxu1 %vm4150_vm4, %v4058_v45 }
 0x59d   :  { %v3927_v19 = vpop.f32.mrb[128].mxu1  ;;  %4453 = vmatpush1.bf16.msra.mxu1 %v8229_v13  ;;  %4230 = vmatprep.mubr.bf16.mxu1 %v10616_v39 }
 0x59e   :  { %v4032_v2 = vmax.f32 %v9745_v50, %v3927_v19  ;;  %v3929_v12 = vpop.f32.mrb[129].mxu1  ;;  %4454 = vmatprep.subr.bf16.mxu1 %v8234_v40  ;;  %v8240_v50 = vld [vmem:[%s10584_s4 + $0xe4] ss:$8 sps:$4 sm:$0xff]  }
 0x59f   :  { %v3930_v1 = vpop.f32.mrb[130].mxu1 }
 0x5a0   :  { %v4033_v60 = vmax.f32 %v9747_v38, %v3930_v1  ;;  %v3932_v36 = vpop.f32.mrb[131].mxu1  ;;  %v8238_v38 = vld [vmem:[%s10584_s4 + $0xe0] ss:$8 sps:$4 sm:$0xff]  }
 0x5a1   :  { %4455 = vmatpush1.bf16.msra.mxu1 %v8232_v7 }
 0x5a2   :  { %v9879_v44 = vpack.c.bf16 %v4033_v60, %v4032_v2  ;;  %4456 = vmatprep.subr.bf16.mxu1 %v8237_v15 }
 0x5a4   :  { %6753 = vmatmul.mubr.msk.bf16.gmra.mrb[184].mxu1 %vm4150_vm4, %v9879_v44 }
 0x5a5   :  { %v3935_v41 = vpop.f32.mrb[132].mxu1  ;;  %4240 = vmatprep.mubr.bf16.mxu1 %v10616_v39  ;;  %4457 = vmatpush1.bf16.msra.mxu1 %v8235_v23 }
 0x5a6   :  { %v4034_v35 = vmax.f32 %v9761_v21, %v3935_v41  ;;  %v3937_v24 = vpop.f32.mrb[133].mxu1  ;;  %4458 = vmatprep.subr.bf16.mxu1 %v8240_v50 }
 0x5a7   :  { %v3938_v63 = vpop.f32.mrb[134].mxu1 }
 0x5a8   :  { %v4035_v28 = vmax.f32 %v9763_v9, %v3938_v63  ;;  %v3940_v0 = vpop.f32.mrb[135].mxu1 }
 0x5a9   :  { %4459 = vmatpush1.bf16.msra.mxu1 %v8238_v38 }
 0x5aa   :  { %v9901_v21 = vpack.c.bf16 %v4035_v28, %v4034_v35  ;;  %4460 = vmatprep.subr.bf16.mxu1 %v8243_v42 }
 0x5ac   :  { %6754 = vmatmul.mubr.msk.bf16.gmra.mrb[188].mxu1 %vm4150_vm4, %v9901_v21 }
 0x5ad   :  { %v3943_v16 = vpop.f32.mrb[136].mxu1  ;;  %4250 = vmatprep.mubr.bf16.mxu1 %v10616_v39  ;;  %4461 = vmatpush1.bf16.msra.mxu1 %v8241_v10 }
 0x5ae   :  { %v4036_v9 = vmax.f32 %v9777_v62, %v3943_v16  ;;  %v3945_v18 = vpop.f32.mrb[137].mxu1  ;;  %6796 = vmatprep.subr.msk.bf16.mxu1 %vm4181_vm3, %v6795_v43 }
 0x5af   :  { %v3946_v33 = vpop.f32.mrb[138].mxu1 }
 0x5b0   :  { %v4037_v47 = vmax.f32 %v9779_v31, %v3946_v33  ;;  %v3948_v53 = vpop.f32.mrb[139].mxu1 }
 0x5b1   :  { %4463 = vmatpush1.bf16.msra.mxu1 %v4447_v37 }
 0x5b2   :  { %v9913_v11 = vpack.c.bf16 %v4037_v47, %v4036_v9  ;;  %4701 = vmatprep.subr.bf16.mxu1 %v8248_v4  ;;  %v8251_v47 = vld [vmem:[%s10584_s4 + $0x11c] ss:$8 sps:$4 sm:$0xff]  }
 0x5b4   :  { %6755 = vmatmul.mubr.msk.bf16.gmra.mrb[192].mxu1 %vm4150_vm4, %v9913_v11 }
 0x5b5   :  { %v3951_v62 = vpop.f32.mrb[140].mxu1  ;;  %4260 = vmatprep.mubr.bf16.mxu1 %v10616_v39 }
 0x5b6   :  { %v4038_v20 = vmax.f32 %v9793_v14, %v3951_v62  ;;  %v3953_v25 = vpop.f32.mrb[141].mxu1 }
 0x5b7   :  { %v3954_v26 = vpop.f32.mrb[142].mxu1 }
 0x5b8   :  { %v4039_v22 = vmax.f32 %v9795_v46, %v3954_v26  ;;  %v3956_v49 = vpop.f32.mrb[143].mxu1 }
 0x5b9   :  { %v8252_v49 = vld [vmem:[%s10584_s4 + $0x128] ss:$8 sps:$4 sm:$0xff]  }
 0x5ba   :  { %v9920_v13 = vpack.c.bf16 %v4039_v22, %v4038_v20  ;;  %v8254_v20 = vld [vmem:[%s10584_s4 + $0x12c] ss:$8 sps:$4 sm:$0xff]  }
 0x5bc   :  { %6756 = vmatmul.mubr.msk.bf16.gmra.mrb[196].mxu1 %vm4150_vm4, %v9920_v13 }
 0x5bd   :  { %v3959_v31 = vpop.f32.mrb[144].mxu1  ;;  %4270 = vmatprep.mubr.bf16.mxu1 %v10616_v39 }
 0x5be   :  { %v4040_v45 = vmax.f32 %v9808_v27, %v3959_v31  ;;  %v3961_v40 = vpop.f32.mrb[145].mxu1 }
 0x5bf   :  { %v3962_v19 = vpop.f32.mrb[146].mxu1 }
 0x5c0   :  { %v4041_v7 = vmax.f32 %v9810_v61, %v3962_v19  ;;  %v3964_v14 = vpop.f32.mrb[147].mxu1 }
 0x5c2   :  { %v9927_v2 = vpack.c.bf16 %v4041_v7, %v4040_v45  ;;  %v8260_v7 = vld [vmem:[%s10584_s4 + $0x14c] ss:$8 sps:$4 sm:$0xff]  }
 0x5c4   :  { %6757 = vmatmul.mubr.msk.bf16.gmra.mrb[200].mxu1 %vm4150_vm4, %v9927_v2 }
 0x5c5   :  { %v3967_v46 = vpop.f32.mrb[148].mxu1  ;;  %4280 = vmatprep.mubr.bf16.mxu1 %v10616_v39 }
 0x5c6   :  { %v4042_v12 = vmax.f32 %v9821_v57, %v3967_v46  ;;  %v3969_v15 = vpop.f32.mrb[149].mxu1  ;;  %v6817_v46 = vld [vmem:[%s10584_s4 + $0x158] sm:$0x33] }
 0x5c7   :  { %v3970_v1 = vpop.f32.mrb[150].mxu1 }
 0x5c8   :  { %v4043_v60 = vmax.f32 %v9823_v32, %v3970_v1  ;;  %v3972_v27 = vpop.f32.mrb[151].mxu1  ;;  %v8258_v1 = vld [vmem:[%s10584_s4 + $0x148] ss:$8 sps:$4 sm:$0xff]  }
 0x5c9   :  { %v6828_v27 = vcombine.low %v6817_v46, %v6817_v46 }
 0x5ca   :  { %v9934_v36 = vpack.c.bf16 %v4043_v60, %v4042_v12  ;;  %v6829_v60 = vcombine.high %v6817_v46, %v6817_v46 }
 0x5cc   :  { %6758 = vmatmul.mubr.msk.bf16.gmra.mrb[204].mxu1 %vm4150_vm4, %v9934_v36 }
 0x5cd   :  { %v3975_v61 = vpop.f32.mrb[152].mxu1  ;;  %4290 = vmatprep.mubr.bf16.mxu1 %v10616_v39 }
 0x5ce   :  { %v4044_v23 = vmax.f32 %v9830_v52, %v3975_v61  ;;  %v3977_v50 = vpop.f32.mrb[153].mxu1 }
 0x5cf   :  { %v3978_v41 = vpop.f32.mrb[154].mxu1  ;;  %v4696_v50 = vsel %vm4181_vm3, %v6828_v27, 0 }
 0x5d0   :  { %v4045_v38 = vmax.f32 %v9832_v17, %v3978_v41  ;;  %v3980_v57 = vpop.f32.mrb[155].mxu1  ;;  %v8265_v41 = vld [vmem:[%s10584_s4 + $0x5c] ss:$8 sps:$4 sm:$0xff]  }
 0x5d2   :  { %v9941_v35 = vpack.c.bf16 %v4045_v38, %v4044_v23 }
 0x5d4   :  { %6759 = vmatmul.mubr.msk.bf16.gmra.mrb[208].mxu1 %vm4150_vm4, %v9941_v35 }
 0x5d5   :  { %v3983_v32 = vpop.f32.mrb[156].mxu1  ;;  %4300 = vmatprep.mubr.bf16.mxu1 %v10616_v39 }
 0x5d6   :  { %v4046_v24 = vmax.f32 %v9834_v51, %v3983_v32  ;;  %v3985_v42 = vpop.f32.mrb[157].mxu1 }
 0x5d7   :  { %v3986_v63 = vpop.f32.mrb[158].mxu1  ;;  %v8266_v42 = vld [vmem:[%s10584_s4 + $0x68] ss:$8 sps:$4 sm:$0xff]  }
 0x5d8   :  { %v4047_v56 = vmax.f32 %v9836_v29, %v3986_v63  ;;  %v3988_v52 = vpop.f32.mrb[159].mxu1  ;;  %v8271_v63 = vld [vmem:[%s10584_s4 + $0x7c] ss:$8 sps:$4 sm:$0xff]  }
 0x5d9   :  { %v8274_v52 = vld [vmem:[%s10584_s4 + $0x8c] ss:$8 sps:$4 sm:$0xff]  }
 0x5da   :  { %v9948_v28 = vpack.c.bf16 %v4047_v56, %v4046_v24  ;;  %v8269_v56 = vld [vmem:[%s10584_s4 + $0x78] ss:$8 sps:$4 sm:$0xff]  }
 0x5dc   :  { %6760 = vmatmul.mubr.msk.bf16.gmra.mrb[212].mxu1 %vm4150_vm4, %v9948_v28 }
 0x5dd   :  { %v3991_v17 = vpop.f32.mrb[160].mxu1  ;;  %4310 = vmatprep.mubr.bf16.mxu1 %v10616_v39 }
 0x5de   :  { %v4048_v0 = vmax.f32 %v9838_v54, %v3991_v17  ;;  %v3993_v10 = vpop.f32.mrb[161].mxu1  ;;  %v8272_v17 = vld [vmem:[%s10584_s4 + $0x88] ss:$8 sps:$4 sm:$0xff]  }
 0x5df   :  { %v3994_v43 = vpop.f32.mrb[162].mxu1  ;;  %v6772_v10 = vld [vmem:[%s10584_s4 + $0xa8] sm:$0x33] }
 0x5e0   :  { %v4049_v6 = vmax.f32 %v9840_v55, %v3994_v43  ;;  %v3996_v51 = vpop.f32.mrb[163].mxu1  ;;  %v8246_v55 = vld [vmem:[%s10584_s4 + $0x108] ss:$8 sps:$4 sm:$0xff]   ;;  %v8275_v43 = vld [vmem:[%s10584_s4 + $0x98] ss:$8 sps:$4 sm:$0xff]  }
 0x5e1   :  { %v6851_v51 = vcombine.low %v6772_v10, %v6772_v10 }
 0x5e2   :  { %v9955_v16 = vpack.c.bf16 %v4049_v6, %v4048_v0  ;;  %v8277_v0 = vld [vmem:[%s10584_s4 + $0x9c] ss:$8 sps:$4 sm:$0xff]   ;;  %v6852_v6 = vcombine.high %v6772_v10, %v6772_v10 }
 0x5e4   :  { %6761 = vmatmul.mubr.msk.bf16.gmra.mrb[216].mxu1 %vm4150_vm4, %v9955_v16 }
 0x5e5   :  { %v3999_v29 = vpop.f32.mrb[164].mxu1  ;;  %4484 = vmatprep.mubr.bf16.mxu1 %v10616_v39 }
 0x5e6   :  { %v4050_v9 = vmax.f32 %v9842_v30, %v3999_v29  ;;  %v4001_v18 = vpop.f32.mrb[165].mxu1  ;;  %v8249_v30 = vld [vmem:[%s10584_s4 + $0x118] ss:$8 sps:$4 sm:$0xff]   ;;  %v4890_v29 = vsel %vm4181_vm3, %v6851_v51, 0 }
 0x5e7   :  { %v4002_v37 = vpop.f32.mrb[166].mxu1  ;;  %v8280_v18 = vld [vmem:[%s10584_s4 + $0x160] ss:$8 sps:$4 sm:$0xff]  }
 0x5e8   :  { %v4051_v4 = vmax.f32 %v9844_v3, %v4002_v37  ;;  %v4004_v54 = vpop.f32.mrb[167].mxu1  ;;  %v8285_v37 = vld [vmem:[%s10584_s4 + $0x174] ss:$8 sps:$4 sm:$0xff]  }
 0x5e9   :  { %v8288_v54 = vld [vmem:[%s10584_s4 + $0x184] ss:$8 sps:$4 sm:$0xff]  }
 0x5ea   :  { %v9965_v33 = vpack.c.bf16 %v4051_v4, %v4050_v9  ;;  %v8282_v9 = vld [vmem:[%s10584_s4 + $0x164] ss:$8 sps:$4 sm:$0xff]   ;;  %v8283_v4 = vld [vmem:[%s10584_s4 + $0x170] ss:$8 sps:$4 sm:$0xff]  }
 0x5ec   :  { %6797 = vmatmul.mubr.msk.bf16.vlgmr.msra.gmra.mrb[180].mxu1 %vm4150_vm4, %v9901_v21 }
 0x5ed   :  { %v4007_v53 = vpop.f32.mrb[168].mxu1  ;;  %4702 = vmatpush1.bf16.msra.mxu1 %v8246_v55  ;;  %4494 = vmatprep.mubr.bf16.mxu1 %v10616_v39  ;;  %v8286_v55 = vld [vmem:[%s10584_s4 + $0x180] ss:$8 sps:$4 sm:$0xff]  }
 0x5ee   :  { %v4052_v3 = vmax.f32 %v9846_v48, %v4007_v53  ;;  %v4009_v62 = vpop.f32.mrb[169].mxu1  ;;  %4703 = vmatprep.subr.bf16.mxu1 %v8251_v47  ;;  %v8257_v48 = vld [vmem:[%s10584_s4 + $0x13c] ss:$8 sps:$4 sm:$0xff]   ;;  %v8289_v47 = vld [vmem:[%s10584_s4 + $0x190] ss:$8 sps:$4 sm:$0xff]  }
 0x5ef   :  { %v4010_v25 = vpop.f32.mrb[170].mxu1  ;;  %v8294_v53 = vld [vmem:[%s10584_s4 + $0x1a4] ss:$8 sps:$4 sm:$0xff]  }
 0x5f0   :  { %v4053_v26 = vmax.f32 %v9848_v5, %v4010_v25  ;;  %v4012_v22 = vpop.f32.mrb[171].mxu1  ;;  %v8255_v5 = vld [vmem:[%s10584_s4 + $0x138] ss:$8 sps:$4 sm:$0xff]   ;;  %v8298_v25 = vld [vmem:[%s10585_s6 + $0x8] sm:$0xff]  }
 0x5f1   :  { %4704 = vmatpush1.bf16.msra.mxu1 %v8249_v30  ;;  %v6874_v30 = vld [vmem:[%s10584_s4 + $0x1b0] sm:$0x33]  ;;  %v8301_v22 = vld [vmem:[%s10585_s6 + $0x20] sm:$0xff]  }
 0x5f2   :  { %v9984_v31 = vpack.c.bf16 %v4053_v26, %v4052_v3  ;;  %4705 = vmatprep.subr.bf16.mxu1 %v8254_v20  ;;  %v6886_v3 = vcombine.high %v6874_v30, %v6874_v30  ;;  %v6885_v62 = vcombine.low %v6874_v30, %v6874_v30  ;;  %v8299_v26 = vld [vmem:[%s10585_s6 + $0x10] sm:$0xff]  }
 0x5f4   :  { %6798 = vmatmul.mubr.msk.bf16.gmra.mrb[184].mxu1 %vm4150_vm4, %v9913_v11  ;;  %v5099_v20 = vsel %vm4181_vm3, %v6885_v62, 0  ;;  %v8309_v62 = vld [vmem:[%s10585_s6 + $0x60] sm:$0xff]  }
 0x5f5   :  { %v4015_v45 = vpop.f32.mrb[172].mxu1  ;;  %4504 = vmatprep.mubr.bf16.mxu1 %v10616_v39  ;;  %4706 = vmatpush1.bf16.msra.mxu1 %v8252_v49 }
 0x5f6   :  { %v4054_v40 = vmax.f32 %v9850_v8, %v4015_v45  ;;  %v4017_v19 = vpop.f32.mrb[173].mxu1  ;;  %4707 = vmatprep.subr.bf16.mxu1 %v8257_v48  ;;  %v10688_v45 = vld [vmem:[#allocation2_spill] sm:$0xff] }
 0x5f7   :  { %v4018_v14 = vpop.f32.mrb[174].mxu1 }
 0x5f8   :  { %v4055_v12 = vmax.f32 %v9852_v58, %v4018_v14  ;;  %v4020_v15 = vpop.f32.mrb[175].mxu1 }
 0x5f9   :  { %4708 = vmatpush1.bf16.msra.mxu1 %v8255_v5  ;;  %v10689_v5 = vsub.s32 0, %v10688_v45 }
 0x5fa   :  { %v10006_v8 = vpack.c.bf16 %v4055_v12, %v4054_v40  ;;  %4709 = vmatprep.subr.bf16.mxu1 %v8260_v7  ;;  %v10690_v7 = vsub.s32 1, %v10688_v45 }
 0x5fc   :  { %6799 = vmatmul.mubr.msk.bf16.gmra.mrb[188].mxu1 %vm4150_vm4, %v9920_v13 }
 0x5fd   :  { %v4023_v61 = vpop.f32.mrb[176].mxu1  ;;  %4514 = vmatprep.mubr.bf16.mxu1 %v10616_v39  ;;  %4710 = vmatpush1.bf16.msra.mxu1 %v8258_v1 }
 0x5fe   :  { %v4056_v58 = vmax.f32 %v9854_v59, %v4023_v61  ;;  %v4025_v23 = vpop.f32.mrb[177].mxu1  ;;  %6830 = vmatprep.subr.msk.bf16.mxu1 %vm4181_vm3, %v6829_v60  ;;  %v8263_v59 = vld [vmem:[%s10584_s4 + $0x58] ss:$8 sps:$4 sm:$0xff]  }
 0x5ff   :  { %v4026_v38 = vpop.f32.mrb[178].mxu1 }
 0x600   :  { %v4057_v57 = vmax.f32 %v9856_v34, %v4026_v38  ;;  %v4028_v32 = vpop.f32.mrb[179].mxu1  ;;  %v8268_v34 = vld [vmem:[%s10584_s4 + $0x6c] ss:$8 sps:$4 sm:$0xff]  }
 0x601   :  { %4712 = vmatpush1.bf16.msra.mxu1 %v4696_v50 }
 0x602   :  { %v10018_v24 = vpack.c.bf16 %v4057_v57, %v4056_v58  ;;  %4895 = vmatprep.subr.bf16.mxu1 %v8265_v41 }
 0x604   :  { %6800 = vmatmul.mubr.msk.bf16.gmra.mrb[192].mxu1 %vm4150_vm4, %v9927_v2 }
 0x605   :  { %4524 = vmatprep.mubr.bf16.mxu1 %v10616_v39 }
 0x60c   :  { %6801 = vmatmul.mubr.msk.bf16.gmra.mrb[196].mxu1 %vm4150_vm4, %v9934_v36 }
 0x60d   :  { %4534 = vmatprep.mubr.bf16.mxu1 %v10616_v39 }
 0x614   :  { %6802 = vmatmul.mubr.msk.bf16.gmra.mrb[200].mxu1 %vm4150_vm4, %v9941_v35 }
 0x615   :  { %4544 = vmatprep.mubr.bf16.mxu1 %v10616_v39 }
 0x61c   :  { %6803 = vmatmul.mubr.msk.bf16.gmra.mrb[204].mxu1 %vm4150_vm4, %v9948_v28 }
 0x61d   :  { %4554 = vmatprep.mubr.bf16.mxu1 %v10616_v39 }
 0x624   :  { %6804 = vmatmul.mubr.msk.bf16.gmra.mrb[208].mxu1 %vm4150_vm4, %v9955_v16 }
 0x625   :  { %4564 = vmatprep.mubr.bf16.mxu1 %v10616_v39 }
 0x62c   :  { %6805 = vmatmul.mubr.msk.bf16.gmra.mrb[212].mxu1 %vm4150_vm4, %v9965_v33 }
 0x62d   :  { %4574 = vmatprep.mubr.bf16.mxu1 %v10616_v39 }
 0x634   :  { %6806 = vmatmul.mubr.msk.bf16.gmra.mrb[216].mxu1 %vm4150_vm4, %v9984_v31 }
 0x635   :  { %4733 = vmatprep.mubr.bf16.mxu1 %v10616_v39 }
 0x63c   :  { %6831 = vmatmul.mubr.msk.bf16.vlgmr.msra.gmra.mrb[180].mxu1 %vm4150_vm4, %v9913_v11 }
 0x63d   :  { %4896 = vmatpush1.bf16.msra.mxu1 %v8263_v59  ;;  %4743 = vmatprep.mubr.bf16.mxu1 %v10616_v39 }
 0x63e   :  { %4897 = vmatprep.subr.bf16.mxu1 %v8268_v34 }
 0x641   :  { %4898 = vmatpush1.bf16.msra.mxu1 %v8266_v42 }
 0x642   :  { %4899 = vmatprep.subr.bf16.mxu1 %v8271_v63 }
 0x644   :  { %6832 = vmatmul.mubr.msk.bf16.gmra.mrb[184].mxu1 %vm4150_vm4, %v9920_v13 }
 0x645   :  { %4753 = vmatprep.mubr.bf16.mxu1 %v10616_v39  ;;  %4900 = vmatpush1.bf16.msra.mxu1 %v8269_v56 }
 0x646   :  { %4901 = vmatprep.subr.bf16.mxu1 %v8274_v52 }
 0x649   :  { %4902 = vmatpush1.bf16.msra.mxu1 %v8272_v17 }
 0x64a   :  { %4903 = vmatprep.subr.bf16.mxu1 %v8277_v0 }
 0x64c   :  { %6833 = vmatmul.mubr.msk.bf16.gmra.mrb[188].mxu1 %vm4150_vm4, %v9927_v2 }
 0x64d   :  { %4763 = vmatprep.mubr.bf16.mxu1 %v10616_v39  ;;  %4904 = vmatpush1.bf16.msra.mxu1 %v8275_v43 }
 0x64e   :  { %6853 = vmatprep.subr.msk.bf16.mxu1 %vm4181_vm3, %v6852_v6 }
 0x651   :  { %4906 = vmatpush1.bf16.msra.mxu1 %v4890_v29 }
 0x652   :  { %5104 = vmatprep.subr.bf16.mxu1 %v8282_v9  ;;  %v8307_v9 = vld [vmem:[%s10585_s6 + $0x50] sm:$0xff]  }
 0x654   :  { %6834 = vmatmul.mubr.msk.bf16.gmra.mrb[192].mxu1 %vm4150_vm4, %v9934_v36 }
 0x655   :  { %4773 = vmatprep.mubr.bf16.mxu1 %v10616_v39 }
 0x65c   :  { %6835 = vmatmul.mubr.msk.bf16.gmra.mrb[196].mxu1 %vm4150_vm4, %v9941_v35 }
 0x65d   :  { %4783 = vmatprep.mubr.bf16.mxu1 %v10616_v39 }
 0x664   :  { %6836 = vmatmul.mubr.msk.bf16.gmra.mrb[200].mxu1 %vm4150_vm4, %v9948_v28 }
 0x665   :  { %4793 = vmatprep.mubr.bf16.mxu1 %v10616_v39 }
 0x66c   :  { %6837 = vmatmul.mubr.msk.bf16.gmra.mrb[204].mxu1 %vm4150_vm4, %v9955_v16 }
 0x66d   :  { %4803 = vmatprep.mubr.bf16.mxu1 %v10616_v39 }
 0x674   :  { %6838 = vmatmul.mubr.msk.bf16.gmra.mrb[208].mxu1 %vm4150_vm4, %v9965_v33 }
 0x675   :  { %4813 = vmatprep.mubr.bf16.mxu1 %v10616_v39 }
 0x67c   :  { %6839 = vmatmul.mubr.msk.bf16.gmra.mrb[212].mxu1 %vm4150_vm4, %v9984_v31 }
 0x67d   :  { %4823 = vmatprep.mubr.bf16.mxu1 %v10616_v39 }
 0x684   :  { %6840 = vmatmul.mubr.msk.bf16.gmra.mrb[216].mxu1 %vm4150_vm4, %v10006_v8 }
 0x685   :  { %4927 = vmatprep.mubr.bf16.mxu1 %v10616_v39 }
 0x68c   :  { %6854 = vmatmul.mubr.msk.bf16.vlgmr.msra.gmra.mrb[180].mxu1 %vm4150_vm4, %v9879_v44  ;;  %v8291_v44 = vld [vmem:[%s10584_s4 + $0x194] ss:$8 sps:$4 sm:$0xff]  }
 0x68d   :  { %5105 = vmatpush1.bf16.msra.mxu1 %v8280_v18  ;;  %4937 = vmatprep.mubr.bf16.mxu1 %v10616_v39 }
 0x68e   :  { %5106 = vmatprep.subr.bf16.mxu1 %v8285_v37  ;;  %v8308_v37 = vld [vmem:[%s10585_s6 + $0x58] sm:$0xff]  }
 0x691   :  { %5107 = vmatpush1.bf16.msra.mxu1 %v8283_v4 }
 0x692   :  { %5108 = vmatprep.subr.bf16.mxu1 %v8288_v54 }
 0x694   :  { %6855 = vmatmul.mubr.msk.bf16.gmra.mrb[184].mxu1 %vm4150_vm4, %v9901_v21  ;;  %v8292_v21 = vld [vmem:[%s10584_s4 + $0x1a0] ss:$8 sps:$4 sm:$0xff]  }
 0x695   :  { %4947 = vmatprep.mubr.bf16.mxu1 %v10616_v39  ;;  %5109 = vmatpush1.bf16.msra.mxu1 %v8286_v55 }
 0x696   :  { %5110 = vmatprep.subr.bf16.mxu1 %v8291_v44 }
 0x699   :  { %5111 = vmatpush1.bf16.msra.mxu1 %v8289_v47 }
 0x69a   :  { %5112 = vmatprep.subr.bf16.mxu1 %v8294_v53 }
 0x69c   :  { %6856 = vmatmul.mubr.msk.bf16.gmra.mrb[188].mxu1 %vm4150_vm4, %v9913_v11  ;;  %v8297_v11 = vld [vmem:[%s10585_s6] sm:$0xff]  }
 0x69d   :  { %4957 = vmatprep.mubr.bf16.mxu1 %v10616_v39  ;;  %5113 = vmatpush1.bf16.msra.mxu1 %v8292_v21 }
 0x69e   :  { %6887 = vmatprep.subr.msk.bf16.mxu1 %vm4181_vm3, %v6886_v3 }
 0x6a1   :  { %5115 = vmatpush1.bf16.msra.mxu1 %v5099_v20 }
 0x6a2   :  { %5482 = vmatprep.subr.bf16.mxu1 %v10616_v39 }
 0x6a4   :  { %6857 = vmatmul.mubr.msk.bf16.gmra.mrb[192].mxu1 %vm4150_vm4, %v9920_v13 }
 0x6a5   :  { %4967 = vmatprep.mubr.bf16.mxu1 %v10616_v39 }
 0x6ac   :  { %6858 = vmatmul.mubr.msk.bf16.gmra.mrb[196].mxu1 %vm4150_vm4, %v9927_v2 }
 0x6ad   :  { %4977 = vmatprep.mubr.bf16.mxu1 %v10616_v39 }
 0x6b4   :  { %6859 = vmatmul.mubr.msk.bf16.gmra.mrb[200].mxu1 %vm4150_vm4, %v9934_v36 }
 0x6b5   :  { %4987 = vmatprep.mubr.bf16.mxu1 %v10616_v39 }
 0x6bc   :  { %6860 = vmatmul.mubr.msk.bf16.gmra.mrb[204].mxu1 %vm4150_vm4, %v9941_v35 }
 0x6bd   :  { %4997 = vmatprep.mubr.bf16.mxu1 %v10616_v39 }
 0x6c4   :  { %6861 = vmatmul.mubr.msk.bf16.gmra.mrb[208].mxu1 %vm4150_vm4, %v9948_v28 }
 0x6c5   :  { %5007 = vmatprep.mubr.bf16.mxu1 %v10616_v39 }
 0x6cc   :  { %6862 = vmatmul.mubr.msk.bf16.gmra.mrb[212].mxu1 %vm4150_vm4, %v9955_v16 }
 0x6cd   :  { %5017 = vmatprep.mubr.bf16.mxu1 %v10616_v39 }
 0x6d4   :  { %6863 = vmatmul.mubr.msk.bf16.gmra.mrb[216].mxu1 %vm4150_vm4, %v9965_v33 }
 0x6d5   :  { %5136 = vmatprep.mubr.bf16.mxu1 %v10616_v39 }
 0x6dc   :  { %6888 = vmatmul.mubr.msk.bf16.vlgmr.msra.gmra.mrb[180].mxu1 %vm4150_vm4, %v9920_v13  ;;  %v8300_v13 = vld [vmem:[%s10585_s6 + $0x18] sm:$0xff]  }
 0x6dd   :  { %5146 = vmatprep.mubr.bf16.mxu1 %v10616_v39  ;;  %5483 = vmatpush1.bf16.msra.mxu1 %v8297_v11 }
 0x6de   :  { %5484 = vmatprep.subr.bf16.mxu1 %v10616_v39 }
 0x6e1   :  { %5485 = vmatpush1.bf16.msra.mxu1 %v8298_v25 }
 0x6e2   :  { %5486 = vmatprep.subr.bf16.mxu1 %v10616_v39 }
 0x6e4   :  { %6889 = vmatmul.mubr.msk.bf16.gmra.mrb[184].mxu1 %vm4150_vm4, %v9927_v2  ;;  %v8302_v2 = vld [vmem:[%s10585_s6 + $0x28] sm:$0xff]  }
 0x6e5   :  { %5156 = vmatprep.mubr.bf16.mxu1 %v10616_v39  ;;  %5487 = vmatpush1.bf16.msra.mxu1 %v8299_v26 }
 0x6e6   :  { %5488 = vmatprep.subr.bf16.mxu1 %v10616_v39 }
 0x6e9   :  { %5489 = vmatpush1.bf16.msra.mxu1 %v8300_v13 }
 0x6ea   :  { %5490 = vmatprep.subr.bf16.mxu1 %v10616_v39 }
 0x6ec   :  { %6890 = vmatmul.mubr.msk.bf16.gmra.mrb[188].mxu1 %vm4150_vm4, %v9934_v36  ;;  %v8303_v36 = vld [vmem:[%s10585_s6 + $0x30] sm:$0xff]  }
 0x6ed   :  { %5166 = vmatprep.mubr.bf16.mxu1 %v10616_v39  ;;  %5491 = vmatpush1.bf16.msra.mxu1 %v8301_v22 }
 0x6ee   :  { %5492 = vmatprep.subr.bf16.mxu1 %v10616_v39 }
 0x6f1   :  { %5493 = vmatpush1.bf16.msra.mxu1 %v8302_v2 }
 0x6f2   :  { %5494 = vmatprep.subr.bf16.mxu1 %v10616_v39 }
 0x6f4   :  { %6891 = vmatmul.mubr.msk.bf16.gmra.mrb[192].mxu1 %vm4150_vm4, %v9941_v35  ;;  %v8304_v35 = vld [vmem:[%s10585_s6 + $0x38] sm:$0xff]  }
 0x6f5   :  { %5176 = vmatprep.mubr.bf16.mxu1 %v10616_v39  ;;  %5495 = vmatpush1.bf16.msra.mxu1 %v8303_v36 }
 0x6f6   :  { %5496 = vmatprep.subr.bf16.mxu1 %v10616_v39 }
 0x6f9   :  { %5497 = vmatpush1.bf16.msra.mxu1 %v8304_v35 }
 0x6fa   :  { %5498 = vmatprep.subr.bf16.mxu1 %v10616_v39 }
 0x6fc   :  { %6892 = vmatmul.mubr.msk.bf16.gmra.mrb[196].mxu1 %vm4150_vm4, %v9948_v28  ;;  %v8305_v28 = vld [vmem:[%s10585_s6 + $0x40] sm:$0xff]  }
 0x6fd   :  { %5186 = vmatprep.mubr.bf16.mxu1 %v10616_v39  ;;  %5499 = vmatpush1.bf16.msra.mxu1 %v8305_v28 }
 0x6fe   :  { %5500 = vmatprep.subr.bf16.mxu1 %v10616_v39 }
 0x704   :  { %6893 = vmatmul.mubr.msk.bf16.gmra.mrb[200].mxu1 %vm4150_vm4, %v9955_v16  ;;  %v8306_v16 = vld [vmem:[%s10585_s6 + $0x48] sm:$0xff]  }
 0x705   :  { %5196 = vmatprep.mubr.bf16.mxu1 %v10616_v39  ;;  %5501 = vmatpush1.bf16.msra.mxu1 %v8306_v16 }
 0x706   :  { %5636 = vmatprep.subr.bf16.mxu1 %v10616_v39 }
 0x70c   :  { %6894 = vmatmul.mubr.msk.bf16.gmra.mrb[204].mxu1 %vm4150_vm4, %v9965_v33  ;;  %v4072_v33 = vld [vmem:[%s10586_s5] sm:$0x3] }
 0x70d   :  { %5206 = vmatprep.mubr.bf16.mxu1 %v10616_v39  ;;  %v10243_v40 = vrot.slane %v4072_v33, %v10689_v5  ;;  %v10247_v14 = vrot.slane %v4072_v33, %v10690_v7 }
 0x714   :  { %6895 = vmatmul.mubr.msk.bf16.gmra.mrb[208].mxu1 %vm4150_vm4, %v9984_v31 }
 0x715   :  { %5216 = vmatprep.mubr.bf16.mxu1 %v10616_v39 }
 0x71c   :  { %6896 = vmatmul.mubr.msk.bf16.gmra.mrb[212].mxu1 %vm4150_vm4, %v10006_v8 }
 0x71d   :  { %5226 = vmatprep.mubr.bf16.mxu1 %v10616_v39 }
 0x724   :  { %6897 = vmatmul.mubr.msk.bf16.gmra.mrb[216].mxu1 %vm4150_vm4, %v10018_v24 }
 0x7af   :  { %v5138_v49 = vpop.f32.mrb[180].mxu1 }
 0x7b0   :  { %v5140_v31 = vpop.f32.mrb[181].mxu1  ;;  %v7446_v46 = vadd.f32 %v5138_v49, %v10243_v40 }
 0x7b1   :  { %v5142_v48 = vpop.f32.mrb[182].mxu1  ;;  %v7447_v12 = vadd.f32 %v5140_v31, %v10247_v14  ;;  %v8310_v31 = vld [vmem:[%s10585_s6 + $0x68] sm:$0xff]  }
 0x7b2   :  { %v5144_v19 = vpop.f32.mrb[183].mxu1  ;;  %v7448_v1 = vadd.f32 %v5142_v48, %v10243_v40  ;;  %v5317_v23 = vmax.f32 %v7446_v46, 0.0 }
 0x7b3   :  { %v7449_v27 = vadd.f32 %v5144_v19, %v10247_v14  ;;  %v5318_v57 = vmax.f32 %v7447_v12, 0.0 }
 0x7b4   :  { %v5319_v59 = vmax.f32 %v7448_v1, 0.0 }
 0x7b5   :  { %v5320_v63 = vmax.f32 %v7449_v27, 0.0 }
 0x7b7   :  { %v5148_v15 = vpop.f32.mrb[184].mxu1 }
 0x7b8   :  { %v7450_v8 = vadd.f32 %v5148_v15, %v10243_v40  ;;  %v5150_v60 = vpop.f32.mrb[185].mxu1  ;;  %v8311_v15 = vld [vmem:[%s10585_s6 + $0x70] sm:$0xff]  }
 0x7b9   :  { %v7451_v61 = vadd.f32 %v5150_v60, %v10247_v14  ;;  %v5152_v58 = vpop.f32.mrb[186].mxu1 }
 0x7ba   :  { %v5321_v50 = vmax.f32 %v7450_v8, 0.0  ;;  %v7452_v41 = vadd.f32 %v5152_v58, %v10243_v40  ;;  %v5154_v38 = vpop.f32.mrb[187].mxu1  ;;  %v8312_v8 = vld [vmem:[%s10585_s6 + $0x78] sm:$0xff]  }
 0x7bb   :  { %v5322_v32 = vmax.f32 %v7451_v61, 0.0  ;;  %v7453_v24 = vadd.f32 %v5154_v38, %v10247_v14 }
 0x7bc   :  { %v5357_v34 = vmax.f32 %v5317_v23, %v5321_v50  ;;  %v5323_v42 = vmax.f32 %v7452_v41, 0.0 }
 0x7bd   :  { %v5358_v56 = vmax.f32 %v5318_v57, %v5322_v32  ;;  %v5324_v52 = vmax.f32 %v7453_v24, 0.0  ;;  %v8313_v32 = vld [vmem:[%s10585_s6 + $0x80] sm:$0xff]  }
 0x7be   :  { %v5359_v17 = vmax.f32 %v5319_v59, %v5323_v42 }
 0x7bf   :  { %v5360_v0 = vmax.f32 %v5320_v63, %v5324_v52  ;;  %v5158_v10 = vpop.f32.mrb[188].mxu1 }
 0x7c0   :  { %v10257_v43 = vpack.c.bf16 %v5359_v17, %v5357_v34  ;;  %v5160_v6 = vpop.f32.mrb[189].mxu1  ;;  %v7454_v4 = vadd.f32 %v5158_v10, %v10243_v40 }
 0x7c1   :  { %v10259_v51 = vpack.c.bf16 %v5360_v0, %v5358_v56  ;;  %v5162_v29 = vpop.f32.mrb[190].mxu1  ;;  %v7455_v54 = vadd.f32 %v5160_v6, %v10247_v14 }
 0x7c2   :  { %v5164_v18 = vpop.f32.mrb[191].mxu1  ;;  %v7456_v44 = vadd.f32 %v5162_v29, %v10243_v40  ;;  %v5325_v20 = vmax.f32 %v7454_v4, 0.0 }
 0x7c3   :  { %6908 = vmatprep.mubr.msk.bf16.mxu1 %vm277_vm0, %v10259_v51  ;;  %v7457_v30 = vadd.f32 %v5164_v18, %v10247_v14  ;;  %v5326_v13 = vmax.f32 %v7455_v54, 0.0  ;;  %v8314_v18 = vld [vmem:[%s10585_s6 + $0x88] sm:$0xff]  }
 0x7c4   :  { %5515 = vmatmul.mubr.bf16.vlgmr.msra.gmra.mrb[220].mxu1 %v10257_v43  ;;  %v5327_v36 = vmax.f32 %v7456_v44, 0.0 }
 0x7c5   :  { %5637 = vmatpush1.bf16.msra.mxu1 %v8307_v9  ;;  %v5328_v16 = vmax.f32 %v7457_v30, 0.0  ;;  %v8315_v30 = vld [vmem:[%s10585_s6 + $0x90] sm:$0xff]  }
 0x7c6   :  { %5638 = vmatprep.subr.bf16.mxu1 %v10616_v39 }
 0x7c7   :  { %v5168_v55 = vpop.f32.mrb[192].mxu1 }
 0x7c8   :  { %v7458_v47 = vadd.f32 %v5168_v55, %v10243_v40  ;;  %v5170_v53 = vpop.f32.mrb[193].mxu1 }
 0x7c9   :  { %v7459_v21 = vadd.f32 %v5170_v53, %v10247_v14  ;;  %v5172_v3 = vpop.f32.mrb[194].mxu1  ;;  %5639 = vmatpush1.bf16.msra.mxu1 %v8308_v37 }
 0x7ca   :  { %v5329_v11 = vmax.f32 %v7458_v47, 0.0  ;;  %v7460_v25 = vadd.f32 %v5172_v3, %v10243_v40  ;;  %v5174_v26 = vpop.f32.mrb[195].mxu1  ;;  %5640 = vmatprep.subr.bf16.mxu1 %v10616_v39  ;;  %v8316_v3 = vld [vmem:[%s10585_s6 + $0x98] sm:$0xff]  }
 0x7cb   :  { %v5330_v22 = vmax.f32 %v7459_v21, 0.0  ;;  %v7461_v2 = vadd.f32 %v5174_v26, %v10247_v14 }
 0x7cc   :  { %v5361_v35 = vmax.f32 %v5325_v20, %v5329_v11  ;;  %v5331_v28 = vmax.f32 %v7460_v25, 0.0 }
 0x7cd   :  { %v5362_v33 = vmax.f32 %v5326_v13, %v5330_v22  ;;  %v5332_v49 = vmax.f32 %v7461_v2, 0.0  ;;  %5641 = vmatpush1.bf16.msra.mxu1 %v8309_v62 }
 0x7ce   :  { %v5363_v48 = vmax.f32 %v5327_v36, %v5331_v28  ;;  %5642 = vmatprep.subr.bf16.mxu1 %v10616_v39 }
 0x7cf   :  { %v5364_v45 = vmax.f32 %v5328_v16, %v5332_v49  ;;  %v5178_v5 = vpop.f32.mrb[196].mxu1 }
 0x7d0   :  { %v5180_v19 = vpop.f32.mrb[197].mxu1  ;;  %v10287_v7 = vpack.c.bf16 %v5363_v48, %v5361_v35  ;;  %v7462_v60 = vadd.f32 %v5178_v5, %v10243_v40 }
 0x7d1   :  { %v10289_v46 = vpack.c.bf16 %v5364_v45, %v5362_v33  ;;  %v5182_v12 = vpop.f32.mrb[198].mxu1  ;;  %5643 = vmatpush1.bf16.msra.mxu1 %v8310_v31  ;;  %v7463_v27 = vadd.f32 %v5180_v19, %v10247_v14 }
 0x7d2   :  { %v5184_v1 = vpop.f32.mrb[199].mxu1  ;;  %5644 = vmatprep.subr.bf16.mxu1 %v10616_v39  ;;  %v7464_v58 = vadd.f32 %v5182_v12, %v10243_v40  ;;  %v5333_v24 = vmax.f32 %v7462_v60, 0.0 }
 0x7d3   :  { %6909 = vmatprep.mubr.msk.bf16.mxu1 %vm277_vm0, %v10289_v46  ;;  %v7465_v41 = vadd.f32 %v5184_v1, %v10247_v14  ;;  %v5334_v63 = vmax.f32 %v7463_v27, 0.0 }
 0x7d4   :  { %5523 = vmatmul.mubr.bf16.gmra.mrb[224].mxu1 %v10287_v7  ;;  %v5335_v17 = vmax.f32 %v7464_v58, 0.0 }
 0x7d5   :  { %5645 = vmatpush1.bf16.msra.mxu1 %v8311_v15  ;;  %v5336_v6 = vmax.f32 %v7465_v41, 0.0 }
 0x7d6   :  { %5646 = vmatprep.subr.bf16.mxu1 %v10616_v39 }
 0x7d7   :  { %v5188_v61 = vpop.f32.mrb[200].mxu1 }
 0x7d8   :  { %v7466_v23 = vadd.f32 %v5188_v61, %v10243_v40  ;;  %v5190_v50 = vpop.f32.mrb[201].mxu1 }
 0x7d9   :  { %v7467_v38 = vadd.f32 %v5190_v50, %v10247_v14  ;;  %v5192_v57 = vpop.f32.mrb[202].mxu1  ;;  %5647 = vmatpush1.bf16.msra.mxu1 %v8312_v8 }
 0x7da   :  { %v5337_v59 = vmax.f32 %v7466_v23, 0.0  ;;  %v7468_v34 = vadd.f32 %v5192_v57, %v10243_v40  ;;  %v5194_v42 = vpop.f32.mrb[203].mxu1  ;;  %5648 = vmatprep.subr.bf16.mxu1 %v10616_v39 }
 0x7db   :  { %v5338_v56 = vmax.f32 %v7467_v38, 0.0  ;;  %v7469_v52 = vadd.f32 %v5194_v42, %v10247_v14 }
 0x7dc   :  { %v5365_v0 = vmax.f32 %v5333_v24, %v5337_v59  ;;  %v5339_v10 = vmax.f32 %v7468_v34, 0.0 }
 0x7dd   :  { %v5366_v29 = vmax.f32 %v5334_v63, %v5338_v56  ;;  %v5340_v9 = vmax.f32 %v7469_v52, 0.0  ;;  %5649 = vmatpush1.bf16.msra.mxu1 %v8313_v32 }
 0x7de   :  { %v5367_v37 = vmax.f32 %v5335_v17, %v5339_v10  ;;  %5650 = vmatprep.subr.bf16.mxu1 %v10616_v39 }
 0x7df   :  { %v5368_v4 = vmax.f32 %v5336_v6, %v5340_v9  ;;  %v5198_v54 = vpop.f32.mrb[204].mxu1 }
 0x7e0   :  { %v5200_v55 = vpop.f32.mrb[205].mxu1  ;;  %v10318_v44 = vpack.c.bf16 %v5367_v37, %v5365_v0  ;;  %v7470_v62 = vadd.f32 %v5198_v54, %v10243_v40 }
 0x7e1   :  { %v10320_v47 = vpack.c.bf16 %v5368_v4, %v5366_v29  ;;  %v5202_v53 = vpop.f32.mrb[206].mxu1  ;;  %5651 = vmatpush1.bf16.msra.mxu1 %v8314_v18  ;;  %v7471_v20 = vadd.f32 %v5200_v55, %v10247_v14 }
 0x7e2   :  { %v5204_v21 = vpop.f32.mrb[207].mxu1  ;;  %5652 = vmatprep.subr.bf16.mxu1 %v10616_v39  ;;  %v7472_v25 = vadd.f32 %v5202_v53, %v10243_v40  ;;  %v5341_v35 = vmax.f32 %v7470_v62, 0.0 }
 0x7e3   :  { %6910 = vmatprep.mubr.msk.bf16.mxu1 %vm277_vm0, %v10320_v47  ;;  %v7473_v22 = vadd.f32 %v5204_v21, %v10247_v14 }
 0x7e4   :  { %5531 = vmatmul.mubr.bf16.gmra.mrb[228].mxu1 %v10318_v44  ;;  %v5343_v48 = vmax.f32 %v7472_v25, 0.0 }
 0x7e5   :  { %5653 = vmatpush1.bf16.msra.mxu1 %v8315_v30  ;;  %v5344_v19 = vmax.f32 %v7473_v22, 0.0 }
 0x7e6   :  { %5654 = vmatprep.subr.bf16.mxu1 %v10616_v39  ;;  %v5342_v39 = vmax.f32 %v7471_v20, 0.0 }
 0x7e7   :  { %v5208_v11 = vpop.f32.mrb[208].mxu1 }
 0x7e8   :  { %v7474_v26 = vadd.f32 %v5208_v11, %v10243_v40  ;;  %v5210_v13 = vpop.f32.mrb[209].mxu1 }
 0x7e9   :  { %v7475_v2 = vadd.f32 %v5210_v13, %v10247_v14  ;;  %v5212_v36 = vpop.f32.mrb[210].mxu1  ;;  %5655 = vmatpush1.bf16.msra.mxu1 %v8316_v3 }
 0x7ea   :  { %v5345_v28 = vmax.f32 %v7474_v26, 0.0  ;;  %v7476_v16 = vadd.f32 %v5212_v36, %v10243_v40  ;;  %v5214_v33 = vpop.f32.mrb[211].mxu1 }
 0x7eb   :  { %v5346_v49 = vmax.f32 %v7475_v2, 0.0  ;;  %v7477_v31 = vadd.f32 %v5214_v33, %v10247_v14 }
 0x7ec   :  { %v5369_v45 = vmax.f32 %v5341_v35, %v5345_v28  ;;  %v5347_v5 = vmax.f32 %v7476_v16, 0.0 }
 0x7ed   :  { %v5370_v12 = vmax.f32 %v5342_v39, %v5346_v49  ;;  %v5348_v15 = vmax.f32 %v7477_v31, 0.0 }
 0x7ee   :  { %v5371_v1 = vmax.f32 %v5343_v48, %v5347_v5 }
 0x7ef   :  { %v5372_v8 = vmax.f32 %v5344_v19, %v5348_v15  ;;  %v5218_v60 = vpop.f32.mrb[212].mxu1 }
 0x7f0   :  { %v7478_v27 = vadd.f32 %v5218_v60, %v10243_v40  ;;  %v5220_v61 = vpop.f32.mrb[213].mxu1  ;;  %v5383_v58 = vpack.c.bf16 %v5371_v1, %v5369_v45  ;;  %v8322_v60 = vld [vmem:[%s10587_s7 + $0x28] sm:$0xff]  }
 0x7f1   :  { %v5384_v23 = vpack.c.bf16 %v5372_v8, %v5370_v12  ;;  %v7479_v50 = vadd.f32 %v5220_v61, %v10247_v14  ;;  %v5222_v41 = vpop.f32.mrb[214].mxu1 }
 0x7f2   :  { %v7480_v38 = vadd.f32 %v5222_v41, %v10243_v40  ;;  %v5224_v57 = vpop.f32.mrb[215].mxu1  ;;  %v5349_v56 = vmax.f32 %v7478_v27, 0.0 }
 0x7f3   :  { %v7481_v32 = vadd.f32 %v5224_v57, %v10247_v14  ;;  %6911 = vmatprep.mubr.msk.bf16.mxu1 %vm277_vm0, %v5384_v23  ;;  %v5350_v10 = vmax.f32 %v7479_v50, 0.0 }
 0x7f4   :  { %5539 = vmatmul.mubr.bf16.gmra.mrb[232].mxu1 %v5383_v58  ;;  %v5351_v9 = vmax.f32 %v7480_v38, 0.0 }
 0x7f5   :  { %v5352_v4 = vmax.f32 %v7481_v32, 0.0  ;;  %v8324_v32 = vld [vmem:[%s10587_s7 + $0x38] sm:$0xff]  }
 0x7f7   :  { %v5228_v24 = vpop.f32.mrb[216].mxu1 }
 0x7f8   :  { %v7482_v59 = vadd.f32 %v5228_v24, %v10243_v40  ;;  %v5230_v34 = vpop.f32.mrb[217].mxu1 }
 0x7f9   :  { %v7483_v42 = vadd.f32 %v5230_v34, %v10247_v14  ;;  %v5232_v63 = vpop.f32.mrb[218].mxu1  ;;  %v8325_v34 = vld [vmem:[%s10587_s7 + $0x40] sm:$0xff]  }
 0x7fa   :  { %v5353_v52 = vmax.f32 %v7482_v59, 0.0  ;;  %v7484_v17 = vadd.f32 %v5232_v63, %v10243_v40  ;;  %v5234_v0 = vpop.f32.mrb[219].mxu1  ;;  %v8343_v40 = vmov 0.0  }
 0x7fb   :  { %v5354_v6 = vmax.f32 %v7483_v42, 0.0  ;;  %v7485_v29 = vadd.f32 %v5234_v0, %v10247_v14  ;;  %7086 = vmatprep.subr.bf16.mxu1 %v8343_v40  ;;  %v8317_v14 = vld [vmem:[%s10587_s7] sm:$0xff]   ;;  %v8326_v0 = vld [vmem:[%s10587_s7 + $0x48] sm:$0xff]  }
 0x7fc   :  { %v5373_v18 = vmax.f32 %v5349_v56, %v5353_v52  ;;  %v5355_v37 = vmax.f32 %v7484_v17, 0.0 }
 0x7fd   :  { %v5374_v54 = vmax.f32 %v5350_v10, %v5354_v6  ;;  %v5356_v55 = vmax.f32 %v7485_v29, 0.0  ;;  %v8327_v29 = vld [vmem:[%s10587_s7 + $0x50] sm:$0xff]  }
 0x7fe   :  { %v5375_v53 = vmax.f32 %v5351_v9, %v5355_v37 }
 0x7ff   :  { %v5376_v30 = vmax.f32 %v5352_v4, %v5356_v55  ;;  %v8328_v55 = vld [vmem:[%s10587_s7 + $0x58] sm:$0xff]  }
 0x800   :  { %v5385_v21 = vpack.c.bf16 %v5375_v53, %v5373_v18 }
 0x801   :  { %v5386_v3 = vpack.c.bf16 %v5376_v30, %v5374_v54 }
 0x803   :  { %6912 = vmatprep.mubr.msk.bf16.mxu1 %vm277_vm0, %v5386_v3 }
 0x804   :  { %5547 = vmatmul.mubr.bf16.gmra.mrb[236].mxu1 %v5385_v21 }
 0x805   :  { %6943 = vmatprep.mubr.msk.bf16.mxu1 %vm277_vm0, %v10259_v51  ;;  %v8319_v51 = vld [vmem:[%s10587_s7 + $0x10] sm:$0xff]  }
 0x80c   :  { %5669 = vmatmul.mubr.bf16.vlgmr.msra.gmra.mrb[240].mxu1 %v10257_v43  ;;  %v8318_v43 = vld [vmem:[%s10587_s7 + $0x8] sm:$0xff]  }
 0x80d   :  { %6944 = vmatprep.mubr.msk.bf16.mxu1 %vm277_vm0, %v10289_v46  ;;  %7087 = vmatpush3.bf16.msra.mxu1 %v8317_v14  ;;  %v8321_v46 = vld [vmem:[%s10587_s7 + $0x20] sm:$0xff]  }
 0x80e   :  { %7088 = vmatprep.subr.bf16.mxu1 %v8343_v40 }
 0x811   :  { %7089 = vmatpush3.bf16.msra.mxu1 %v8318_v43 }
 0x812   :  { %7090 = vmatprep.subr.bf16.mxu1 %v8343_v40 }
 0x814   :  { %5677 = vmatmul.mubr.bf16.gmra.mrb[244].mxu1 %v10287_v7  ;;  %v8320_v7 = vld [vmem:[%s10587_s7 + $0x18] sm:$0xff]  }
 0x815   :  { %6945 = vmatprep.mubr.msk.bf16.mxu1 %vm277_vm0, %v10320_v47  ;;  %7091 = vmatpush3.bf16.msra.mxu1 %v8319_v51 }
 0x816   :  { %7092 = vmatprep.subr.bf16.mxu1 %v8343_v40 }
 0x819   :  { %7093 = vmatpush3.bf16.msra.mxu1 %v8320_v7 }
 0x81a   :  { %7094 = vmatprep.subr.bf16.mxu1 %v8343_v40 }
 0x81c   :  { %5685 = vmatmul.mubr.bf16.gmra.mrb[248].mxu1 %v10318_v44 }
 0x81d   :  { %6946 = vmatprep.mubr.msk.bf16.mxu1 %vm277_vm0, %v5384_v23  ;;  %7095 = vmatpush3.bf16.msra.mxu1 %v8321_v46  ;;  %v8330_v46 = vld [vmem:[%s10587_s7 + $0x68] sm:$0xff]  }
 0x81e   :  { %7100 = vmatprep.subr.bf16.mxu1 %v8343_v40 }
 0x824   :  { %5693 = vmatmul.mubr.bf16.gmra.mrb[252].mxu1 %v5383_v58  ;;  %v8323_v58 = vld [vmem:[%s10587_s7 + $0x30] sm:$0xff]  }
 0x825   :  { %6947 = vmatprep.mubr.msk.bf16.mxu1 %vm277_vm0, %v5386_v3 }
 0x82c   :  { %5701 = vmatmul.mubr.bf16.gmra.mrb[0].mxu1 %v5385_v21  ;;  %v8329_v21 = vld [vmem:[%s10587_s7 + $0x60] sm:$0xff]  }
 0x82d   :  { %7096 = vmatprep.mubr.msk.bf16.mxu1 %vm8344_vm5, %v8343_v40 }
 0x897   :  { %v5516_v44 = vpop.f32.mrb[220].mxu1 }
 0x898   :  { %v5518_v47 = vpop.f32.mrb[221].mxu1 }
 0x899   :  { %v5519_v62 = vpop.f32.mrb[222].mxu1  ;;  %v8331_v47 = vld [vmem:[%s10587_s7 + $0x70] sm:$0xff]  }
 0x89a   :  { %v5521_v20 = vpop.f32.mrb[223].mxu1 }
 0x89b   :  { %v8333_v20 = vld [vmem:[%s10587_s7 + $0x80] sm:$0xff]  }
 0x8a7   :  { %v5524_v11 = vpop.f32.mrb[224].mxu1 }
 0x8a8   :  { %v5526_v25 = vpop.f32.mrb[225].mxu1 }
 0x8a9   :  { %v5527_v26 = vpop.f32.mrb[226].mxu1  ;;  %v8335_v25 = vld [vmem:[%s10587_s7 + $0x90] sm:$0xff]  }
 0x8aa   :  { %v5529_v13 = vpop.f32.mrb[227].mxu1 }
 0x8ab   :  { %v8337_v13 = vld [vmem:[%s10587_s7 + $0xa0] sm:$0xff]  }
 0x8b7   :  { %v5532_v22 = vpop.f32.mrb[228].mxu1 }
 0x8b8   :  { %v5534_v2 = vpop.f32.mrb[229].mxu1 }
 0x8b9   :  { %v5535_v36 = vpop.f32.mrb[230].mxu1  ;;  %v8339_v2 = vld [vmem:[%s10587_s7 + $0xb0] sm:$0xff]  }
 0x8ba   :  { %v5537_v35 = vpop.f32.mrb[231].mxu1 }
 0x8bb   :  { %v6166_v35 = vld [vmem:[%s10588_s9] sm:$0xff] }
 0x8c7   :  { %v5540_v28 = vpop.f32.mrb[232].mxu1 }
 0x8c8   :  { %v5542_v16 = vpop.f32.mrb[233].mxu1 }
 0x8c9   :  { %v5543_v33 = vpop.f32.mrb[234].mxu1  ;;  %v8341_v16 = vld [vmem:[%s10587_s7 + $0xc0] sm:$0xff]  }
 0x8ca   :  { %v5545_v39 = vpop.f32.mrb[235].mxu1 }
 0x8cb   :  { %v6168_v39 = vld [vmem:[%s10588_s9 + $0x10] sm:$0xff] }
 0x8d7   :  { %v10385_v49 = vpop.f32.mrb[236].mxu1 }
 0x8d8   :  { %v5550_v31 = vpop.f32.mrb[237].mxu1 }
 0x8d9   :  { %v10387_v48 = vpop.f32.mrb[238].mxu1 }
 0x8da   :  { %v5553_v45 = vpop.f32.mrb[239].mxu1 }
 0x8df   :  { %v5670_v5 = vpop.f32.mrb[240].mxu1 }
 0x8e0   :  { %v5709_v19 = vmax.f32 %v5516_v44, %v5670_v5  ;;  %v5672_v12 = vpop.f32.mrb[241].mxu1  ;;  %v6172_v5 = vld [vmem:[%s10588_s9 + $0x30] sm:$0xff] }
 0x8e1   :  { %v5673_v15 = vpop.f32.mrb[242].mxu1 }
 0x8e2   :  { %v5710_v1 = vmax.f32 %v5519_v62, %v5673_v15  ;;  %v5675_v8 = vpop.f32.mrb[243].mxu1  ;;  %v8332_v62 = vld [vmem:[%s10587_s7 + $0x78] sm:$0xff]   ;;  %v6174_v15 = vld [vmem:[%s10588_s9 + $0x40] sm:$0xff] }
 0x8e4   :  { %v5719_v27 = vpack.c.bf16 %v5710_v1, %v5709_v19  ;;  %v6173_v19 = vld [vmem:[%s10588_s9 + $0x38] sm:$0xff]  ;;  %v6175_v1 = vld [vmem:[%s10588_s9 + $0x48] sm:$0xff] }
 0x8e5   :  { %v7226_v12 = vpack.c.bf16 %v6173_v19, %v6172_v5  ;;  %v7230_v8 = vpack.c.bf16 %v6175_v1, %v6174_v15 }
 0x8e6   :  { %7097 = vmatmul.mubr.msk.bf16.vlgmr.msra.gmra.mrb[4].mxu1 %vm5771_vm6, %v5719_v27  ;;  %v6177_v27 = vld [vmem:[%s10588_s9 + $0x58] sm:$0xff] }
 0x8e7   :  { %7101 = vmatpush3.bf16.msra.mxu1 %v8322_v60  ;;  %v5678_v61 = vpop.f32.mrb[244].mxu1  ;;  %7110 = vmatprep.mubr.msk.bf16.mxu1 %vm8344_vm5, %v8343_v40  ;;  %v6176_v60 = vld [vmem:[%s10588_s9 + $0x50] sm:$0xff] }
 0x8e8   :  { %v5711_v23 = vmax.f32 %v5524_v11, %v5678_v61  ;;  %v5680_v50 = vpop.f32.mrb[245].mxu1  ;;  %7102 = vmatprep.subr.bf16.mxu1 %v8343_v40  ;;  %v8334_v11 = vld [vmem:[%s10587_s7 + $0x88] sm:$0xff]   ;;  %v7234_v61 = vpack.c.bf16 %v6177_v27, %v6176_v60 }
 0x8e9   :  { %v5681_v41 = vpop.f32.mrb[246].mxu1 }
 0x8ea   :  { %v5712_v38 = vmax.f32 %v5527_v26, %v5681_v41  ;;  %v5683_v57 = vpop.f32.mrb[247].mxu1  ;;  %v8336_v26 = vld [vmem:[%s10587_s7 + $0x98] sm:$0xff]   ;;  %v6180_v41 = vld [vmem:[%s10588_s9 + $0x70] sm:$0xff] }
 0x8eb   :  { %7103 = vmatpush3.bf16.msra.mxu1 %v8323_v58  ;;  %v6178_v58 = vld [vmem:[%s10588_s9 + $0x60] sm:$0xff]  ;;  %v6271_v57 = vld [vmem:[%s10589_s11 + $0x8] sm:$0xff] }
 0x8ec   :  { %v5720_v24 = vpack.c.bf16 %v5712_v38, %v5711_v23  ;;  %7104 = vmatprep.subr.bf16.mxu1 %v8343_v40  ;;  %v6179_v23 = vld [vmem:[%s10588_s9 + $0x68] sm:$0xff]  ;;  %v6270_v38 = vld [vmem:[%s10589_s11] sm:$0xff] }
 0x8ed   :  { %v7238_v50 = vpack.c.bf16 %v6179_v23, %v6178_v58 }
 0x8ef   :  { %7105 = vmatpush3.bf16.msra.mxu1 %v8324_v32  ;;  %v5686_v59 = vpop.f32.mrb[248].mxu1  ;;  %v7242_v32 = vpack.c.bf16 %v6271_v57, %v6270_v38 }
 0x8f0   :  { %v5713_v42 = vmax.f32 %v5532_v22, %v5686_v59  ;;  %v5688_v63 = vpop.f32.mrb[249].mxu1  ;;  %7106 = vmatprep.subr.bf16.mxu1 %v8343_v40  ;;  %v8338_v22 = vld [vmem:[%s10587_s7 + $0xa8] sm:$0xff]  }
 0x8f1   :  { %v5689_v56 = vpop.f32.mrb[250].mxu1 }
 0x8f2   :  { %v5714_v52 = vmax.f32 %v5535_v36, %v5689_v56  ;;  %v5691_v17 = vpop.f32.mrb[251].mxu1  ;;  %v8340_v36 = vld [vmem:[%s10587_s7 + $0xb8] sm:$0xff]  }
 0x8f3   :  { %7107 = vmatpush3.bf16.msra.mxu1 %v8325_v34  ;;  %v6272_v34 = vld [vmem:[%s10589_s11 + $0x10] sm:$0xff] }
 0x8f4   :  { %v5721_v10 = vpack.c.bf16 %v5714_v52, %v5713_v42  ;;  %7108 = vmatprep.subr.bf16.mxu1 %v8343_v40  ;;  %v6273_v42 = vld [vmem:[%s10589_s11 + $0x18] sm:$0xff] }
 0x8f7   :  { %7109 = vmatpush3.bf16.msra.mxu1 %v8326_v0  ;;  %v5694_v6 = vpop.f32.mrb[252].mxu1 }
 0x8f8   :  { %v5715_v9 = vmax.f32 %v5540_v28, %v5694_v6  ;;  %v5696_v18 = vpop.f32.mrb[253].mxu1  ;;  %7114 = vmatprep.subr.bf16.mxu1 %v8343_v40  ;;  %v6167_v28 = vld [vmem:[%s10588_s9 + $0x8] sm:$0xff]  ;;  %v6274_v6 = vld [vmem:[%s10589_s11 + $0x20] sm:$0xff] }
 0x8f9   :  { %v5697_v37 = vpop.f32.mrb[254].mxu1  ;;  %v6276_v18 = vld [vmem:[%s10589_s11 + $0x30] sm:$0xff] }
 0x8fa   :  { %v5716_v4 = vmax.f32 %v5543_v33, %v5697_v37  ;;  %7111 = vmatmul.mubr.msk.bf16.vlgmr.msra.gmra.mrb[4].mxu1 %vm5771_vm6, %v5720_v24  ;;  %v5699_v54 = vpop.f32.mrb[255].mxu1  ;;  %v7214_v33 = vpack.c.bf16 %v6167_v28, %v6166_v35  ;;  %v6948_v24 = vld [vmem:[%s10590_s8] ss:$0 sm:$0xff]  ;;  %v6277_v37 = vld [vmem:[%s10589_s11 + $0x38] sm:$0xff] }
 0x8fb   :  { %7115 = vmatpush3.bf16.msra.mxu1 %v8327_v29  ;;  %7124 = vmatprep.mubr.msk.bf16.mxu1 %vm8344_vm5, %v8343_v40  ;;  %v6275_v29 = vld [vmem:[%s10589_s11 + $0x28] sm:$0xff]  ;;  %v6278_v54 = vld [vmem:[%s10589_s11 + $0x40] sm:$0xff] }
 0x8fc   :  { %v5722_v53 = vpack.c.bf16 %v5716_v4, %v5715_v9  ;;  %7116 = vmatprep.subr.bf16.mxu1 %v8343_v40  ;;  %v7250_v9 = vpack.c.bf16 %v6275_v29, %v6274_v6  ;;  %v7254_v4 = vpack.c.bf16 %v6277_v37, %v6276_v18 }
 0x8ff   :  { %7117 = vmatpush3.bf16.msra.mxu1 %v8328_v55  ;;  %v5702_v30 = vpop.f32.mrb[0].mxu1  ;;  %v6279_v55 = vld [vmem:[%s10589_s11 + $0x48] sm:$0xff] }
 0x900   :  { %v5717_v3 = vmax.f32 %v10385_v49, %v5702_v30  ;;  %v5704_v14 = vpop.f32.mrb[1].mxu1  ;;  %7118 = vmatprep.subr.bf16.mxu1 %v8343_v40  ;;  %v6169_v49 = vld [vmem:[%s10588_s9 + $0x18] sm:$0xff]  ;;  %v6280_v30 = vld [vmem:[%s10589_s11 + $0x50] sm:$0xf] }
 0x901   :  { %v5705_v43 = vpop.f32.mrb[2].mxu1  ;;  %v7218_v31 = vpack.c.bf16 %v6169_v49, %v6168_v39 }
 0x902   :  { %v5718_v51 = vmax.f32 %v10387_v48, %v5705_v43  ;;  %v5707_v7 = vpop.f32.mrb[3].mxu1  ;;  %v6170_v48 = vld [vmem:[%s10588_s9 + $0x20] sm:$0xff] }
 0x903   :  { %7119 = vmatpush3.bf16.msra.mxu1 %v8329_v21  ;;  %v7019_v21 = vld [vmem:[%s10591_s10] ss:$0 sm:$0xff] }
 0x904   :  { %v5723_v44 = vpack.c.bf16 %v5718_v51, %v5717_v3  ;;  %7120 = vmatprep.subr.bf16.mxu1 %v8343_v40  ;;  %v7022_v7 = vld [vmem:[%s10592_s12] ss:$0 sm:$0xff] }
 0x907   :  { %7121 = vmatpush3.bf16.msra.mxu1 %v8330_v46 }
 0x908   :  { %7122 = vmatprep.subr.bf16.mxu1 %v8343_v40 }
 0x90b   :  { %7123 = vmatpush3.bf16.msra.mxu1 %v8331_v47 }
 0x90c   :  { %7128 = vmatprep.subr.bf16.mxu1 %v8343_v40 }
 0x90e   :  { %7125 = vmatmul.mubr.msk.bf16.vlgmr.msra.gmra.mrb[4].mxu1 %vm5771_vm6, %v5721_v10  ;;  %v7246_v10 = vpack.c.bf16 %v6273_v42, %v6272_v34 }
 0x90f   :  { %7129 = vmatpush3.bf16.msra.mxu1 %v8332_v62  ;;  %7138 = vmatprep.mubr.msk.bf16.mxu1 %vm8344_vm5, %v8343_v40 }
 0x910   :  { %7130 = vmatprep.subr.bf16.mxu1 %v8343_v40 }
 0x913   :  { %7131 = vmatpush3.bf16.msra.mxu1 %v8333_v20 }
 0x914   :  { %7132 = vmatprep.subr.bf16.mxu1 %v8343_v40 }
 0x917   :  { %7133 = vmatpush3.bf16.msra.mxu1 %v8334_v11 }
 0x918   :  { %7134 = vmatprep.subr.bf16.mxu1 %v8343_v40 }
 0x91b   :  { %7135 = vmatpush3.bf16.msra.mxu1 %v8335_v25 }
 0x91c   :  { %7136 = vmatprep.subr.bf16.mxu1 %v8343_v40 }
 0x91f   :  { %7137 = vmatpush3.bf16.msra.mxu1 %v8336_v26 }
 0x920   :  { %7142 = vmatprep.subr.bf16.mxu1 %v8343_v40 }
 0x922   :  { %7139 = vmatmul.mubr.msk.bf16.vlgmr.msra.gmra.mrb[4].mxu1 %vm5771_vm6, %v5722_v53  ;;  %v7258_v53 = vpack.c.bf16 %v6279_v55, %v6278_v54 }
 0x923   :  { %7143 = vmatpush3.bf16.msra.mxu1 %v8337_v13  ;;  %7152 = vmatprep.mubr.msk.bf16.mxu1 %vm8344_vm5, %v8343_v40 }
 0x924   :  { %7144 = vmatprep.subr.bf16.mxu1 %v8343_v40 }
 0x927   :  { %7145 = vmatpush3.bf16.msra.mxu1 %v8338_v22 }
 0x928   :  { %7146 = vmatprep.subr.bf16.mxu1 %v8343_v40 }
 0x92b   :  { %7147 = vmatpush3.bf16.msra.mxu1 %v8339_v2 }
 0x92c   :  { %7148 = vmatprep.subr.bf16.mxu1 %v8343_v40 }
 0x92f   :  { %7149 = vmatpush3.bf16.msra.mxu1 %v8340_v36 }
 0x930   :  { %7150 = vmatprep.subr.bf16.mxu1 %v8343_v40  ;;  %v6171_v40 = vld [vmem:[%s10588_s9 + $0x28] sm:$0xff] }
 0x931   :  { %v7222_v45 = vpack.c.bf16 %v6171_v40, %v6170_v48 }
 0x933   :  { %7151 = vmatpush3.bf16.msra.mxu1 %v8341_v16 }
 0x934   :  { %7215 = vmatprep.subr.bf16.mxu1 %v7214_v33 }
 0x936   :  { %7153 = vmatmul.mubr.msk.bf16.vlgmr.msra.gmra.mrb[4].mxu1 %vm5771_vm6, %v5723_v44 }
 0x937   :  { %7217 = vmatpush3.bf16.msra.mxu1 %v7214_v33 }
 0x938   :  { %7219 = vmatprep.subr.bf16.mxu1 %v7218_v31 }
 0x93b   :  { %7221 = vmatpush3.bf16.msra.mxu1 %v7218_v31 }
 0x93c   :  { %7223 = vmatprep.subr.bf16.mxu1 %v7222_v45 }
 0x93f   :  { %7225 = vmatpush3.bf16.msra.mxu1 %v7222_v45 }
 0x940   :  { %7227 = vmatprep.subr.bf16.mxu1 %v7226_v12 }
 0x943   :  { %7229 = vmatpush3.bf16.msra.mxu1 %v7226_v12 }
 0x944   :  { %7231 = vmatprep.subr.bf16.mxu1 %v7230_v8 }
 0x947   :  { %7233 = vmatpush3.bf16.msra.mxu1 %v7230_v8 }
 0x948   :  { %7235 = vmatprep.subr.bf16.mxu1 %v7234_v61 }
 0x94b   :  { %7237 = vmatpush3.bf16.msra.mxu1 %v7234_v61 }
 0x94c   :  { %7239 = vmatprep.subr.bf16.mxu1 %v7238_v50 }
 0x94f   :  { %7241 = vmatpush3.bf16.msra.mxu1 %v7238_v50 }
 0x950   :  { %7184 = vmatprep.subr.mxu1 %v6180_v41 }
 0x953   :  { %7185 = vmatpush3.msra.mxu1 %v6180_v41 }
 0x954   :  { %7243 = vmatprep.subr.bf16.mxu1 %v7242_v32 }
 0xa09   :  { %v6157_v59 = vpop.f32.mrb[4].mxu1 }
 0xa0a   :  { %v7486_v63 = vadd.f32 %v6948_v24, %v6157_v59  ;;  %v7154_v56 = vpop.f32.mrb[5].mxu1 }
 0xa0b   :  { %v6160_v52 = vpop.f32.mrb[6].mxu1 }
 0xa0c   :  { %v7487_v17 = vadd.f32 %v6948_v24, %v6160_v52  ;;  %v7155_v0 = vpop.f32.mrb[7].mxu1  ;;  %7186 = vmatprep.mubr.msk.f32.mxu1 %vm6188_vm7, %v7486_v63 }
 0xa0e   :  { %7187 = vmatmul.mubr.msk.f32.vlgmr.msra.gmra.mrb[8].mxu1 %vm6188_vm7, %v7487_v17 }
 0xa0f   :  { %7245 = vmatpush3.bf16.msra.mxu1 %v7242_v32 }
 0xa10   :  { %7247 = vmatprep.subr.bf16.mxu1 %v7246_v10 }
 0xa13   :  { %7249 = vmatpush3.bf16.msra.mxu1 %v7246_v10 }
 0xa14   :  { %7251 = vmatprep.subr.bf16.mxu1 %v7250_v9 }
 0xa17   :  { %7253 = vmatpush3.bf16.msra.mxu1 %v7250_v9 }
 0xa18   :  { %7255 = vmatprep.subr.bf16.mxu1 %v7254_v4 }
 0xa1b   :  { %7257 = vmatpush3.bf16.msra.mxu1 %v7254_v4 }
 0xa1c   :  { %7259 = vmatprep.subr.bf16.mxu1 %v7258_v53 }
 0xa1f   :  { %7261 = vmatpush3.bf16.msra.mxu1 %v7258_v53 }
 0xa20   :  { %7209 = vmatprep.subr.msk.mxu1 %vm3648_vm1, %v6280_v30 }
 0xa23   :  { %7210 = vmatpush3.msk.msra.mxu1 %vm3648_vm1, %v6280_v30 }
 0xae1   :  { %v7188_v3 = vpop.f32.mrb[8].mxu1 }
 0xae2   :  { %v6261_v14 = vpop.f32.mrb[9].mxu1  ;;  %v6267_v51 = vadd.f32 %v7188_v3, %v7019_v21 }
 0xae3   :  { %v6262_v43 = vadd.f32 %v7019_v21, %v6261_v14 }
 0xae5   :  { %7211 = vmatprep.mubr.msk.f32.mxu1 %vm4150_vm4, %v6262_v43 }
 0xae6   :  { %7212 = vmatmul.mubr.msk.f32.vlgmr.msra.gmra.mrb[10].mxu1 %vm4150_vm4, %v6267_v51 }
 0xbb9   :  { %v7213_v46 = vpop.f32.mrb[10].mxu1 }
 0xbba   :  { %v6369_v44 = vadd.f32 %v7213_v46, %v7022_v7  ;;  %v6363_v47 = vpop.f32.mrb[11].mxu1 }
 0xbbb   :  { %v6364_v62 = vadd.f32 %v7022_v7, %v6363_v47 }
 0xbbc   :  { %6374 = vst.msk [vmem:[%s10593_s13 + $0x8] sm:$0xff] %vm6372_vm8, %v6369_v44 }
 0xbbd   :  { %6373 = vst.msk [vmem:[%s10593_s13] sm:$0xff] %vm6372_vm8, %v6364_v62 }

</bundles_post_ra>
